<compile_context>
chip_gen: v7x
topology: tpu7x:2x2x1
jax: 0.10.0
libtpu: 0.0.40
codegen_flags: <defaults>
</compile_context>

<pallas_src>
import functools

import jax
import jax.numpy as jnp
from jax.experimental import pallas as pl
from jax.experimental.pallas import tpu as pltpu


_INV_SQRT2 = 0.7071067811865476


def _erf_approx(x):
    # Abramowitz & Stegun 7.1.26 rational approximation, |err| < 1.5e-7
    # (float32-level).  Built only from ops with guaranteed Mosaic lowerings
    # (abs / exp / where / mul / add / div) so it compiles inside the kernel.
    p = 0.3275911
    a1, a2, a3, a4, a5 = (0.254829592, -0.284496736, 1.421413741,
                          -1.453152027, 1.061405429)
    ax = jnp.abs(x)
    t = 1.0 / (1.0 + p * ax)
    poly = ((((a5 * t + a4) * t + a3) * t + a2) * t + a1) * t
    y = 1.0 - poly * jnp.exp(-ax * ax)
    return jnp.where(x >= 0, y, -y)


def _gelu_exact(x):
    # erf-based GELU (matches torch.nn.GELU() default, not the tanh approx).
    return 0.5 * x * (1.0 + _erf_approx(x * _INV_SQRT2))


def _cnn_observer_kernel(u_ref, w1_ref, b1_ref, w2_ref, b2_ref, y_ref, *,
                         taps1, taps2):
    """Single-invocation CNNObserver kernel.

    u_ref : (B, 3w-1, F)  padded-input frames feeding the last conv2 output
    w1_ref: (w, F, H)     conv1 weight, tap-major
    b1_ref: (1, H)
    w2_ref: (2w, H, O)    conv2 weight, tap-major
    b2_ref: (1, O)
    y_ref : (B, O)
    """
    B = u_ref.shape[0]
    H = w1_ref.shape[2]

    for b in range(B):                               # static unroll, B is tiny
        u_b = u_ref[b]                               # (3w-1, F)

        # Conv1 restricted to the 2w positions inside conv2's last receptive
        # field: one (2w, F) @ (F, H) matmul per tap, accumulated in f32.
        acc = jnp.zeros((taps2, H), jnp.float32)
        for k in range(taps1):
            acc = acc + jnp.dot(u_b[k:k + taps2, :], w1_ref[k],
                                precision=jax.lax.Precision.HIGHEST,
                                preferred_element_type=jnp.float32)
        h = _gelu_exact(acc + b1_ref[...])           # (2w, H)

        # Conv2, last output position only: tap-wise (1, H) @ (H, O) matmuls.
        y_b = b2_ref[...].astype(jnp.float32)        # (1, O)
        for t in range(taps2):
            y_b = y_b + jnp.dot(h[t:t + 1, :], w2_ref[t],
                                precision=jax.lax.Precision.HIGHEST,
                                preferred_element_type=jnp.float32)

        y_ref[b:b + 1, :] = jnp.tanh(y_b).astype(y_ref.dtype)


def cnn_observer_forward(u, params, *, scan_window):
    """u: (B, T, in_features) -> (B, 1, out_features); matches CNNObserver.forward."""
    B, T, F = u.shape
    w = scan_window
    pad = w // 2
    stride = w // 4
    k2 = 2 * w
    H = params["w1"].shape[0]
    O = params["w2"].shape[0]

    L1 = T + 2 * pad - w + 1                 # conv1 output length
    L2 = (L1 - k2) // stride + 1             # conv2 output length
    assert L2 >= 1, "sequence too short for this scan_window"
    s0 = (L2 - 1) * stride                   # first conv1 position of the last conv2 window
    lwin = k2 + w - 1                        # padded-input frames needed

    u_pad = jnp.pad(u.astype(jnp.float32), ((0, 0), (pad, pad), (0, 0)))
    u_win = u_pad[:, s0:s0 + lwin, :]        # (B, lwin, F)

    # Layout plumbing only (no compute hoisted): tap-major weights so the
    # kernel never concatenates along the lane dim.
    w1_kfh = jnp.transpose(params["w1"], (2, 1, 0)).astype(jnp.float32)   # (w, F, H)
    w2_tho = jnp.transpose(params["w2"], (2, 1, 0)).astype(jnp.float32)   # (2w, H, O)
    b1 = params["b1"].reshape(1, H).astype(jnp.float32)
    b2 = params["b2"].reshape(1, O).astype(jnp.float32)

    kernel = functools.partial(_cnn_observer_kernel, taps1=w, taps2=k2)

    y2d = pl.pallas_call(
        kernel,
        out_shape=jax.ShapeDtypeStruct((B, O), jnp.float32),
        grid=(1,),
        in_specs=[
            pl.BlockSpec((B, lwin, F), lambda i: (0, 0, 0)),
            pl.BlockSpec((w, F, H), lambda i: (0, 0, 0)),
            pl.BlockSpec((1, H), lambda i: (0, 0)),
            pl.BlockSpec((k2, H, O), lambda i: (0, 0, 0)),
            pl.BlockSpec((1, O), lambda i: (0, 0)),
        ],
        out_specs=pl.BlockSpec((B, O), lambda i: (0, 0)),
        compiler_params=pltpu.CompilerParams(dimension_semantics=("arbitrary",)),
    )(u_win, w1_kfh, b1, w2_tho, b2)

    return y2d[:, None, :]                   # (B, 1, O)


def init_params(key, in_features, out_features, hidden_channels, scan_window):
    """PyTorch Conv1d default init: U(-1/sqrt(fan_in), 1/sqrt(fan_in))."""
    k1w, k1b, k2w, k2b = jax.random.split(key, 4)
    w = scan_window
    bound1 = 1.0 / float(in_features * w) ** 0.5
    w1 = jax.random.uniform(k1w, (hidden_channels, in_features, w),
                            jnp.float32, -bound1, bound1)
    b1 = jax.random.uniform(k1b, (hidden_channels,), jnp.float32, -bound1, bound1)
    bound2 = 1.0 / float(hidden_channels * 2 * w) ** 0.5
    w2 = jax.random.uniform(k2w, (out_features, hidden_channels, 2 * w),
                            jnp.float32, -bound2, bound2)
    b2 = jax.random.uniform(k2b, (out_features,), jnp.float32, -bound2, bound2)
    return dict(w1=w1, b1=b1, w2=w2, b2=b2)


def _conv1d_ref(x, w, b, *, stride, padding):
    """PyTorch Conv1d semantics (cross-correlation). x:(B,Cin,L), w:(Cout,Cin,K)."""
    _, _, L = x.shape
    _, _, K = w.shape
    xp = jnp.pad(x, ((0, 0), (0, 0), (padding, padding)))
    Lout = (L + 2 * padding - K) // stride + 1
    idx = jnp.arange(Lout)[:, None] * stride + jnp.arange(K)[None, :]   # (Lout, K)
    xw = xp[:, :, idx]                                                   # (B, Cin, Lout, K)
    return jnp.einsum('bclk,ock->bol', xw, w,
                      precision=jax.lax.Precision.HIGHEST) + b[None, :, None]


def reference_forward(u, params, *, scan_window):
    """Pure-JAX reference of the full PyTorch forward (conv->gelu->conv->last->tanh)."""
    w = scan_window
    x = jnp.transpose(u, (0, 2, 1))                           # (B, F, T)
    h = _conv1d_ref(x, params["w1"], params["b1"], stride=1, padding=w // 2)
    h = jax.nn.gelu(h, approximate=False)                     # exact (erf) GELU
    y = _conv1d_ref(h, params["w2"], params["b2"], stride=w // 4, padding=0)
    y = jnp.transpose(y, (0, 2, 1))                           # (B, L2, O)
    return jnp.tanh(y[:, -1:, :])                             # (B, 1, O)


if __name__ == "__main__":
    B, T = 2, 64
    IN_FEATURES, OUT_FEATURES = 4, 8
    HIDDEN_CHANNELS, SCAN_WINDOW = 32, 8

    key = jax.random.PRNGKey(0)
    k_params, k_u = jax.random.split(key)
    params = init_params(k_params, IN_FEATURES, OUT_FEATURES,
                         HIDDEN_CHANNELS, SCAN_WINDOW)
    u = jax.random.normal(k_u, (B, T, IN_FEATURES), jnp.float32)

    y = jax.block_until_ready(cnn_observer_forward(u, params, scan_window=SCAN_WINDOW))
    y_ref = jax.block_until_ready(reference_forward(u, params, scan_window=SCAN_WINDOW))

    assert y.shape == (B, 1, OUT_FEATURES), y.shape
    max_diff = float(jnp.max(jnp.abs(y - y_ref)))
    assert jnp.allclose(y, y_ref, atol=5e-4, rtol=5e-4), f"max abs diff {max_diff}"
    print("KERNEL_OK")
</pallas_src>

<mosaic_0001>
module attributes {stable_mosaic.version = 11 : i64} {
  func.func @_cnn_observer_kernel(%arg0: i32, %arg1: memref<2x23x4xf32, #tpu.memory_space<vmem>>, %arg2: memref<8x4x32xf32, #tpu.memory_space<vmem>>, %arg3: memref<1x32xf32, #tpu.memory_space<vmem>>, %arg4: memref<16x32x8xf32, #tpu.memory_space<vmem>>, %arg5: memref<1x8xf32, #tpu.memory_space<vmem>>, %arg6: memref<2x8xf32, #tpu.memory_space<vmem>>) attributes {dimension_semantics = [#tpu.dimension_semantics<arbitrary>], iteration_bounds = array<i64: 1>, scalar_prefetch = 0 : i64, scratch_operands = 0 : i64, tpu.core_type = #tpu.core_type<tc>, window_params = [{pipeline_mode = #tpu.pipeline_mode<synchronous>, transform_indices = @transform_0, window_bounds = array<i64: 2, 23, 4>}, {pipeline_mode = #tpu.pipeline_mode<synchronous>, transform_indices = @transform_1, window_bounds = array<i64: 8, 4, 32>}, {pipeline_mode = #tpu.pipeline_mode<synchronous>, transform_indices = @transform_2, window_bounds = array<i64: 1, 32>}, {pipeline_mode = #tpu.pipeline_mode<synchronous>, transform_indices = @transform_3, window_bounds = array<i64: 16, 32, 8>}, {pipeline_mode = #tpu.pipeline_mode<synchronous>, transform_indices = @transform_4, window_bounds = array<i64: 1, 8>}, {pipeline_mode = #tpu.pipeline_mode<synchronous>, transform_indices = @transform_5, window_bounds = array<i64: 2, 8>}]} {
    %c0 = arith.constant 0 : index
    %c0_0 = arith.constant 0 : index
    %c0_1 = arith.constant 0 : index
    %0 = vector.load %arg1[%c0, %c0_0, %c0_1] : memref<2x23x4xf32, #tpu.memory_space<vmem>>, vector<1x23x4xf32>
    %1 = vector.shape_cast %0 : vector<1x23x4xf32> to vector<23x4xf32>
    %cst = arith.constant 0.000000e+00 : f32
    %2 = vector.broadcast %cst : f32 to vector<16x32xf32>
    %3 = vector.extract_strided_slice %1 {offsets = [0, 0], sizes = [16, 4], strides = [1, 1]} : vector<23x4xf32> to vector<16x4xf32>
    %c0_2 = arith.constant 0 : index
    %c0_3 = arith.constant 0 : index
    %c0_4 = arith.constant 0 : index
    %4 = vector.load %arg2[%c0_2, %c0_3, %c0_4] : memref<8x4x32xf32, #tpu.memory_space<vmem>>, vector<1x4x32xf32>
    %5 = vector.shape_cast %4 : vector<1x4x32xf32> to vector<4x32xf32>
    %cst_5 = arith.constant dense<0.000000e+00> : vector<16x32xf32>
    %6 = tpu.matmul %3, %5, %cst_5 {dimension_numbers = #tpu.dot_dimension_numbers<[1], [0], [0], [1], [0, 0, 1, 1], [], []>, precision = #tpu.contract_precision<fp32>} : vector<16x4xf32>, vector<4x32xf32>, vector<16x32xf32> -> vector<16x32xf32>
    %7 = arith.addf %2, %6 : vector<16x32xf32>
    %8 = vector.extract_strided_slice %1 {offsets = [1, 0], sizes = [16, 4], strides = [1, 1]} : vector<23x4xf32> to vector<16x4xf32>
    %c1 = arith.constant 1 : index
    %c0_6 = arith.constant 0 : index
    %c0_7 = arith.constant 0 : index
    %9 = vector.load %arg2[%c1, %c0_6, %c0_7] : memref<8x4x32xf32, #tpu.memory_space<vmem>>, vector<1x4x32xf32>
    %10 = vector.shape_cast %9 : vector<1x4x32xf32> to vector<4x32xf32>
    %cst_8 = arith.constant dense<0.000000e+00> : vector<16x32xf32>
    %11 = tpu.matmul %8, %10, %cst_8 {dimension_numbers = #tpu.dot_dimension_numbers<[1], [0], [0], [1], [0, 0, 1, 1], [], []>, precision = #tpu.contract_precision<fp32>} : vector<16x4xf32>, vector<4x32xf32>, vector<16x32xf32> -> vector<16x32xf32>
    %12 = arith.addf %7, %11 : vector<16x32xf32>
    %13 = vector.extract_strided_slice %1 {offsets = [2, 0], sizes = [16, 4], strides = [1, 1]} : vector<23x4xf32> to vector<16x4xf32>
    %c2 = arith.constant 2 : index
    %c0_9 = arith.constant 0 : index
    %c0_10 = arith.constant 0 : index
    %14 = vector.load %arg2[%c2, %c0_9, %c0_10] : memref<8x4x32xf32, #tpu.memory_space<vmem>>, vector<1x4x32xf32>
    %15 = vector.shape_cast %14 : vector<1x4x32xf32> to vector<4x32xf32>
    %cst_11 = arith.constant dense<0.000000e+00> : vector<16x32xf32>
    %16 = tpu.matmul %13, %15, %cst_11 {dimension_numbers = #tpu.dot_dimension_numbers<[1], [0], [0], [1], [0, 0, 1, 1], [], []>, precision = #tpu.contract_precision<fp32>} : vector<16x4xf32>, vector<4x32xf32>, vector<16x32xf32> -> vector<16x32xf32>
    %17 = arith.addf %12, %16 : vector<16x32xf32>
    %18 = vector.extract_strided_slice %1 {offsets = [3, 0], sizes = [16, 4], strides = [1, 1]} : vector<23x4xf32> to vector<16x4xf32>
    %c3 = arith.constant 3 : index
    %c0_12 = arith.constant 0 : index
    %c0_13 = arith.constant 0 : index
    %19 = vector.load %arg2[%c3, %c0_12, %c0_13] : memref<8x4x32xf32, #tpu.memory_space<vmem>>, vector<1x4x32xf32>
    %20 = vector.shape_cast %19 : vector<1x4x32xf32> to vector<4x32xf32>
    %cst_14 = arith.constant dense<0.000000e+00> : vector<16x32xf32>
    %21 = tpu.matmul %18, %20, %cst_14 {dimension_numbers = #tpu.dot_dimension_numbers<[1], [0], [0], [1], [0, 0, 1, 1], [], []>, precision = #tpu.contract_precision<fp32>} : vector<16x4xf32>, vector<4x32xf32>, vector<16x32xf32> -> vector<16x32xf32>
    %22 = arith.addf %17, %21 : vector<16x32xf32>
    %23 = vector.extract_strided_slice %1 {offsets = [4, 0], sizes = [16, 4], strides = [1, 1]} : vector<23x4xf32> to vector<16x4xf32>
    %c4 = arith.constant 4 : index
    %c0_15 = arith.constant 0 : index
    %c0_16 = arith.constant 0 : index
    %24 = vector.load %arg2[%c4, %c0_15, %c0_16] : memref<8x4x32xf32, #tpu.memory_space<vmem>>, vector<1x4x32xf32>
    %25 = vector.shape_cast %24 : vector<1x4x32xf32> to vector<4x32xf32>
    %cst_17 = arith.constant dense<0.000000e+00> : vector<16x32xf32>
    %26 = tpu.matmul %23, %25, %cst_17 {dimension_numbers = #tpu.dot_dimension_numbers<[1], [0], [0], [1], [0, 0, 1, 1], [], []>, precision = #tpu.contract_precision<fp32>} : vector<16x4xf32>, vector<4x32xf32>, vector<16x32xf32> -> vector<16x32xf32>
    %27 = arith.addf %22, %26 : vector<16x32xf32>
    %28 = vector.extract_strided_slice %1 {offsets = [5, 0], sizes = [16, 4], strides = [1, 1]} : vector<23x4xf32> to vector<16x4xf32>
    %c5 = arith.constant 5 : index
    %c0_18 = arith.constant 0 : index
    %c0_19 = arith.constant 0 : index
    %29 = vector.load %arg2[%c5, %c0_18, %c0_19] : memref<8x4x32xf32, #tpu.memory_space<vmem>>, vector<1x4x32xf32>
    %30 = vector.shape_cast %29 : vector<1x4x32xf32> to vector<4x32xf32>
    %cst_20 = arith.constant dense<0.000000e+00> : vector<16x32xf32>
    %31 = tpu.matmul %28, %30, %cst_20 {dimension_numbers = #tpu.dot_dimension_numbers<[1], [0], [0], [1], [0, 0, 1, 1], [], []>, precision = #tpu.contract_precision<fp32>} : vector<16x4xf32>, vector<4x32xf32>, vector<16x32xf32> -> vector<16x32xf32>
    %32 = arith.addf %27, %31 : vector<16x32xf32>
    %33 = vector.extract_strided_slice %1 {offsets = [6, 0], sizes = [16, 4], strides = [1, 1]} : vector<23x4xf32> to vector<16x4xf32>
    %c6 = arith.constant 6 : index
    %c0_21 = arith.constant 0 : index
    %c0_22 = arith.constant 0 : index
    %34 = vector.load %arg2[%c6, %c0_21, %c0_22] : memref<8x4x32xf32, #tpu.memory_space<vmem>>, vector<1x4x32xf32>
    %35 = vector.shape_cast %34 : vector<1x4x32xf32> to vector<4x32xf32>
    %cst_23 = arith.constant dense<0.000000e+00> : vector<16x32xf32>
    %36 = tpu.matmul %33, %35, %cst_23 {dimension_numbers = #tpu.dot_dimension_numbers<[1], [0], [0], [1], [0, 0, 1, 1], [], []>, precision = #tpu.contract_precision<fp32>} : vector<16x4xf32>, vector<4x32xf32>, vector<16x32xf32> -> vector<16x32xf32>
    %37 = arith.addf %32, %36 : vector<16x32xf32>
    %38 = vector.extract_strided_slice %1 {offsets = [7, 0], sizes = [16, 4], strides = [1, 1]} : vector<23x4xf32> to vector<16x4xf32>
    %c7 = arith.constant 7 : index
    %c0_24 = arith.constant 0 : index
    %c0_25 = arith.constant 0 : index
    %39 = vector.load %arg2[%c7, %c0_24, %c0_25] : memref<8x4x32xf32, #tpu.memory_space<vmem>>, vector<1x4x32xf32>
    %40 = vector.shape_cast %39 : vector<1x4x32xf32> to vector<4x32xf32>
    %cst_26 = arith.constant dense<0.000000e+00> : vector<16x32xf32>
    %41 = tpu.matmul %38, %40, %cst_26 {dimension_numbers = #tpu.dot_dimension_numbers<[1], [0], [0], [1], [0, 0, 1, 1], [], []>, precision = #tpu.contract_precision<fp32>} : vector<16x4xf32>, vector<4x32xf32>, vector<16x32xf32> -> vector<16x32xf32>
    %42 = arith.addf %37, %41 : vector<16x32xf32>
    %c0_27 = arith.constant 0 : index
    %c0_28 = arith.constant 0 : index
    %43 = vector.load %arg3[%c0_27, %c0_28] : memref<1x32xf32, #tpu.memory_space<vmem>>, vector<1x32xf32>
    %44 = vector.broadcast %43 : vector<1x32xf32> to vector<16x32xf32>
    %45 = arith.addf %42, %44 : vector<16x32xf32>
    %cst_29 = arith.constant 5.000000e-01 : f32
    %46 = vector.broadcast %cst_29 : f32 to vector<16x32xf32>
    %47 = arith.mulf %46, %45 : vector<16x32xf32>
    %cst_30 = arith.constant 0.707106769 : f32
    %48 = vector.broadcast %cst_30 : f32 to vector<16x32xf32>
    %49 = arith.mulf %45, %48 : vector<16x32xf32>
    %50 = math.absf %49 : vector<16x32xf32>
    %cst_31 = arith.constant 0.327591091 : f32
    %51 = vector.broadcast %cst_31 : f32 to vector<16x32xf32>
    %52 = arith.mulf %51, %50 : vector<16x32xf32>
    %cst_32 = arith.constant 1.000000e+00 : f32
    %53 = vector.broadcast %cst_32 : f32 to vector<16x32xf32>
    %54 = arith.addf %53, %52 : vector<16x32xf32>
    %cst_33 = arith.constant 1.000000e+00 : f32
    %55 = vector.broadcast %cst_33 : f32 to vector<16x32xf32>
    %56 = arith.divf %55, %54 : vector<16x32xf32>
    %cst_34 = arith.constant 1.06140542 : f32
    %57 = vector.broadcast %cst_34 : f32 to vector<16x32xf32>
    %58 = arith.mulf %57, %56 : vector<16x32xf32>
    %cst_35 = arith.constant -1.45315206 : f32
    %59 = vector.broadcast %cst_35 : f32 to vector<16x32xf32>
    %60 = arith.addf %58, %59 : vector<16x32xf32>
    %61 = arith.mulf %60, %56 : vector<16x32xf32>
    %cst_36 = arith.constant 1.42141378 : f32
    %62 = vector.broadcast %cst_36 : f32 to vector<16x32xf32>
    %63 = arith.addf %61, %62 : vector<16x32xf32>
    %64 = arith.mulf %63, %56 : vector<16x32xf32>
    %cst_37 = arith.constant -0.284496725 : f32
    %65 = vector.broadcast %cst_37 : f32 to vector<16x32xf32>
    %66 = arith.addf %64, %65 : vector<16x32xf32>
    %67 = arith.mulf %66, %56 : vector<16x32xf32>
    %cst_38 = arith.constant 0.254829586 : f32
    %68 = vector.broadcast %cst_38 : f32 to vector<16x32xf32>
    %69 = arith.addf %67, %68 : vector<16x32xf32>
    %70 = arith.mulf %69, %56 : vector<16x32xf32>
    %cst_39 = arith.constant 0.000000e+00 : f32
    %71 = vector.broadcast %cst_39 : f32 to vector<16x32xf32>
    %72 = arith.subf %71, %50 : vector<16x32xf32>
    %73 = arith.mulf %72, %50 : vector<16x32xf32>
    %74 = math.exp %73 : vector<16x32xf32>
    %75 = arith.mulf %70, %74 : vector<16x32xf32>
    %cst_40 = arith.constant 1.000000e+00 : f32
    %76 = vector.broadcast %cst_40 : f32 to vector<16x32xf32>
    %77 = arith.subf %76, %75 : vector<16x32xf32>
    %cst_41 = arith.constant 0.000000e+00 : f32
    %78 = vector.broadcast %cst_41 : f32 to vector<16x32xf32>
    %79 = arith.cmpf oge, %49, %78 : vector<16x32xf32>
    %cst_42 = arith.constant 0.000000e+00 : f32
    %80 = vector.broadcast %cst_42 : f32 to vector<16x32xf32>
    %81 = arith.subf %80, %77 : vector<16x32xf32>
    %82 = arith.select %79, %77, %81 : vector<16x32xi1>, vector<16x32xf32>
    %cst_43 = arith.constant 1.000000e+00 : f32
    %83 = vector.broadcast %cst_43 : f32 to vector<16x32xf32>
    %84 = arith.addf %83, %82 : vector<16x32xf32>
    %85 = arith.mulf %47, %84 : vector<16x32xf32>
    %c0_44 = arith.constant 0 : index
    %c0_45 = arith.constant 0 : index
    %86 = vector.load %arg5[%c0_44, %c0_45] : memref<1x8xf32, #tpu.memory_space<vmem>>, vector<1x8xf32>
    %87 = vector.extract_strided_slice %85 {offsets = [0, 0], sizes = [1, 32], strides = [1, 1]} : vector<16x32xf32> to vector<1x32xf32>
    %c0_46 = arith.constant 0 : index
    %c0_47 = arith.constant 0 : index
    %c0_48 = arith.constant 0 : index
    %88 = vector.load %arg4[%c0_46, %c0_47, %c0_48] : memref<16x32x8xf32, #tpu.memory_space<vmem>>, vector<1x32x8xf32>
    %89 = vector.shape_cast %88 : vector<1x32x8xf32> to vector<32x8xf32>
    %cst_49 = arith.constant dense<0.000000e+00> : vector<1x8xf32>
    %90 = tpu.matmul %87, %89, %cst_49 {dimension_numbers = #tpu.dot_dimension_numbers<[1], [0], [0], [1], [0, 0, 1, 1], [], []>, precision = #tpu.contract_precision<fp32>} : vector<1x32xf32>, vector<32x8xf32>, vector<1x8xf32> -> vector<1x8xf32>
    %91 = arith.addf %86, %90 : vector<1x8xf32>
    %92 = vector.extract_strided_slice %85 {offsets = [1, 0], sizes = [1, 32], strides = [1, 1]} : vector<16x32xf32> to vector<1x32xf32>
    %c1_50 = arith.constant 1 : index
    %c0_51 = arith.constant 0 : index
    %c0_52 = arith.constant 0 : index
    %93 = vector.load %arg4[%c1_50, %c0_51, %c0_52] : memref<16x32x8xf32, #tpu.memory_space<vmem>>, vector<1x32x8xf32>
    %94 = vector.shape_cast %93 : vector<1x32x8xf32> to vector<32x8xf32>
    %cst_53 = arith.constant dense<0.000000e+00> : vector<1x8xf32>
    %95 = tpu.matmul %92, %94, %cst_53 {dimension_numbers = #tpu.dot_dimension_numbers<[1], [0], [0], [1], [0, 0, 1, 1], [], []>, precision = #tpu.contract_precision<fp32>} : vector<1x32xf32>, vector<32x8xf32>, vector<1x8xf32> -> vector<1x8xf32>
    %96 = arith.addf %91, %95 : vector<1x8xf32>
    %97 = vector.extract_strided_slice %85 {offsets = [2, 0], sizes = [1, 32], strides = [1, 1]} : vector<16x32xf32> to vector<1x32xf32>
    %c2_54 = arith.constant 2 : index
    %c0_55 = arith.constant 0 : index
    %c0_56 = arith.constant 0 : index
    %98 = vector.load %arg4[%c2_54, %c0_55, %c0_56] : memref<16x32x8xf32, #tpu.memory_space<vmem>>, vector<1x32x8xf32>
    %99 = vector.shape_cast %98 : vector<1x32x8xf32> to vector<32x8xf32>
    %cst_57 = arith.constant dense<0.000000e+00> : vector<1x8xf32>
    %100 = tpu.matmul %97, %99, %cst_57 {dimension_numbers = #tpu.dot_dimension_numbers<[1], [0], [0], [1], [0, 0, 1, 1], [], []>, precision = #tpu.contract_precision<fp32>} : vector<1x32xf32>, vector<32x8xf32>, vector<1x8xf32> -> vector<1x8xf32>
    %101 = arith.addf %96, %100 : vector<1x8xf32>
    %102 = vector.extract_strided_slice %85 {offsets = [3, 0], sizes = [1, 32], strides = [1, 1]} : vector<16x32xf32> to vector<1x32xf32>
    %c3_58 = arith.constant 3 : index
    %c0_59 = arith.constant 0 : index
    %c0_60 = arith.constant 0 : index
    %103 = vector.load %arg4[%c3_58, %c0_59, %c0_60] : memref<16x32x8xf32, #tpu.memory_space<vmem>>, vector<1x32x8xf32>
    %104 = vector.shape_cast %103 : vector<1x32x8xf32> to vector<32x8xf32>
    %cst_61 = arith.constant dense<0.000000e+00> : vector<1x8xf32>
    %105 = tpu.matmul %102, %104, %cst_61 {dimension_numbers = #tpu.dot_dimension_numbers<[1], [0], [0], [1], [0, 0, 1, 1], [], []>, precision = #tpu.contract_precision<fp32>} : vector<1x32xf32>, vector<32x8xf32>, vector<1x8xf32> -> vector<1x8xf32>
    %106 = arith.addf %101, %105 : vector<1x8xf32>
    %107 = vector.extract_strided_slice %85 {offsets = [4, 0], sizes = [1, 32], strides = [1, 1]} : vector<16x32xf32> to vector<1x32xf32>
    %c4_62 = arith.constant 4 : index
    %c0_63 = arith.constant 0 : index
    %c0_64 = arith.constant 0 : index
    %108 = vector.load %arg4[%c4_62, %c0_63, %c0_64] : memref<16x32x8xf32, #tpu.memory_space<vmem>>, vector<1x32x8xf32>
    %109 = vector.shape_cast %108 : vector<1x32x8xf32> to vector<32x8xf32>
    %cst_65 = arith.constant dense<0.000000e+00> : vector<1x8xf32>
    %110 = tpu.matmul %107, %109, %cst_65 {dimension_numbers = #tpu.dot_dimension_numbers<[1], [0], [0], [1], [0, 0, 1, 1], [], []>, precision = #tpu.contract_precision<fp32>} : vector<1x32xf32>, vector<32x8xf32>, vector<1x8xf32> -> vector<1x8xf32>
    %111 = arith.addf %106, %110 : vector<1x8xf32>
    %112 = vector.extract_strided_slice %85 {offsets = [5, 0], sizes = [1, 32], strides = [1, 1]} : vector<16x32xf32> to vector<1x32xf32>
    %c5_66 = arith.constant 5 : index
    %c0_67 = arith.constant 0 : index
    %c0_68 = arith.constant 0 : index
    %113 = vector.load %arg4[%c5_66, %c0_67, %c0_68] : memref<16x32x8xf32, #tpu.memory_space<vmem>>, vector<1x32x8xf32>
    %114 = vector.shape_cast %113 : vector<1x32x8xf32> to vector<32x8xf32>
    %cst_69 = arith.constant dense<0.000000e+00> : vector<1x8xf32>
    %115 = tpu.matmul %112, %114, %cst_69 {dimension_numbers = #tpu.dot_dimension_numbers<[1], [0], [0], [1], [0, 0, 1, 1], [], []>, precision = #tpu.contract_precision<fp32>} : vector<1x32xf32>, vector<32x8xf32>, vector<1x8xf32> -> vector<1x8xf32>
    %116 = arith.addf %111, %115 : vector<1x8xf32>
    %117 = vector.extract_strided_slice %85 {offsets = [6, 0], sizes = [1, 32], strides = [1, 1]} : vector<16x32xf32> to vector<1x32xf32>
    %c6_70 = arith.constant 6 : index
    %c0_71 = arith.constant 0 : index
    %c0_72 = arith.constant 0 : index
    %118 = vector.load %arg4[%c6_70, %c0_71, %c0_72] : memref<16x32x8xf32, #tpu.memory_space<vmem>>, vector<1x32x8xf32>
    %119 = vector.shape_cast %118 : vector<1x32x8xf32> to vector<32x8xf32>
    %cst_73 = arith.constant dense<0.000000e+00> : vector<1x8xf32>
    %120 = tpu.matmul %117, %119, %cst_73 {dimension_numbers = #tpu.dot_dimension_numbers<[1], [0], [0], [1], [0, 0, 1, 1], [], []>, precision = #tpu.contract_precision<fp32>} : vector<1x32xf32>, vector<32x8xf32>, vector<1x8xf32> -> vector<1x8xf32>
    %121 = arith.addf %116, %120 : vector<1x8xf32>
    %122 = vector.extract_strided_slice %85 {offsets = [7, 0], sizes = [1, 32], strides = [1, 1]} : vector<16x32xf32> to vector<1x32xf32>
    %c7_74 = arith.constant 7 : index
    %c0_75 = arith.constant 0 : index
    %c0_76 = arith.constant 0 : index
    %123 = vector.load %arg4[%c7_74, %c0_75, %c0_76] : memref<16x32x8xf32, #tpu.memory_space<vmem>>, vector<1x32x8xf32>
    %124 = vector.shape_cast %123 : vector<1x32x8xf32> to vector<32x8xf32>
    %cst_77 = arith.constant dense<0.000000e+00> : vector<1x8xf32>
    %125 = tpu.matmul %122, %124, %cst_77 {dimension_numbers = #tpu.dot_dimension_numbers<[1], [0], [0], [1], [0, 0, 1, 1], [], []>, precision = #tpu.contract_precision<fp32>} : vector<1x32xf32>, vector<32x8xf32>, vector<1x8xf32> -> vector<1x8xf32>
    %126 = arith.addf %121, %125 : vector<1x8xf32>
    %127 = vector.extract_strided_slice %85 {offsets = [8, 0], sizes = [1, 32], strides = [1, 1]} : vector<16x32xf32> to vector<1x32xf32>
    %c8 = arith.constant 8 : index
    %c0_78 = arith.constant 0 : index
    %c0_79 = arith.constant 0 : index
    %128 = vector.load %arg4[%c8, %c0_78, %c0_79] : memref<16x32x8xf32, #tpu.memory_space<vmem>>, vector<1x32x8xf32>
    %129 = vector.shape_cast %128 : vector<1x32x8xf32> to vector<32x8xf32>
    %cst_80 = arith.constant dense<0.000000e+00> : vector<1x8xf32>
    %130 = tpu.matmul %127, %129, %cst_80 {dimension_numbers = #tpu.dot_dimension_numbers<[1], [0], [0], [1], [0, 0, 1, 1], [], []>, precision = #tpu.contract_precision<fp32>} : vector<1x32xf32>, vector<32x8xf32>, vector<1x8xf32> -> vector<1x8xf32>
    %131 = arith.addf %126, %130 : vector<1x8xf32>
    %132 = vector.extract_strided_slice %85 {offsets = [9, 0], sizes = [1, 32], strides = [1, 1]} : vector<16x32xf32> to vector<1x32xf32>
    %c9 = arith.constant 9 : index
    %c0_81 = arith.constant 0 : index
    %c0_82 = arith.constant 0 : index
    %133 = vector.load %arg4[%c9, %c0_81, %c0_82] : memref<16x32x8xf32, #tpu.memory_space<vmem>>, vector<1x32x8xf32>
    %134 = vector.shape_cast %133 : vector<1x32x8xf32> to vector<32x8xf32>
    %cst_83 = arith.constant dense<0.000000e+00> : vector<1x8xf32>
    %135 = tpu.matmul %132, %134, %cst_83 {dimension_numbers = #tpu.dot_dimension_numbers<[1], [0], [0], [1], [0, 0, 1, 1], [], []>, precision = #tpu.contract_precision<fp32>} : vector<1x32xf32>, vector<32x8xf32>, vector<1x8xf32> -> vector<1x8xf32>
    %136 = arith.addf %131, %135 : vector<1x8xf32>
    %137 = vector.extract_strided_slice %85 {offsets = [10, 0], sizes = [1, 32], strides = [1, 1]} : vector<16x32xf32> to vector<1x32xf32>
    %c10 = arith.constant 10 : index
    %c0_84 = arith.constant 0 : index
    %c0_85 = arith.constant 0 : index
    %138 = vector.load %arg4[%c10, %c0_84, %c0_85] : memref<16x32x8xf32, #tpu.memory_space<vmem>>, vector<1x32x8xf32>
    %139 = vector.shape_cast %138 : vector<1x32x8xf32> to vector<32x8xf32>
    %cst_86 = arith.constant dense<0.000000e+00> : vector<1x8xf32>
    %140 = tpu.matmul %137, %139, %cst_86 {dimension_numbers = #tpu.dot_dimension_numbers<[1], [0], [0], [1], [0, 0, 1, 1], [], []>, precision = #tpu.contract_precision<fp32>} : vector<1x32xf32>, vector<32x8xf32>, vector<1x8xf32> -> vector<1x8xf32>
    %141 = arith.addf %136, %140 : vector<1x8xf32>
    %142 = vector.extract_strided_slice %85 {offsets = [11, 0], sizes = [1, 32], strides = [1, 1]} : vector<16x32xf32> to vector<1x32xf32>
    %c11 = arith.constant 11 : index
    %c0_87 = arith.constant 0 : index
    %c0_88 = arith.constant 0 : index
    %143 = vector.load %arg4[%c11, %c0_87, %c0_88] : memref<16x32x8xf32, #tpu.memory_space<vmem>>, vector<1x32x8xf32>
    %144 = vector.shape_cast %143 : vector<1x32x8xf32> to vector<32x8xf32>
    %cst_89 = arith.constant dense<0.000000e+00> : vector<1x8xf32>
    %145 = tpu.matmul %142, %144, %cst_89 {dimension_numbers = #tpu.dot_dimension_numbers<[1], [0], [0], [1], [0, 0, 1, 1], [], []>, precision = #tpu.contract_precision<fp32>} : vector<1x32xf32>, vector<32x8xf32>, vector<1x8xf32> -> vector<1x8xf32>
    %146 = arith.addf %141, %145 : vector<1x8xf32>
    %147 = vector.extract_strided_slice %85 {offsets = [12, 0], sizes = [1, 32], strides = [1, 1]} : vector<16x32xf32> to vector<1x32xf32>
    %c12 = arith.constant 12 : index
    %c0_90 = arith.constant 0 : index
    %c0_91 = arith.constant 0 : index
    %148 = vector.load %arg4[%c12, %c0_90, %c0_91] : memref<16x32x8xf32, #tpu.memory_space<vmem>>, vector<1x32x8xf32>
    %149 = vector.shape_cast %148 : vector<1x32x8xf32> to vector<32x8xf32>
    %cst_92 = arith.constant dense<0.000000e+00> : vector<1x8xf32>
    %150 = tpu.matmul %147, %149, %cst_92 {dimension_numbers = #tpu.dot_dimension_numbers<[1], [0], [0], [1], [0, 0, 1, 1], [], []>, precision = #tpu.contract_precision<fp32>} : vector<1x32xf32>, vector<32x8xf32>, vector<1x8xf32> -> vector<1x8xf32>
    %151 = arith.addf %146, %150 : vector<1x8xf32>
    %152 = vector.extract_strided_slice %85 {offsets = [13, 0], sizes = [1, 32], strides = [1, 1]} : vector<16x32xf32> to vector<1x32xf32>
    %c13 = arith.constant 13 : index
    %c0_93 = arith.constant 0 : index
    %c0_94 = arith.constant 0 : index
    %153 = vector.load %arg4[%c13, %c0_93, %c0_94] : memref<16x32x8xf32, #tpu.memory_space<vmem>>, vector<1x32x8xf32>
    %154 = vector.shape_cast %153 : vector<1x32x8xf32> to vector<32x8xf32>
    %cst_95 = arith.constant dense<0.000000e+00> : vector<1x8xf32>
    %155 = tpu.matmul %152, %154, %cst_95 {dimension_numbers = #tpu.dot_dimension_numbers<[1], [0], [0], [1], [0, 0, 1, 1], [], []>, precision = #tpu.contract_precision<fp32>} : vector<1x32xf32>, vector<32x8xf32>, vector<1x8xf32> -> vector<1x8xf32>
    %156 = arith.addf %151, %155 : vector<1x8xf32>
    %157 = vector.extract_strided_slice %85 {offsets = [14, 0], sizes = [1, 32], strides = [1, 1]} : vector<16x32xf32> to vector<1x32xf32>
    %c14 = arith.constant 14 : index
    %c0_96 = arith.constant 0 : index
    %c0_97 = arith.constant 0 : index
    %158 = vector.load %arg4[%c14, %c0_96, %c0_97] : memref<16x32x8xf32, #tpu.memory_space<vmem>>, vector<1x32x8xf32>
    %159 = vector.shape_cast %158 : vector<1x32x8xf32> to vector<32x8xf32>
    %cst_98 = arith.constant dense<0.000000e+00> : vector<1x8xf32>
    %160 = tpu.matmul %157, %159, %cst_98 {dimension_numbers = #tpu.dot_dimension_numbers<[1], [0], [0], [1], [0, 0, 1, 1], [], []>, precision = #tpu.contract_precision<fp32>} : vector<1x32xf32>, vector<32x8xf32>, vector<1x8xf32> -> vector<1x8xf32>
    %161 = arith.addf %156, %160 : vector<1x8xf32>
    %162 = vector.extract_strided_slice %85 {offsets = [15, 0], sizes = [1, 32], strides = [1, 1]} : vector<16x32xf32> to vector<1x32xf32>
    %c15 = arith.constant 15 : index
    %c0_99 = arith.constant 0 : index
    %c0_100 = arith.constant 0 : index
    %163 = vector.load %arg4[%c15, %c0_99, %c0_100] : memref<16x32x8xf32, #tpu.memory_space<vmem>>, vector<1x32x8xf32>
    %164 = vector.shape_cast %163 : vector<1x32x8xf32> to vector<32x8xf32>
    %cst_101 = arith.constant dense<0.000000e+00> : vector<1x8xf32>
    %165 = tpu.matmul %162, %164, %cst_101 {dimension_numbers = #tpu.dot_dimension_numbers<[1], [0], [0], [1], [0, 0, 1, 1], [], []>, precision = #tpu.contract_precision<fp32>} : vector<1x32xf32>, vector<32x8xf32>, vector<1x8xf32> -> vector<1x8xf32>
    %166 = arith.addf %161, %165 : vector<1x8xf32>
    %167 = math.tanh %166 : vector<1x8xf32>
    %c0_102 = arith.constant 0 : index
    %c0_103 = arith.constant 0 : index
    %168 = vector.load %arg6[%c0_102, %c0_103] : memref<2x8xf32, #tpu.memory_space<vmem>>, vector<1x8xf32>
    tpu.vector_store %arg6[%c0_102, %c0_103], %167 {strides = array<i32>} : memref<2x8xf32, #tpu.memory_space<vmem>>, vector<1x8xf32>,
    %c1_104 = arith.constant 1 : index
    %c0_105 = arith.constant 0 : index
    %c0_106 = arith.constant 0 : index
    %169 = vector.load %arg1[%c1_104, %c0_105, %c0_106] : memref<2x23x4xf32, #tpu.memory_space<vmem>>, vector<1x23x4xf32>
    %170 = vector.shape_cast %169 : vector<1x23x4xf32> to vector<23x4xf32>
    %cst_107 = arith.constant 0.000000e+00 : f32
    %171 = vector.broadcast %cst_107 : f32 to vector<16x32xf32>
    %172 = vector.extract_strided_slice %170 {offsets = [0, 0], sizes = [16, 4], strides = [1, 1]} : vector<23x4xf32> to vector<16x4xf32>
    %c0_108 = arith.constant 0 : index
    %c0_109 = arith.constant 0 : index
    %c0_110 = arith.constant 0 : index
    %173 = vector.load %arg2[%c0_108, %c0_109, %c0_110] : memref<8x4x32xf32, #tpu.memory_space<vmem>>, vector<1x4x32xf32>
    %174 = vector.shape_cast %173 : vector<1x4x32xf32> to vector<4x32xf32>
    %cst_111 = arith.constant dense<0.000000e+00> : vector<16x32xf32>
    %175 = tpu.matmul %172, %174, %cst_111 {dimension_numbers = #tpu.dot_dimension_numbers<[1], [0], [0], [1], [0, 0, 1, 1], [], []>, precision = #tpu.contract_precision<fp32>} : vector<16x4xf32>, vector<4x32xf32>, vector<16x32xf32> -> vector<16x32xf32>
    %176 = arith.addf %171, %175 : vector<16x32xf32>
    %177 = vector.extract_strided_slice %170 {offsets = [1, 0], sizes = [16, 4], strides = [1, 1]} : vector<23x4xf32> to vector<16x4xf32>
    %c1_112 = arith.constant 1 : index
    %c0_113 = arith.constant 0 : index
    %c0_114 = arith.constant 0 : index
    %178 = vector.load %arg2[%c1_112, %c0_113, %c0_114] : memref<8x4x32xf32, #tpu.memory_space<vmem>>, vector<1x4x32xf32>
    %179 = vector.shape_cast %178 : vector<1x4x32xf32> to vector<4x32xf32>
    %cst_115 = arith.constant dense<0.000000e+00> : vector<16x32xf32>
    %180 = tpu.matmul %177, %179, %cst_115 {dimension_numbers = #tpu.dot_dimension_numbers<[1], [0], [0], [1], [0, 0, 1, 1], [], []>, precision = #tpu.contract_precision<fp32>} : vector<16x4xf32>, vector<4x32xf32>, vector<16x32xf32> -> vector<16x32xf32>
    %181 = arith.addf %176, %180 : vector<16x32xf32>
    %182 = vector.extract_strided_slice %170 {offsets = [2, 0], sizes = [16, 4], strides = [1, 1]} : vector<23x4xf32> to vector<16x4xf32>
    %c2_116 = arith.constant 2 : index
    %c0_117 = arith.constant 0 : index
    %c0_118 = arith.constant 0 : index
    %183 = vector.load %arg2[%c2_116, %c0_117, %c0_118] : memref<8x4x32xf32, #tpu.memory_space<vmem>>, vector<1x4x32xf32>
    %184 = vector.shape_cast %183 : vector<1x4x32xf32> to vector<4x32xf32>
    %cst_119 = arith.constant dense<0.000000e+00> : vector<16x32xf32>
    %185 = tpu.matmul %182, %184, %cst_119 {dimension_numbers = #tpu.dot_dimension_numbers<[1], [0], [0], [1], [0, 0, 1, 1], [], []>, precision = #tpu.contract_precision<fp32>} : vector<16x4xf32>, vector<4x32xf32>, vector<16x32xf32> -> vector<16x32xf32>
    %186 = arith.addf %181, %185 : vector<16x32xf32>
    %187 = vector.extract_strided_slice %170 {offsets = [3, 0], sizes = [16, 4], strides = [1, 1]} : vector<23x4xf32> to vector<16x4xf32>
    %c3_120 = arith.constant 3 : index
    %c0_121 = arith.constant 0 : index
    %c0_122 = arith.constant 0 : index
    %188 = vector.load %arg2[%c3_120, %c0_121, %c0_122] : memref<8x4x32xf32, #tpu.memory_space<vmem>>, vector<1x4x32xf32>
    %189 = vector.shape_cast %188 : vector<1x4x32xf32> to vector<4x32xf32>
    %cst_123 = arith.constant dense<0.000000e+00> : vector<16x32xf32>
    %190 = tpu.matmul %187, %189, %cst_123 {dimension_numbers = #tpu.dot_dimension_numbers<[1], [0], [0], [1], [0, 0, 1, 1], [], []>, precision = #tpu.contract_precision<fp32>} : vector<16x4xf32>, vector<4x32xf32>, vector<16x32xf32> -> vector<16x32xf32>
    %191 = arith.addf %186, %190 : vector<16x32xf32>
    %192 = vector.extract_strided_slice %170 {offsets = [4, 0], sizes = [16, 4], strides = [1, 1]} : vector<23x4xf32> to vector<16x4xf32>
    %c4_124 = arith.constant 4 : index
    %c0_125 = arith.constant 0 : index
    %c0_126 = arith.constant 0 : index
    %193 = vector.load %arg2[%c4_124, %c0_125, %c0_126] : memref<8x4x32xf32, #tpu.memory_space<vmem>>, vector<1x4x32xf32>
    %194 = vector.shape_cast %193 : vector<1x4x32xf32> to vector<4x32xf32>
    %cst_127 = arith.constant dense<0.000000e+00> : vector<16x32xf32>
    %195 = tpu.matmul %192, %194, %cst_127 {dimension_numbers = #tpu.dot_dimension_numbers<[1], [0], [0], [1], [0, 0, 1, 1], [], []>, precision = #tpu.contract_precision<fp32>} : vector<16x4xf32>, vector<4x32xf32>, vector<16x32xf32> -> vector<16x32xf32>
    %196 = arith.addf %191, %195 : vector<16x32xf32>
    %197 = vector.extract_strided_slice %170 {offsets = [5, 0], sizes = [16, 4], strides = [1, 1]} : vector<23x4xf32> to vector<16x4xf32>
    %c5_128 = arith.constant 5 : index
    %c0_129 = arith.constant 0 : index
    %c0_130 = arith.constant 0 : index
    %198 = vector.load %arg2[%c5_128, %c0_129, %c0_130] : memref<8x4x32xf32, #tpu.memory_space<vmem>>, vector<1x4x32xf32>
    %199 = vector.shape_cast %198 : vector<1x4x32xf32> to vector<4x32xf32>
    %cst_131 = arith.constant dense<0.000000e+00> : vector<16x32xf32>
    %200 = tpu.matmul %197, %199, %cst_131 {dimension_numbers = #tpu.dot_dimension_numbers<[1], [0], [0], [1], [0, 0, 1, 1], [], []>, precision = #tpu.contract_precision<fp32>} : vector<16x4xf32>, vector<4x32xf32>, vector<16x32xf32> -> vector<16x32xf32>
    %201 = arith.addf %196, %200 : vector<16x32xf32>
    %202 = vector.extract_strided_slice %170 {offsets = [6, 0], sizes = [16, 4], strides = [1, 1]} : vector<23x4xf32> to vector<16x4xf32>
    %c6_132 = arith.constant 6 : index
    %c0_133 = arith.constant 0 : index
    %c0_134 = arith.constant 0 : index
    %203 = vector.load %arg2[%c6_132, %c0_133, %c0_134] : memref<8x4x32xf32, #tpu.memory_space<vmem>>, vector<1x4x32xf32>
    %204 = vector.shape_cast %203 : vector<1x4x32xf32> to vector<4x32xf32>
    %cst_135 = arith.constant dense<0.000000e+00> : vector<16x32xf32>
    %205 = tpu.matmul %202, %204, %cst_135 {dimension_numbers = #tpu.dot_dimension_numbers<[1], [0], [0], [1], [0, 0, 1, 1], [], []>, precision = #tpu.contract_precision<fp32>} : vector<16x4xf32>, vector<4x32xf32>, vector<16x32xf32> -> vector<16x32xf32>
    %206 = arith.addf %201, %205 : vector<16x32xf32>
    %207 = vector.extract_strided_slice %170 {offsets = [7, 0], sizes = [16, 4], strides = [1, 1]} : vector<23x4xf32> to vector<16x4xf32>
    %c7_136 = arith.constant 7 : index
    %c0_137 = arith.constant 0 : index
    %c0_138 = arith.constant 0 : index
    %208 = vector.load %arg2[%c7_136, %c0_137, %c0_138] : memref<8x4x32xf32, #tpu.memory_space<vmem>>, vector<1x4x32xf32>
    %209 = vector.shape_cast %208 : vector<1x4x32xf32> to vector<4x32xf32>
    %cst_139 = arith.constant dense<0.000000e+00> : vector<16x32xf32>
    %210 = tpu.matmul %207, %209, %cst_139 {dimension_numbers = #tpu.dot_dimension_numbers<[1], [0], [0], [1], [0, 0, 1, 1], [], []>, precision = #tpu.contract_precision<fp32>} : vector<16x4xf32>, vector<4x32xf32>, vector<16x32xf32> -> vector<16x32xf32>
    %211 = arith.addf %206, %210 : vector<16x32xf32>
    %c0_140 = arith.constant 0 : index
    %c0_141 = arith.constant 0 : index
    %212 = vector.load %arg3[%c0_140, %c0_141] : memref<1x32xf32, #tpu.memory_space<vmem>>, vector<1x32xf32>
    %213 = vector.broadcast %212 : vector<1x32xf32> to vector<16x32xf32>
    %214 = arith.addf %211, %213 : vector<16x32xf32>
    %cst_142 = arith.constant 5.000000e-01 : f32
    %215 = vector.broadcast %cst_142 : f32 to vector<16x32xf32>
    %216 = arith.mulf %215, %214 : vector<16x32xf32>
    %cst_143 = arith.constant 0.707106769 : f32
    %217 = vector.broadcast %cst_143 : f32 to vector<16x32xf32>
    %218 = arith.mulf %214, %217 : vector<16x32xf32>
    %219 = math.absf %218 : vector<16x32xf32>
    %cst_144 = arith.constant 0.327591091 : f32
    %220 = vector.broadcast %cst_144 : f32 to vector<16x32xf32>
    %221 = arith.mulf %220, %219 : vector<16x32xf32>
    %cst_145 = arith.constant 1.000000e+00 : f32
    %222 = vector.broadcast %cst_145 : f32 to vector<16x32xf32>
    %223 = arith.addf %222, %221 : vector<16x32xf32>
    %cst_146 = arith.constant 1.000000e+00 : f32
    %224 = vector.broadcast %cst_146 : f32 to vector<16x32xf32>
    %225 = arith.divf %224, %223 : vector<16x32xf32>
    %cst_147 = arith.constant 1.06140542 : f32
    %226 = vector.broadcast %cst_147 : f32 to vector<16x32xf32>
    %227 = arith.mulf %226, %225 : vector<16x32xf32>
    %cst_148 = arith.constant -1.45315206 : f32
    %228 = vector.broadcast %cst_148 : f32 to vector<16x32xf32>
    %229 = arith.addf %227, %228 : vector<16x32xf32>
    %230 = arith.mulf %229, %225 : vector<16x32xf32>
    %cst_149 = arith.constant 1.42141378 : f32
    %231 = vector.broadcast %cst_149 : f32 to vector<16x32xf32>
    %232 = arith.addf %230, %231 : vector<16x32xf32>
    %233 = arith.mulf %232, %225 : vector<16x32xf32>
    %cst_150 = arith.constant -0.284496725 : f32
    %234 = vector.broadcast %cst_150 : f32 to vector<16x32xf32>
    %235 = arith.addf %233, %234 : vector<16x32xf32>
    %236 = arith.mulf %235, %225 : vector<16x32xf32>
    %cst_151 = arith.constant 0.254829586 : f32
    %237 = vector.broadcast %cst_151 : f32 to vector<16x32xf32>
    %238 = arith.addf %236, %237 : vector<16x32xf32>
    %239 = arith.mulf %238, %225 : vector<16x32xf32>
    %cst_152 = arith.constant 0.000000e+00 : f32
    %240 = vector.broadcast %cst_152 : f32 to vector<16x32xf32>
    %241 = arith.subf %240, %219 : vector<16x32xf32>
    %242 = arith.mulf %241, %219 : vector<16x32xf32>
    %243 = math.exp %242 : vector<16x32xf32>
    %244 = arith.mulf %239, %243 : vector<16x32xf32>
    %cst_153 = arith.constant 1.000000e+00 : f32
    %245 = vector.broadcast %cst_153 : f32 to vector<16x32xf32>
    %246 = arith.subf %245, %244 : vector<16x32xf32>
    %cst_154 = arith.constant 0.000000e+00 : f32
    %247 = vector.broadcast %cst_154 : f32 to vector<16x32xf32>
    %248 = arith.cmpf oge, %218, %247 : vector<16x32xf32>
    %cst_155 = arith.constant 0.000000e+00 : f32
    %249 = vector.broadcast %cst_155 : f32 to vector<16x32xf32>
    %250 = arith.subf %249, %246 : vector<16x32xf32>
    %251 = arith.select %248, %246, %250 : vector<16x32xi1>, vector<16x32xf32>
    %cst_156 = arith.constant 1.000000e+00 : f32
    %252 = vector.broadcast %cst_156 : f32 to vector<16x32xf32>
    %253 = arith.addf %252, %251 : vector<16x32xf32>
    %254 = arith.mulf %216, %253 : vector<16x32xf32>
    %c0_157 = arith.constant 0 : index
    %c0_158 = arith.constant 0 : index
    %255 = vector.load %arg5[%c0_157, %c0_158] : memref<1x8xf32, #tpu.memory_space<vmem>>, vector<1x8xf32>
    %256 = vector.extract_strided_slice %254 {offsets = [0, 0], sizes = [1, 32], strides = [1, 1]} : vector<16x32xf32> to vector<1x32xf32>
    %c0_159 = arith.constant 0 : index
    %c0_160 = arith.constant 0 : index
    %c0_161 = arith.constant 0 : index
    %257 = vector.load %arg4[%c0_159, %c0_160, %c0_161] : memref<16x32x8xf32, #tpu.memory_space<vmem>>, vector<1x32x8xf32>
    %258 = vector.shape_cast %257 : vector<1x32x8xf32> to vector<32x8xf32>
    %cst_162 = arith.constant dense<0.000000e+00> : vector<1x8xf32>
    %259 = tpu.matmul %256, %258, %cst_162 {dimension_numbers = #tpu.dot_dimension_numbers<[1], [0], [0], [1], [0, 0, 1, 1], [], []>, precision = #tpu.contract_precision<fp32>} : vector<1x32xf32>, vector<32x8xf32>, vector<1x8xf32> -> vector<1x8xf32>
    %260 = arith.addf %255, %259 : vector<1x8xf32>
    %261 = vector.extract_strided_slice %254 {offsets = [1, 0], sizes = [1, 32], strides = [1, 1]} : vector<16x32xf32> to vector<1x32xf32>
    %c1_163 = arith.constant 1 : index
    %c0_164 = arith.constant 0 : index
    %c0_165 = arith.constant 0 : index
    %262 = vector.load %arg4[%c1_163, %c0_164, %c0_165] : memref<16x32x8xf32, #tpu.memory_space<vmem>>, vector<1x32x8xf32>
    %263 = vector.shape_cast %262 : vector<1x32x8xf32> to vector<32x8xf32>
    %cst_166 = arith.constant dense<0.000000e+00> : vector<1x8xf32>
    %264 = tpu.matmul %261, %263, %cst_166 {dimension_numbers = #tpu.dot_dimension_numbers<[1], [0], [0], [1], [0, 0, 1, 1], [], []>, precision = #tpu.contract_precision<fp32>} : vector<1x32xf32>, vector<32x8xf32>, vector<1x8xf32> -> vector<1x8xf32>
    %265 = arith.addf %260, %264 : vector<1x8xf32>
    %266 = vector.extract_strided_slice %254 {offsets = [2, 0], sizes = [1, 32], strides = [1, 1]} : vector<16x32xf32> to vector<1x32xf32>
    %c2_167 = arith.constant 2 : index
    %c0_168 = arith.constant 0 : index
    %c0_169 = arith.constant 0 : index
    %267 = vector.load %arg4[%c2_167, %c0_168, %c0_169] : memref<16x32x8xf32, #tpu.memory_space<vmem>>, vector<1x32x8xf32>
    %268 = vector.shape_cast %267 : vector<1x32x8xf32> to vector<32x8xf32>
    %cst_170 = arith.constant dense<0.000000e+00> : vector<1x8xf32>
    %269 = tpu.matmul %266, %268, %cst_170 {dimension_numbers = #tpu.dot_dimension_numbers<[1], [0], [0], [1], [0, 0, 1, 1], [], []>, precision = #tpu.contract_precision<fp32>} : vector<1x32xf32>, vector<32x8xf32>, vector<1x8xf32> -> vector<1x8xf32>
    %270 = arith.addf %265, %269 : vector<1x8xf32>
    %271 = vector.extract_strided_slice %254 {offsets = [3, 0], sizes = [1, 32], strides = [1, 1]} : vector<16x32xf32> to vector<1x32xf32>
    %c3_171 = arith.constant 3 : index
    %c0_172 = arith.constant 0 : index
    %c0_173 = arith.constant 0 : index
    %272 = vector.load %arg4[%c3_171, %c0_172, %c0_173] : memref<16x32x8xf32, #tpu.memory_space<vmem>>, vector<1x32x8xf32>
    %273 = vector.shape_cast %272 : vector<1x32x8xf32> to vector<32x8xf32>
    %cst_174 = arith.constant dense<0.000000e+00> : vector<1x8xf32>
    %274 = tpu.matmul %271, %273, %cst_174 {dimension_numbers = #tpu.dot_dimension_numbers<[1], [0], [0], [1], [0, 0, 1, 1], [], []>, precision = #tpu.contract_precision<fp32>} : vector<1x32xf32>, vector<32x8xf32>, vector<1x8xf32> -> vector<1x8xf32>
    %275 = arith.addf %270, %274 : vector<1x8xf32>
    %276 = vector.extract_strided_slice %254 {offsets = [4, 0], sizes = [1, 32], strides = [1, 1]} : vector<16x32xf32> to vector<1x32xf32>
    %c4_175 = arith.constant 4 : index
    %c0_176 = arith.constant 0 : index
    %c0_177 = arith.constant 0 : index
    %277 = vector.load %arg4[%c4_175, %c0_176, %c0_177] : memref<16x32x8xf32, #tpu.memory_space<vmem>>, vector<1x32x8xf32>
    %278 = vector.shape_cast %277 : vector<1x32x8xf32> to vector<32x8xf32>
    %cst_178 = arith.constant dense<0.000000e+00> : vector<1x8xf32>
    %279 = tpu.matmul %276, %278, %cst_178 {dimension_numbers = #tpu.dot_dimension_numbers<[1], [0], [0], [1], [0, 0, 1, 1], [], []>, precision = #tpu.contract_precision<fp32>} : vector<1x32xf32>, vector<32x8xf32>, vector<1x8xf32> -> vector<1x8xf32>
    %280 = arith.addf %275, %279 : vector<1x8xf32>
    %281 = vector.extract_strided_slice %254 {offsets = [5, 0], sizes = [1, 32], strides = [1, 1]} : vector<16x32xf32> to vector<1x32xf32>
    %c5_179 = arith.constant 5 : index
    %c0_180 = arith.constant 0 : index
    %c0_181 = arith.constant 0 : index
    %282 = vector.load %arg4[%c5_179, %c0_180, %c0_181] : memref<16x32x8xf32, #tpu.memory_space<vmem>>, vector<1x32x8xf32>
    %283 = vector.shape_cast %282 : vector<1x32x8xf32> to vector<32x8xf32>
    %cst_182 = arith.constant dense<0.000000e+00> : vector<1x8xf32>
    %284 = tpu.matmul %281, %283, %cst_182 {dimension_numbers = #tpu.dot_dimension_numbers<[1], [0], [0], [1], [0, 0, 1, 1], [], []>, precision = #tpu.contract_precision<fp32>} : vector<1x32xf32>, vector<32x8xf32>, vector<1x8xf32> -> vector<1x8xf32>
    %285 = arith.addf %280, %284 : vector<1x8xf32>
    %286 = vector.extract_strided_slice %254 {offsets = [6, 0], sizes = [1, 32], strides = [1, 1]} : vector<16x32xf32> to vector<1x32xf32>
    %c6_183 = arith.constant 6 : index
    %c0_184 = arith.constant 0 : index
    %c0_185 = arith.constant 0 : index
    %287 = vector.load %arg4[%c6_183, %c0_184, %c0_185] : memref<16x32x8xf32, #tpu.memory_space<vmem>>, vector<1x32x8xf32>
    %288 = vector.shape_cast %287 : vector<1x32x8xf32> to vector<32x8xf32>
    %cst_186 = arith.constant dense<0.000000e+00> : vector<1x8xf32>
    %289 = tpu.matmul %286, %288, %cst_186 {dimension_numbers = #tpu.dot_dimension_numbers<[1], [0], [0], [1], [0, 0, 1, 1], [], []>, precision = #tpu.contract_precision<fp32>} : vector<1x32xf32>, vector<32x8xf32>, vector<1x8xf32> -> vector<1x8xf32>
    %290 = arith.addf %285, %289 : vector<1x8xf32>
    %291 = vector.extract_strided_slice %254 {offsets = [7, 0], sizes = [1, 32], strides = [1, 1]} : vector<16x32xf32> to vector<1x32xf32>
    %c7_187 = arith.constant 7 : index
    %c0_188 = arith.constant 0 : index
    %c0_189 = arith.constant 0 : index
    %292 = vector.load %arg4[%c7_187, %c0_188, %c0_189] : memref<16x32x8xf32, #tpu.memory_space<vmem>>, vector<1x32x8xf32>
    %293 = vector.shape_cast %292 : vector<1x32x8xf32> to vector<32x8xf32>
    %cst_190 = arith.constant dense<0.000000e+00> : vector<1x8xf32>
    %294 = tpu.matmul %291, %293, %cst_190 {dimension_numbers = #tpu.dot_dimension_numbers<[1], [0], [0], [1], [0, 0, 1, 1], [], []>, precision = #tpu.contract_precision<fp32>} : vector<1x32xf32>, vector<32x8xf32>, vector<1x8xf32> -> vector<1x8xf32>
    %295 = arith.addf %290, %294 : vector<1x8xf32>
    %296 = vector.extract_strided_slice %254 {offsets = [8, 0], sizes = [1, 32], strides = [1, 1]} : vector<16x32xf32> to vector<1x32xf32>
    %c8_191 = arith.constant 8 : index
    %c0_192 = arith.constant 0 : index
    %c0_193 = arith.constant 0 : index
    %297 = vector.load %arg4[%c8_191, %c0_192, %c0_193] : memref<16x32x8xf32, #tpu.memory_space<vmem>>, vector<1x32x8xf32>
    %298 = vector.shape_cast %297 : vector<1x32x8xf32> to vector<32x8xf32>
    %cst_194 = arith.constant dense<0.000000e+00> : vector<1x8xf32>
    %299 = tpu.matmul %296, %298, %cst_194 {dimension_numbers = #tpu.dot_dimension_numbers<[1], [0], [0], [1], [0, 0, 1, 1], [], []>, precision = #tpu.contract_precision<fp32>} : vector<1x32xf32>, vector<32x8xf32>, vector<1x8xf32> -> vector<1x8xf32>
    %300 = arith.addf %295, %299 : vector<1x8xf32>
    %301 = vector.extract_strided_slice %254 {offsets = [9, 0], sizes = [1, 32], strides = [1, 1]} : vector<16x32xf32> to vector<1x32xf32>
    %c9_195 = arith.constant 9 : index
    %c0_196 = arith.constant 0 : index
    %c0_197 = arith.constant 0 : index
    %302 = vector.load %arg4[%c9_195, %c0_196, %c0_197] : memref<16x32x8xf32, #tpu.memory_space<vmem>>, vector<1x32x8xf32>
    %303 = vector.shape_cast %302 : vector<1x32x8xf32> to vector<32x8xf32>
    %cst_198 = arith.constant dense<0.000000e+00> : vector<1x8xf32>
    %304 = tpu.matmul %301, %303, %cst_198 {dimension_numbers = #tpu.dot_dimension_numbers<[1], [0], [0], [1], [0, 0, 1, 1], [], []>, precision = #tpu.contract_precision<fp32>} : vector<1x32xf32>, vector<32x8xf32>, vector<1x8xf32> -> vector<1x8xf32>
    %305 = arith.addf %300, %304 : vector<1x8xf32>
    %306 = vector.extract_strided_slice %254 {offsets = [10, 0], sizes = [1, 32], strides = [1, 1]} : vector<16x32xf32> to vector<1x32xf32>
    %c10_199 = arith.constant 10 : index
    %c0_200 = arith.constant 0 : index
    %c0_201 = arith.constant 0 : index
    %307 = vector.load %arg4[%c10_199, %c0_200, %c0_201] : memref<16x32x8xf32, #tpu.memory_space<vmem>>, vector<1x32x8xf32>
    %308 = vector.shape_cast %307 : vector<1x32x8xf32> to vector<32x8xf32>
    %cst_202 = arith.constant dense<0.000000e+00> : vector<1x8xf32>
    %309 = tpu.matmul %306, %308, %cst_202 {dimension_numbers = #tpu.dot_dimension_numbers<[1], [0], [0], [1], [0, 0, 1, 1], [], []>, precision = #tpu.contract_precision<fp32>} : vector<1x32xf32>, vector<32x8xf32>, vector<1x8xf32> -> vector<1x8xf32>
    %310 = arith.addf %305, %309 : vector<1x8xf32>
    %311 = vector.extract_strided_slice %254 {offsets = [11, 0], sizes = [1, 32], strides = [1, 1]} : vector<16x32xf32> to vector<1x32xf32>
    %c11_203 = arith.constant 11 : index
    %c0_204 = arith.constant 0 : index
    %c0_205 = arith.constant 0 : index
    %312 = vector.load %arg4[%c11_203, %c0_204, %c0_205] : memref<16x32x8xf32, #tpu.memory_space<vmem>>, vector<1x32x8xf32>
    %313 = vector.shape_cast %312 : vector<1x32x8xf32> to vector<32x8xf32>
    %cst_206 = arith.constant dense<0.000000e+00> : vector<1x8xf32>
    %314 = tpu.matmul %311, %313, %cst_206 {dimension_numbers = #tpu.dot_dimension_numbers<[1], [0], [0], [1], [0, 0, 1, 1], [], []>, precision = #tpu.contract_precision<fp32>} : vector<1x32xf32>, vector<32x8xf32>, vector<1x8xf32> -> vector<1x8xf32>
    %315 = arith.addf %310, %314 : vector<1x8xf32>
    %316 = vector.extract_strided_slice %254 {offsets = [12, 0], sizes = [1, 32], strides = [1, 1]} : vector<16x32xf32> to vector<1x32xf32>
    %c12_207 = arith.constant 12 : index
    %c0_208 = arith.constant 0 : index
    %c0_209 = arith.constant 0 : index
    %317 = vector.load %arg4[%c12_207, %c0_208, %c0_209] : memref<16x32x8xf32, #tpu.memory_space<vmem>>, vector<1x32x8xf32>
    %318 = vector.shape_cast %317 : vector<1x32x8xf32> to vector<32x8xf32>
    %cst_210 = arith.constant dense<0.000000e+00> : vector<1x8xf32>
    %319 = tpu.matmul %316, %318, %cst_210 {dimension_numbers = #tpu.dot_dimension_numbers<[1], [0], [0], [1], [0, 0, 1, 1], [], []>, precision = #tpu.contract_precision<fp32>} : vector<1x32xf32>, vector<32x8xf32>, vector<1x8xf32> -> vector<1x8xf32>
    %320 = arith.addf %315, %319 : vector<1x8xf32>
    %321 = vector.extract_strided_slice %254 {offsets = [13, 0], sizes = [1, 32], strides = [1, 1]} : vector<16x32xf32> to vector<1x32xf32>
    %c13_211 = arith.constant 13 : index
    %c0_212 = arith.constant 0 : index
    %c0_213 = arith.constant 0 : index
    %322 = vector.load %arg4[%c13_211, %c0_212, %c0_213] : memref<16x32x8xf32, #tpu.memory_space<vmem>>, vector<1x32x8xf32>
    %323 = vector.shape_cast %322 : vector<1x32x8xf32> to vector<32x8xf32>
    %cst_214 = arith.constant dense<0.000000e+00> : vector<1x8xf32>
    %324 = tpu.matmul %321, %323, %cst_214 {dimension_numbers = #tpu.dot_dimension_numbers<[1], [0], [0], [1], [0, 0, 1, 1], [], []>, precision = #tpu.contract_precision<fp32>} : vector<1x32xf32>, vector<32x8xf32>, vector<1x8xf32> -> vector<1x8xf32>
    %325 = arith.addf %320, %324 : vector<1x8xf32>
    %326 = vector.extract_strided_slice %254 {offsets = [14, 0], sizes = [1, 32], strides = [1, 1]} : vector<16x32xf32> to vector<1x32xf32>
    %c14_215 = arith.constant 14 : index
    %c0_216 = arith.constant 0 : index
    %c0_217 = arith.constant 0 : index
    %327 = vector.load %arg4[%c14_215, %c0_216, %c0_217] : memref<16x32x8xf32, #tpu.memory_space<vmem>>, vector<1x32x8xf32>
    %328 = vector.shape_cast %327 : vector<1x32x8xf32> to vector<32x8xf32>
    %cst_218 = arith.constant dense<0.000000e+00> : vector<1x8xf32>
    %329 = tpu.matmul %326, %328, %cst_218 {dimension_numbers = #tpu.dot_dimension_numbers<[1], [0], [0], [1], [0, 0, 1, 1], [], []>, precision = #tpu.contract_precision<fp32>} : vector<1x32xf32>, vector<32x8xf32>, vector<1x8xf32> -> vector<1x8xf32>
    %330 = arith.addf %325, %329 : vector<1x8xf32>
    %331 = vector.extract_strided_slice %254 {offsets = [15, 0], sizes = [1, 32], strides = [1, 1]} : vector<16x32xf32> to vector<1x32xf32>
    %c15_219 = arith.constant 15 : index
    %c0_220 = arith.constant 0 : index
    %c0_221 = arith.constant 0 : index
    %332 = vector.load %arg4[%c15_219, %c0_220, %c0_221] : memref<16x32x8xf32, #tpu.memory_space<vmem>>, vector<1x32x8xf32>
    %333 = vector.shape_cast %332 : vector<1x32x8xf32> to vector<32x8xf32>
    %cst_222 = arith.constant dense<0.000000e+00> : vector<1x8xf32>
    %334 = tpu.matmul %331, %333, %cst_222 {dimension_numbers = #tpu.dot_dimension_numbers<[1], [0], [0], [1], [0, 0, 1, 1], [], []>, precision = #tpu.contract_precision<fp32>} : vector<1x32xf32>, vector<32x8xf32>, vector<1x8xf32> -> vector<1x8xf32>
    %335 = arith.addf %330, %334 : vector<1x8xf32>
    %336 = math.tanh %335 : vector<1x8xf32>
    %c1_223 = arith.constant 1 : index
    %c0_224 = arith.constant 0 : index
    %337 = vector.load %arg6[%c1_223, %c0_224] : memref<2x8xf32, #tpu.memory_space<vmem>>, vector<1x8xf32>
    tpu.vector_store %arg6[%c1_223, %c0_224], %336 {strides = array<i32>} : memref<2x8xf32, #tpu.memory_space<vmem>>, vector<1x8xf32>,
    return
  }
  func.func @transform_0(%arg0: i32) -> (i32, i32, i32) {
    %c0_i32 = arith.constant 0 : i32
    %c0_i32_0 = arith.constant 0 : i32
    %c0_i32_1 = arith.constant 0 : i32
    %c0_i32_2 = arith.constant 0 : i32
    return %c0_i32, %c0_i32_0, %c0_i32_1 : i32, i32, i32
  }
  func.func @transform_1(%arg0: i32) -> (i32, i32, i32) {
    %c0_i32 = arith.constant 0 : i32
    %c0_i32_0 = arith.constant 0 : i32
    %c0_i32_1 = arith.constant 0 : i32
    %c0_i32_2 = arith.constant 0 : i32
    return %c0_i32, %c0_i32_0, %c0_i32_1 : i32, i32, i32
  }
  func.func @transform_2(%arg0: i32) -> (i32, i32) {
    %c0_i32 = arith.constant 0 : i32
    %c0_i32_0 = arith.constant 0 : i32
    %c0_i32_1 = arith.constant 0 : i32
    return %c0_i32, %c0_i32_0 : i32, i32
  }
  func.func @transform_3(%arg0: i32) -> (i32, i32, i32) {
    %c0_i32 = arith.constant 0 : i32
    %c0_i32_0 = arith.constant 0 : i32
    %c0_i32_1 = arith.constant 0 : i32
    %c0_i32_2 = arith.constant 0 : i32
    return %c0_i32, %c0_i32_0, %c0_i32_1 : i32, i32, i32
  }
  func.func @transform_4(%arg0: i32) -> (i32, i32) {
    %c0_i32 = arith.constant 0 : i32
    %c0_i32_0 = arith.constant 0 : i32
    %c0_i32_1 = arith.constant 0 : i32
    return %c0_i32, %c0_i32_0 : i32, i32
  }
  func.func @transform_5(%arg0: i32) -> (i32, i32) {
    %c0_i32 = arith.constant 0 : i32
    %c0_i32_0 = arith.constant 0 : i32
    %c0_i32_1 = arith.constant 0 : i32
    return %c0_i32, %c0_i32_0 : i32, i32
  }
}

</mosaic_0001>

<bundles_post_ra>
// kernel: tpu_custom_call.1
= control target key start
LH: loop header
LB: loop body
LE: loop exit
PB: predicated region body
PF: predicated region fallthrough
CT: control target
= control target key end

     0   :  { %vm41_vm0 = vcmask 1043456   ;;  %vm30_vm1 = vcmask 1046528   ;;  %vm36_vm2 = vcmask 31744   ;;  %s33413_s0 = inlined_call_operand.vmem [shape: f32[2,23,4], index: 0, kind: input, shape index: {}]   ;;  %s33414_s1 = inlined_call_operand.vmem [shape: f32[8,4,32], index: 1, kind: input, shape index: {}]   ;;  %s33415_s2 = inlined_call_operand.vmem [shape: f32[1,32], index: 2, kind: input, shape index: {}]   ;;  %s33416_s3 = inlined_call_operand.vmem [shape: f32[16,32,8], index: 3, kind: input, shape index: {}]   ;;  %s33417_s4 = inlined_call_operand.vmem [shape: f32[1,8], index: 4, kind: input, shape index: {}]   ;;  %s33418_s5 = inlined_call_operand.hbm [shape: f32[2,8], index: 5, kind: output, shape index: {}]  }
   0x1   :  { %v24034_v0 = vld [vmem:[%s33414_s1 + $0x4] sm:$0xf]  ;;  %v29827_v2 = vld [vmem:[%s33413_s0 + $0x8] sm:$0xff]  ;;  %v29835_v6 = vld [vmem:[%s33413_s0 + $0x10] sm:$0x7f] }
   0x2   :  { %v29822_v1 = vld [vmem:[%s33413_s0] sm:$0xff]  ;;  %v43_v3 = vsel %vm41_vm0, %v24034_v0, 0  ;;  %v32_v5 = vrot.slane %v29827_v2, 1  ;;  %v34_v8 = vrot.slane %v29835_v6, 1 }
   0x3   :  { %v31_v4 = vrot.slane %v29822_v1, 1  ;;  %v46_v7 = vand.u32 4294901760, %v43_v3 }
   0x4   :  { %v35_v11 = vsel %vm30_vm1, %v32_v5, %v34_v8 }
   0x5   :  { %v33_v9 = vsel %vm30_vm1, %v31_v4, %v32_v5  ;;  %25421 = vmatprep.subr.mxu0 %v46_v7  ;;  %v133_v12 = vsub.f32 %v43_v3, %v46_v7 }
   0x6   :  { %v37_v10 = vsel %vm36_vm2, %v33_v9, 0 }
   0x7   :  { %10 = vsyncpa [#allocation3], 0  ;;  %25422 = vmatpush3.msra.mxu0 %v46_v7  ;;  %v111_v13 = vand.u32 4294901760, %v37_v10  ;;  %v39_v14 = vsel %vm36_vm2, %v35_v11, 0  ;;  %v134_v16 = vand.u32 4294901760, %v133_v12  ;;  %v534_v28 = vsel %vm36_vm2, %v29822_v1, 0 }
   0x8   :  { %v121_v15 = vand.u32 4294901760, %v39_v14  ;;  %v24_v27 = vld [vmem:[%s33414_s1] sm:$0xf]  ;;  %v29848_v30 = vand.u32 4294901760, %v534_v28  ;;  %v536_v33 = vsel %vm36_vm2, %v29827_v2, 0  ;;  %v1033_v46 = vrot.slane %v29822_v1, 2 }
   0x9   :  { %v112_v17 = vsub.f32 %v37_v10, %v111_v13  ;;  %v135_v19 = vsub.f32 %v133_v12, %v134_v16  ;;  %v539_v29 = vsel %vm41_vm0, %v24_v27, 0  ;;  %v617_v35 = vand.u32 4294901760, %v536_v33  ;;  %v24035_v49 = vld [vmem:[%s33414_s1 + $0x8] sm:$0xf]  ;;  %s29785_s29 = smov [#allocation2]  }
   0xa   :  { %v122_v18 = vsub.f32 %v39_v14, %v121_v15  ;;  %v542_v31 = vand.u32 4294901760, %v539_v29  ;;  %v608_v32 = vsub.f32 %v534_v28, %v29848_v30  ;;  %v1034_v47 = vrot.slane %v29827_v2, 2  ;;  %s24026_s30 = sshll.u32 %s29785_s29, 4  ;;  %s24027_s30 = int_to_ptr.vmem [resolvable:$true] %s24026_s30 }
   0xb   :  { %v113_v20 = vand.u32 4294901760, %v112_v17  ;;  %v136_v22 = vand.u32 4294901760, %v135_v19  ;;  %v618_v38 = vsub.f32 %v536_v33, %v617_v35  ;;  %vm1032_vm3 = vcmask 1045504   ;;  %s29758_s6 = scalar_lea.vmem %s24027_s30, 32  ;;  %p29763_p1 = scmp.lt.s32.totalorder %s24027_s30, %s24027_s30 }
   0xc   :  { %v123_v21 = vand.u32 4294901760, %v122_v18  ;;  %v629_v34 = vsub.f32 %v539_v29, %v542_v31  ;;  %v609_v36 = vand.u32 4294901760, %v608_v32  ;;  %v1035_v48 = vsel %vm1032_vm3, %v1033_v46, %v1034_v47  ;;  %p29759_p0 = scmp.ne.s32.totalorder %s24027_s30, %s29758_s6  ;;  %p29764_p2 = scmp.lt.s32.totalorder %s29758_s6, %s29758_s6 }
   0xd   :  { %v114_v23 = vsub.f32 %v112_v17, %v113_v20  ;;  %25426 = vmatprep.subr.mxu0 %v136_v22  ;;  %v619_v41 = vand.u32 4294901760, %v618_v38  ;;  %v1038_v50 = vsel %vm36_vm2, %v1035_v48, 0  ;;  %v1036_v51 = vrot.slane %v29835_v6, 2 }
   0xe   :  { %v124_v24 = vsub.f32 %v122_v18, %v123_v21  ;;  %v630_v37 = vand.u32 4294901760, %v629_v34  ;;  %v610_v39 = vsub.f32 %v608_v32, %v609_v36  ;;  %v1043_v52 = vsel %vm41_vm0, %v24035_v49, 0  ;;  %p29765_p3 = por %p29764_p2, %p29763_p1 }
   0xf   :  { %v115_v25 = vand.u32 4294901760, %v114_v23  ;;  %v620_v44 = vsub.f32 %v618_v38, %v619_v41  ;;  %v29863_v53 = vand.u32 4294901760, %v1038_v50  ;;  %v29865_v54 = vand.u32 4294901760, %v1043_v52 }
  0x10   :  { %v125_v26 = vand.u32 4294901760, %v124_v24  ;;  %v631_v40 = vsub.f32 %v629_v34, %v630_v37  ;;  %v611_v42 = vand.u32 4294901760, %v610_v39  ;;  %v1037_v55 = vsel %vm1032_vm3, %v1034_v47, %v1036_v51  ;;  %p29766_p4 = pnand %p29765_p3, %p29759_p0 }
  0x11   :  { %25423 = vmatprep.mubr.f32.mxu0 %v115_v25  ;;  %v621_v45 = vand.u32 4294901760, %v620_v44  ;;  %v1112_v56 = vsub.f32 %v1038_v50, %v29863_v53  ;;  %v1040_v57 = vsel %vm36_vm2, %v1037_v55, 0  ;;  %v1133_v58 = vsub.f32 %v1043_v52, %v29865_v54 }
  0x12   :  { %25424 = vmatmul.mubr.f32.vlgmr.msra.gmra.mrb[0].mxu0 %v125_v26  ;;  %v632_v43 = vand.u32 4294901760, %v631_v40  ;;  %v1121_v59 = vand.u32 4294901760, %v1040_v57  ;;  %v1539_v9 = vrot.slane %v29822_v1, 3  ;;  %v1540_v10 = vrot.slane %v29827_v2, 3 }
  0x13   :  { %25427 = vmatpush3.msra.mxu0 %v136_v22  ;;  %25428 = vmatprep.mubr.f32.mxu0 %v111_v13  ;;  %v1113_v60 = vand.u32 4294901760, %v1112_v56  ;;  %v1134_v61 = vand.u32 4294901760, %v1133_v58  ;;  %vm1538_vm4 = vcmask 1044480   ;;  %v1542_v14 = vrot.slane %v29835_v6, 3 }
  0x14   :  { %25431 = vmatprep.subr.mxu0 %v133_v12  ;;  %v1122_v62 = vsub.f32 %v1040_v57, %v1121_v59  ;;  %v1541_v11 = vsel %vm1538_vm4, %v1539_v9, %v1540_v10  ;;  %v2044_v33 = vrot.slane %v29822_v1, 4  ;;  %v2550_v57 = vrot.slane %v29822_v1, 5 }
  0x15   :  { %v1114_v63 = vsub.f32 %v1112_v56, %v1113_v60  ;;  %v1135_v0 = vsub.f32 %v1133_v58, %v1134_v61  ;;  %vm2549_vm5 = vcmask 1042432   ;;  %vm3055_vm6 = vcmask 1041408  }
  0x16   :  { %v1123_v3 = vand.u32 4294901760, %v1122_v62  ;;  %vm3561_vm7 = vcmask 1040384   ;;  %vm29783_vm8 = vmmov 0   ;;  %vm4133_vm10 = vcmask 261120  }
  0x17   :  { %v1115_v4 = vand.u32 4294901760, %v1114_v63  ;;  %v1136_v5 = vand.u32 4294901760, %v1135_v0  ;;  %vm12034_vm14 = vcmask 57344  }
  0x1a   :  { %25429 = vmatmul.mubr.f32.vlgmr.msra.gmra.mrb[0].mxu0 %v121_v15 }
  0x1b   :  { %25432 = vmatpush3.msra.mxu0 %v133_v12  ;;  %25433 = vmatprep.mubr.f32.mxu0 %v112_v17  ;;  %v24036_v12 = vld [vmem:[%s33414_s1 + $0xc] sm:$0xf] }
  0x1c   :  { %25436 = vmatprep.subr.mxu0 %v46_v7 }
  0x22   :  { %25434 = vmatmul.mubr.f32.vlgmr.msra.gmra.mrb[0].mxu0 %v122_v18  ;;  %v1543_v18 = vsel %vm1538_vm4, %v1540_v10, %v1542_v14 }
  0x23   :  { %25437 = vmatpush3.msra.mxu0 %v46_v7  ;;  %25438 = vmatprep.mubr.f32.mxu0 %v113_v20  ;;  %v1546_v20 = vsel %vm36_vm2, %v1543_v18, 0 }
  0x24   :  { %25441 = vmatprep.subr.mxu0 %v134_v16  ;;  %v1627_v22 = vand.u32 4294901760, %v1546_v20 }
  0x26   :  { %v1628_v25 = vsub.f32 %v1546_v20, %v1627_v22  ;;  %v3056_v20 = vrot.slane %v29822_v1, 6 }
  0x28   :  { %v1629_v28 = vand.u32 4294901760, %v1628_v25 }
  0x2a   :  { %25439 = vmatmul.mubr.f32.vlgmr.msra.gmra.mrb[0].mxu0 %v123_v21 }
  0x2b   :  { %25442 = vmatpush3.msra.mxu0 %v134_v16  ;;  %25443 = vmatprep.mubr.f32.mxu0 %v111_v13 }
  0x2c   :  { %25446 = vmatprep.subr.mxu0 %v46_v7 }
  0x32   :  { %25444 = vmatmul.mubr.f32.vlgmr.msra.gmra.mrb[0].mxu0 %v121_v15 }
  0x33   :  { %25447 = vmatpush3.msra.mxu0 %v46_v7  ;;  %25448 = vmatprep.mubr.f32.mxu0 %v111_v13  ;;  %v1124_v7 = vsub.f32 %v1122_v62, %v1123_v3  ;;  %v1544_v13 = vsel %vm36_vm2, %v1541_v11, 0 }
  0x34   :  { %25451 = vmatprep.subr.mxu0 %v542_v31  ;;  %v29887_v16 = vand.u32 4294901760, %v1544_v13 }
  0x35   :  { %v1125_v8 = vand.u32 4294901760, %v1124_v7 }
  0x36   :  { %v1618_v19 = vsub.f32 %v1544_v13, %v29887_v16 }
  0x38   :  { %v1619_v23 = vand.u32 4294901760, %v1618_v19 }
  0x3a   :  { %25449 = vmatmul.mubr.f32.vlgmr.msra.gmra.mrb[0].mxu0 %v121_v15  ;;  %v1549_v15 = vsel %vm41_vm0, %v24036_v12, 0  ;;  %v1620_v26 = vsub.f32 %v1618_v19, %v1619_v23 }
  0x3b   :  { %25452 = vmatpush3.msra.mxu0 %v542_v31  ;;  %25453 = vmatprep.mubr.f32.mxu0 %v611_v42  ;;  %v1552_v17 = vand.u32 4294901760, %v1549_v15 }
  0x3c   :  { %25456 = vmatprep.subr.mxu0 %v632_v43  ;;  %v1621_v29 = vand.u32 4294901760, %v1620_v26 }
  0x3d   :  { %v1639_v21 = vsub.f32 %v1549_v15, %v1552_v17 }
  0x3f   :  { %v1640_v24 = vand.u32 4294901760, %v1639_v21 }
  0x41   :  { %v1641_v27 = vsub.f32 %v1639_v21, %v1640_v24 }
  0x42   :  { %25454 = vmatmul.mubr.f32.vlgmr.msra.gmra.mrb[0].mxu0 %v621_v45 }
  0x43   :  { %25457 = vmatpush3.msra.mxu0 %v632_v43  ;;  %25458 = vmatprep.mubr.f32.mxu0 %v29848_v30 }
  0x44   :  { %25461 = vmatprep.subr.mxu0 %v629_v34 }
  0x4a   :  { %25459 = vmatmul.mubr.f32.vlgmr.msra.gmra.mrb[0].mxu0 %v617_v35 }
  0x4b   :  { %25462 = vmatpush3.msra.mxu0 %v629_v34  ;;  %25463 = vmatprep.mubr.f32.mxu0 %v608_v32  ;;  %v2045_v34 = vrot.slane %v29827_v2, 4 }
  0x4c   :  { %25466 = vmatprep.subr.mxu0 %v542_v31 }
  0x52   :  { %25464 = vmatmul.mubr.f32.vlgmr.msra.gmra.mrb[0].mxu0 %v618_v38  ;;  %v2047_v38 = vrot.slane %v29835_v6, 4 }
  0x53   :  { %25467 = vmatpush3.msra.mxu0 %v542_v31  ;;  %25468 = vmatprep.mubr.f32.mxu0 %v609_v36  ;;  %v24037_v36 = vld [vmem:[%s33414_s1 + $0x10] sm:$0xf] }
  0x54   :  { %25471 = vmatprep.subr.mxu0 %v630_v37  ;;  %v2054_v39 = vsel %vm41_vm0, %v24037_v36, 0  ;;  %v2048_v42 = vsel %vm41_vm0, %v2045_v34, %v2047_v38 }
  0x55   :  { %v2051_v44 = vsel %vm36_vm2, %v2048_v42, 0 }
  0x56   :  { %v2132_v46 = vand.u32 4294901760, %v2051_v44 }
  0x58   :  { %v2133_v49 = vsub.f32 %v2051_v44, %v2132_v46  ;;  %v3562_v44 = vrot.slane %v29822_v1, 7 }
  0x5a   :  { %25469 = vmatmul.mubr.f32.vlgmr.msra.gmra.mrb[0].mxu0 %v619_v41  ;;  %v29908_v41 = vand.u32 4294901760, %v2054_v39  ;;  %v2134_v52 = vand.u32 4294901760, %v2133_v49 }
  0x5b   :  { %25472 = vmatpush3.msra.mxu0 %v630_v37  ;;  %25473 = vmatprep.mubr.f32.mxu0 %v29848_v30 }
  0x5c   :  { %25476 = vmatprep.subr.mxu0 %v542_v31  ;;  %v2144_v45 = vsub.f32 %v2054_v39, %v29908_v41  ;;  %v2135_v55 = vsub.f32 %v2133_v49, %v2134_v52 }
  0x5e   :  { %v2145_v48 = vand.u32 4294901760, %v2144_v45 }
  0x60   :  { %v2146_v51 = vsub.f32 %v2144_v45, %v2145_v48 }
  0x62   :  { %25474 = vmatmul.mubr.f32.vlgmr.msra.gmra.mrb[0].mxu0 %v617_v35 }
  0x63   :  { %25477 = vmatpush3.msra.mxu0 %v542_v31  ;;  %25478 = vmatprep.mubr.f32.mxu0 %v29848_v30  ;;  %v1642_v30 = vand.u32 4294901760, %v1641_v27  ;;  %v1630_v31 = vsub.f32 %v1628_v25, %v1629_v28 }
  0x64   :  { %25481 = vmatprep.subr.mxu0 %v29865_v54 }
  0x65   :  { %v1631_v32 = vand.u32 4294901760, %v1630_v31 }
  0x6a   :  { %25479 = vmatmul.mubr.f32.vlgmr.msra.gmra.mrb[0].mxu0 %v617_v35  ;;  %v2046_v35 = vsel %vm41_vm0, %v2044_v33, %v2045_v34 }
  0x6b   :  { %25482 = vmatpush3.msra.mxu0 %v29865_v54  ;;  %25483 = vmatprep.mubr.f32.mxu0 %v1115_v4  ;;  %v2049_v37 = vsel %vm36_vm2, %v2046_v35, 0 }
  0x6c   :  { %25486 = vmatprep.subr.mxu0 %v1136_v5  ;;  %v29906_v40 = vand.u32 4294901760, %v2049_v37 }
  0x6e   :  { %v2123_v43 = vsub.f32 %v2049_v37, %v29906_v40 }
  0x70   :  { %v2124_v47 = vand.u32 4294901760, %v2123_v43 }
  0x72   :  { %25484 = vmatmul.mubr.f32.vlgmr.msra.gmra.mrb[0].mxu0 %v1125_v8  ;;  %v2125_v50 = vsub.f32 %v2123_v43, %v2124_v47 }
  0x73   :  { %25487 = vmatpush3.msra.mxu0 %v1136_v5  ;;  %25488 = vmatprep.mubr.f32.mxu0 %v29863_v53 }
  0x74   :  { %25491 = vmatprep.subr.mxu0 %v1133_v58 }
  0x7a   :  { %25489 = vmatmul.mubr.f32.vlgmr.msra.gmra.mrb[0].mxu0 %v1121_v59 }
  0x7b   :  { %25492 = vmatpush3.msra.mxu0 %v1133_v58  ;;  %25493 = vmatprep.mubr.f32.mxu0 %v1112_v56  ;;  %v2136_v56 = vand.u32 4294901760, %v2135_v55  ;;  %v2551_v58 = vrot.slane %v29827_v2, 5 }
  0x7c   :  { %25496 = vmatprep.subr.mxu0 %v29865_v54 }
  0x82   :  { %25494 = vmatmul.mubr.f32.vlgmr.msra.gmra.mrb[0].mxu0 %v1122_v62  ;;  %v2553_v62 = vrot.slane %v29835_v6, 5 }
  0x83   :  { %25497 = vmatpush3.msra.mxu0 %v29865_v54  ;;  %25498 = vmatprep.mubr.f32.mxu0 %v1113_v60  ;;  %v24038_v60 = vld [vmem:[%s33414_s1 + $0x14] sm:$0xf] }
  0x84   :  { %25501 = vmatprep.subr.mxu0 %v1134_v61  ;;  %v2560_v63 = vsel %vm41_vm0, %v24038_v60, 0  ;;  %v2554_v4 = vsel %vm2549_vm5, %v2551_v58, %v2553_v62 }
  0x85   :  { %v2557_v7 = vsel %vm36_vm2, %v2554_v4, 0  ;;  %v30009_v4 = vld [vmem:[%s33413_s0 + $0x20] sm:$0xff] }
  0x86   :  { %v2638_v9 = vand.u32 4294901760, %v2557_v7 }
  0x88   :  { %v2639_v12 = vsub.f32 %v2557_v7, %v2638_v9  ;;  %v12046_v7 = vrot.slane %v30009_v4, 1 }
  0x8a   :  { %25499 = vmatmul.mubr.f32.vlgmr.msra.gmra.mrb[0].mxu0 %v1123_v3  ;;  %v29932_v3 = vand.u32 4294901760, %v2560_v63  ;;  %v2640_v15 = vand.u32 4294901760, %v2639_v12 }
  0x8b   :  { %25502 = vmatpush3.msra.mxu0 %v1134_v61  ;;  %25503 = vmatprep.mubr.f32.mxu0 %v29863_v53 }
  0x8c   :  { %25506 = vmatprep.subr.mxu0 %v29865_v54  ;;  %v2650_v8 = vsub.f32 %v2560_v63, %v29932_v3  ;;  %v2641_v18 = vsub.f32 %v2639_v12, %v2640_v15 }
  0x8e   :  { %v2651_v11 = vand.u32 4294901760, %v2650_v8 }
  0x90   :  { %v2652_v14 = vsub.f32 %v2650_v8, %v2651_v11 }
  0x92   :  { %25504 = vmatmul.mubr.f32.vlgmr.msra.gmra.mrb[0].mxu0 %v1121_v59 }
  0x93   :  { %25507 = vmatpush3.msra.mxu0 %v29865_v54  ;;  %25508 = vmatprep.mubr.f32.mxu0 %v29863_v53  ;;  %v2126_v53 = vand.u32 4294901760, %v2125_v50  ;;  %v2147_v54 = vand.u32 4294901760, %v2146_v51 }
  0x94   :  { %25511 = vmatprep.subr.mxu0 %v1552_v17 }
  0x9a   :  { %25509 = vmatmul.mubr.f32.vlgmr.msra.gmra.mrb[0].mxu0 %v1121_v59  ;;  %v2552_v59 = vsel %vm2549_vm5, %v2550_v57, %v2551_v58 }
  0x9b   :  { %25512 = vmatpush3.msra.mxu0 %v1552_v17  ;;  %25513 = vmatprep.mubr.f32.mxu0 %v1621_v29  ;;  %v2555_v61 = vsel %vm36_vm2, %v2552_v59, 0 }
  0x9c   :  { %25516 = vmatprep.subr.mxu0 %v1642_v30  ;;  %v29930_v0 = vand.u32 4294901760, %v2555_v61 }
  0x9e   :  { %v2629_v5 = vsub.f32 %v2555_v61, %v29930_v0 }
  0xa0   :  { %v2630_v10 = vand.u32 4294901760, %v2629_v5 }
  0xa2   :  { %25514 = vmatmul.mubr.f32.vlgmr.msra.gmra.mrb[0].mxu0 %v1631_v32  ;;  %v2631_v13 = vsub.f32 %v2629_v5, %v2630_v10 }
  0xa3   :  { %25517 = vmatpush3.msra.mxu0 %v1642_v30  ;;  %25518 = vmatprep.mubr.f32.mxu0 %v29887_v16 }
  0xa4   :  { %25521 = vmatprep.subr.mxu0 %v1639_v21 }
  0xaa   :  { %25519 = vmatmul.mubr.f32.vlgmr.msra.gmra.mrb[0].mxu0 %v1627_v22 }
  0xab   :  { %25522 = vmatpush3.msra.mxu0 %v1639_v21  ;;  %25523 = vmatprep.mubr.f32.mxu0 %v1618_v19  ;;  %v2642_v19 = vand.u32 4294901760, %v2641_v18  ;;  %v3057_v21 = vrot.slane %v29827_v2, 6 }
  0xac   :  { %25526 = vmatprep.subr.mxu0 %v1552_v17 }
  0xb2   :  { %25524 = vmatmul.mubr.f32.vlgmr.msra.gmra.mrb[0].mxu0 %v1628_v25  ;;  %v3059_v25 = vrot.slane %v29835_v6, 6 }
  0xb3   :  { %25527 = vmatpush3.msra.mxu0 %v1552_v17  ;;  %25528 = vmatprep.mubr.f32.mxu0 %v1619_v23  ;;  %v24039_v23 = vld [vmem:[%s33414_s1 + $0x18] sm:$0xf] }
  0xb4   :  { %25531 = vmatprep.subr.mxu0 %v1640_v24  ;;  %v3066_v26 = vsel %vm41_vm0, %v24039_v23, 0  ;;  %v3060_v29 = vsel %vm3055_vm6, %v3057_v21, %v3059_v25 }
  0xb5   :  { %v3063_v31 = vsel %vm36_vm2, %v3060_v29, 0 }
  0xb6   :  { %v3144_v33 = vand.u32 4294901760, %v3063_v31 }
  0xb8   :  { %v3145_v36 = vsub.f32 %v3063_v31, %v3144_v33  ;;  %v12040_v31 = vld [vmem:[%s33414_s1] sm:$0xf] }
  0xba   :  { %25529 = vmatmul.mubr.f32.vlgmr.msra.gmra.mrb[0].mxu0 %v1629_v28  ;;  %v29958_v28 = vand.u32 4294901760, %v3066_v26  ;;  %v3146_v39 = vand.u32 4294901760, %v3145_v36 }
  0xbb   :  { %25532 = vmatpush3.msra.mxu0 %v1640_v24  ;;  %25533 = vmatprep.mubr.f32.mxu0 %v29887_v16 }
  0xbc   :  { %25536 = vmatprep.subr.mxu0 %v1552_v17  ;;  %v3156_v32 = vsub.f32 %v3066_v26, %v29958_v28  ;;  %v3147_v42 = vsub.f32 %v3145_v36, %v3146_v39 }
  0xbe   :  { %v3157_v35 = vand.u32 4294901760, %v3156_v32 }
  0xc0   :  { %v3158_v38 = vsub.f32 %v3156_v32, %v3157_v35 }
  0xc2   :  { %25534 = vmatmul.mubr.f32.vlgmr.msra.gmra.mrb[0].mxu0 %v1627_v22 }
  0xc3   :  { %25537 = vmatpush3.msra.mxu0 %v1552_v17  ;;  %25538 = vmatprep.mubr.f32.mxu0 %v29887_v16  ;;  %v2632_v16 = vand.u32 4294901760, %v2631_v13  ;;  %v2653_v17 = vand.u32 4294901760, %v2652_v14 }
  0xc4   :  { %25541 = vmatprep.subr.mxu0 %v29908_v41 }
  0xca   :  { %25539 = vmatmul.mubr.f32.vlgmr.msra.gmra.mrb[0].mxu0 %v1627_v22  ;;  %v3058_v22 = vsel %vm3055_vm6, %v3056_v20, %v3057_v21 }
  0xcb   :  { %25542 = vmatpush3.msra.mxu0 %v29908_v41  ;;  %25543 = vmatprep.mubr.f32.mxu0 %v2126_v53  ;;  %v3061_v24 = vsel %vm36_vm2, %v3058_v22, 0 }
  0xcc   :  { %25546 = vmatprep.subr.mxu0 %v2147_v54  ;;  %v29956_v27 = vand.u32 4294901760, %v3061_v24 }
  0xce   :  { %v3135_v30 = vsub.f32 %v3061_v24, %v29956_v27 }
  0xd0   :  { %v3136_v34 = vand.u32 4294901760, %v3135_v30 }
  0xd2   :  { %25544 = vmatmul.mubr.f32.vlgmr.msra.gmra.mrb[0].mxu0 %v2136_v56  ;;  %v3137_v37 = vsub.f32 %v3135_v30, %v3136_v34 }
  0xd3   :  { %25547 = vmatpush3.msra.mxu0 %v2147_v54  ;;  %25548 = vmatprep.mubr.f32.mxu0 %v29906_v40 }
  0xd4   :  { %25551 = vmatprep.subr.mxu0 %v2144_v45 }
  0xda   :  { %25549 = vmatmul.mubr.f32.vlgmr.msra.gmra.mrb[0].mxu0 %v2132_v46 }
  0xdb   :  { %25552 = vmatpush3.msra.mxu0 %v2144_v45  ;;  %25553 = vmatprep.mubr.f32.mxu0 %v2123_v43  ;;  %v3148_v43 = vand.u32 4294901760, %v3147_v42  ;;  %v3563_v45 = vrot.slane %v29827_v2, 7 }
  0xdc   :  { %25556 = vmatprep.subr.mxu0 %v29908_v41 }
  0xe2   :  { %25554 = vmatmul.mubr.f32.vlgmr.msra.gmra.mrb[0].mxu0 %v2133_v49  ;;  %v3565_v49 = vrot.slane %v29835_v6, 7 }
  0xe3   :  { %25557 = vmatpush3.msra.mxu0 %v29908_v41  ;;  %25558 = vmatprep.mubr.f32.mxu0 %v2124_v47  ;;  %v24040_v47 = vld [vmem:[%s33414_s1 + $0x1c] sm:$0xf] }
  0xe4   :  { %25561 = vmatprep.subr.mxu0 %v2145_v48  ;;  %v3572_v1 = vsel %vm41_vm0, %v24040_v47, 0  ;;  %v3566_v51 = vsel %vm3561_vm7, %v3563_v45, %v3565_v49 }
  0xe5   :  { %v29984_v2 = vand.u32 4294901760, %v3572_v1  ;;  %v3569_v53 = vsel %vm36_vm2, %v3566_v51, 0  ;;  %v24106_v51 = vld [vmem:[%s33414_s1 + $0x8] sm:$0xf] }
  0xe6   :  { %v29992_v54 = vand.u32 4294901760, %v3569_v53 }
  0xe7   :  { %v3662_v6 = vsub.f32 %v3572_v1, %v29984_v2 }
  0xe8   :  { %v3651_v57 = vsub.f32 %v3569_v53, %v29992_v54 }
  0xe9   :  { %v3663_v56 = vand.u32 4294901760, %v3662_v6 }
  0xea   :  { %25559 = vmatmul.mubr.f32.vlgmr.msra.gmra.mrb[0].mxu0 %v2134_v52  ;;  %v3652_v60 = vand.u32 4294901760, %v3651_v57 }
  0xeb   :  { %25562 = vmatpush3.msra.mxu0 %v2145_v48  ;;  %25563 = vmatprep.mubr.f32.mxu0 %v29906_v40  ;;  %v3664_v59 = vsub.f32 %v3662_v6, %v3663_v56 }
  0xec   :  { %25566 = vmatprep.subr.mxu0 %v29908_v41  ;;  %v3653_v63 = vsub.f32 %v3651_v57, %v3652_v60 }
  0xed   :  { %v3665_v62 = vand.u32 4294901760, %v3664_v59 }
  0xf2   :  { %25564 = vmatmul.mubr.f32.vlgmr.msra.gmra.mrb[0].mxu0 %v2132_v46 }
  0xf3   :  { %25567 = vmatpush3.msra.mxu0 %v29908_v41  ;;  %25568 = vmatprep.mubr.f32.mxu0 %v29906_v40  ;;  %v3138_v40 = vand.u32 4294901760, %v3137_v37  ;;  %v3159_v41 = vand.u32 4294901760, %v3158_v38  ;;  %v12548_v37 = vsel %vm36_vm2, %v30009_v4, 0 }
  0xf4   :  { %25571 = vmatprep.subr.mxu0 %v29932_v3 }
  0xfa   :  { %25569 = vmatmul.mubr.f32.vlgmr.msra.gmra.mrb[0].mxu0 %v2132_v46  ;;  %v3564_v46 = vsel %vm3561_vm7, %v3562_v44, %v3563_v45 }
  0xfb   :  { %25572 = vmatpush3.msra.mxu0 %v29932_v3  ;;  %25573 = vmatprep.mubr.f32.mxu0 %v2632_v16  ;;  %v3567_v48 = vsel %vm36_vm2, %v3564_v46, 0 }
  0xfc   :  { %25576 = vmatprep.subr.mxu0 %v2653_v17  ;;  %v29982_v50 = vand.u32 4294901760, %v3567_v48 }
  0xfe   :  { %v3641_v52 = vsub.f32 %v3567_v48, %v29982_v50 }
 0x100   :  { %v3642_v55 = vand.u32 4294901760, %v3641_v52 }
 0x102   :  { %25574 = vmatmul.mubr.f32.vlgmr.msra.gmra.mrb[0].mxu0 %v2642_v19  ;;  %v3643_v58 = vsub.f32 %v3641_v52, %v3642_v55 }
 0x103   :  { %25577 = vmatpush3.msra.mxu0 %v2653_v17  ;;  %25578 = vmatprep.mubr.f32.mxu0 %v29930_v0 }
 0x104   :  { %25581 = vmatprep.subr.mxu0 %v2650_v8  ;;  %v3644_v61 = vand.u32 4294901760, %v3643_v58 }
 0x10a   :  { %25579 = vmatmul.mubr.f32.vlgmr.msra.gmra.mrb[0].mxu0 %v2638_v9 }
 0x10b   :  { %25582 = vmatpush3.msra.mxu0 %v2650_v8  ;;  %25583 = vmatprep.mubr.f32.mxu0 %v2629_v5  ;;  %v30017_v8 = vld [vmem:[%s33413_s0 + $0x28] sm:$0x7f] }
 0x10c   :  { %25586 = vmatprep.subr.mxu0 %v29932_v3  ;;  %v13046_v53 = vrot.slane %v30017_v8, 2 }
 0x112   :  { %25584 = vmatmul.mubr.f32.vlgmr.msra.gmra.mrb[0].mxu0 %v2639_v12 }
 0x113   :  { %25587 = vmatpush3.msra.mxu0 %v29932_v3  ;;  %25588 = vmatprep.mubr.f32.mxu0 %v2630_v10 }
 0x114   :  { %25591 = vmatprep.subr.mxu0 %v2651_v11 }
 0x11a   :  { %25589 = vmatmul.mubr.f32.vlgmr.msra.gmra.mrb[0].mxu0 %v2640_v15 }
 0x11b   :  { %25592 = vmatpush3.msra.mxu0 %v2651_v11  ;;  %25593 = vmatprep.mubr.f32.mxu0 %v29930_v0  ;;  %v24105_v11 = vld [vmem:[%s33414_s1 + $0x4] sm:$0xf] }
 0x11c   :  { %25596 = vmatprep.subr.mxu0 %v29932_v3  ;;  %v12055_v14 = vsel %vm41_vm0, %v24105_v11, 0 }
 0x11d   :  { %v12058_v17 = vand.u32 4294901760, %v12055_v14 }
 0x11f   :  { %v12145_v20 = vsub.f32 %v12055_v14, %v12058_v17  ;;  %v13548_v14 = vrot.slane %v30009_v4, 3 }
 0x121   :  { %v12146_v23 = vand.u32 4294901760, %v12145_v20 }
 0x122   :  { %25594 = vmatmul.mubr.f32.vlgmr.msra.gmra.mrb[0].mxu0 %v2638_v9 }
 0x123   :  { %25597 = vmatpush3.msra.mxu0 %v29932_v3  ;;  %25598 = vmatprep.mubr.f32.mxu0 %v29930_v0  ;;  %v3654_v0 = vand.u32 4294901760, %v3653_v63  ;;  %v30004_v3 = vld [vmem:[%s33413_s0 + $0x18] sm:$0xff]  ;;  %v12147_v26 = vsub.f32 %v12145_v20, %v12146_v23 }
 0x124   :  { %25601 = vmatprep.subr.mxu0 %v29958_v28  ;;  %v12045_v5 = vrot.slane %v30004_v3, 1  ;;  %v13043_v1 = vrot.slane %v30004_v3, 2 }
 0x125   :  { %v12148_v29 = vand.u32 4294901760, %v12147_v26 }
 0x126   :  { %v12047_v10 = vsel %vm30_vm1, %v12045_v5, %v12046_v7 }
 0x127   :  { %v12050_v12 = vsel %vm36_vm2, %v12047_v10, 0 }
 0x128   :  { %v12123_v15 = vand.u32 4294901760, %v12050_v12 }
 0x12a   :  { %25599 = vmatmul.mubr.f32.vlgmr.msra.gmra.mrb[0].mxu0 %v2638_v9  ;;  %v12048_v9 = vrot.slane %v30017_v8, 1  ;;  %v12124_v19 = vsub.f32 %v12050_v12, %v12123_v15 }
 0x12b   :  { %25602 = vmatpush3.msra.mxu0 %v29958_v28  ;;  %25603 = vmatprep.mubr.f32.mxu0 %v3138_v40 }
 0x12c   :  { %25606 = vmatprep.subr.mxu0 %v3159_v41  ;;  %v12049_v13 = vsel %vm30_vm1, %v12046_v7, %v12048_v9  ;;  %v12125_v22 = vand.u32 4294901760, %v12124_v19 }
 0x12d   :  { %v12052_v16 = vsel %vm36_vm2, %v12049_v13, 0  ;;  %v13547_v13 = vrot.slane %v30004_v3, 3 }
 0x12e   :  { %v12133_v18 = vand.u32 4294901760, %v12052_v16  ;;  %v12126_v25 = vsub.f32 %v12124_v19, %v12125_v22 }
 0x130   :  { %v12134_v21 = vsub.f32 %v12052_v16, %v12133_v18  ;;  %v13549_v16 = vsel %vm1538_vm4, %v13547_v13, %v13548_v14  ;;  %v14054_v13 = vrot.slane %v30017_v8, 4 }
 0x132   :  { %25604 = vmatmul.mubr.f32.vlgmr.msra.gmra.mrb[0].mxu0 %v3148_v43  ;;  %v12135_v24 = vand.u32 4294901760, %v12134_v21 }
 0x133   :  { %25607 = vmatpush3.msra.mxu0 %v3159_v41  ;;  %25608 = vmatprep.mubr.f32.mxu0 %v29956_v27 }
 0x134   :  { %25611 = vmatprep.subr.mxu0 %v3156_v32 }
 0x13a   :  { %25609 = vmatmul.mubr.f32.vlgmr.msra.gmra.mrb[0].mxu0 %v3144_v33 }
 0x13b   :  { %25612 = vmatpush3.msra.mxu0 %v3156_v32  ;;  %25613 = vmatprep.mubr.f32.mxu0 %v3135_v30  ;;  %v12546_v32 = vsel %vm36_vm2, %v30004_v3, 0 }
 0x13c   :  { %25616 = vmatprep.subr.mxu0 %v29958_v28 }
 0x142   :  { %25614 = vmatmul.mubr.f32.vlgmr.msra.gmra.mrb[0].mxu0 %v3145_v36 }
 0x143   :  { %25617 = vmatpush3.msra.mxu0 %v29958_v28  ;;  %25618 = vmatprep.mubr.f32.mxu0 %v3136_v34  ;;  %v12619_v34 = vand.u32 4294901760, %v12546_v32 }
 0x144   :  { %25621 = vmatprep.subr.mxu0 %v3157_v35 }
 0x145   :  { %v12620_v36 = vsub.f32 %v12546_v32, %v12619_v34  ;;  %v4129_v32 = vld [vmem:[%s33416_s3] sm:$0xff] }
 0x147   :  { %v12621_v40 = vand.u32 4294901760, %v12620_v36 }
 0x149   :  { %v12622_v43 = vsub.f32 %v12620_v36, %v12621_v40 }
 0x14a   :  { %25619 = vmatmul.mubr.f32.vlgmr.msra.gmra.mrb[0].mxu0 %v3146_v39  ;;  %v12629_v39 = vand.u32 4294901760, %v12548_v37 }
 0x14b   :  { %25622 = vmatpush3.msra.mxu0 %v3157_v35  ;;  %25623 = vmatprep.mubr.f32.mxu0 %v29956_v27  ;;  %v12623_v46 = vand.u32 4294901760, %v12622_v43  ;;  %v4131_v43 = vld [vmem:[%s33416_s3 + $0x10] sm:$0xff] }
 0x14c   :  { %25626 = vmatprep.subr.mxu0 %v29958_v28  ;;  %v12630_v42 = vsub.f32 %v12548_v37, %v12629_v39 }
 0x14e   :  { %v12631_v45 = vand.u32 4294901760, %v12630_v42 }
 0x150   :  { %v12632_v48 = vsub.f32 %v12630_v42, %v12631_v45 }
 0x152   :  { %25624 = vmatmul.mubr.f32.vlgmr.msra.gmra.mrb[0].mxu0 %v3144_v33  ;;  %v12633_v49 = vand.u32 4294901760, %v12632_v48 }
 0x153   :  { %25627 = vmatpush3.msra.mxu0 %v29958_v28  ;;  %25628 = vmatprep.mubr.f32.mxu0 %v29956_v27  ;;  %v12136_v27 = vsub.f32 %v12134_v21, %v12135_v24  ;;  %v12127_v28 = vand.u32 4294901760, %v12126_v25 }
 0x154   :  { %25631 = vmatprep.subr.mxu0 %v29984_v2 }
 0x155   :  { %v12137_v30 = vand.u32 4294901760, %v12136_v27 }
 0x15a   :  { %25629 = vmatmul.mubr.f32.vlgmr.msra.gmra.mrb[0].mxu0 %v3144_v33  ;;  %v12551_v33 = vsel %vm41_vm0, %v12040_v31, 0 }
 0x15b   :  { %25632 = vmatpush3.msra.mxu0 %v29984_v2  ;;  %25633 = vmatprep.mubr.f32.mxu0 %v3644_v61  ;;  %v12554_v35 = vand.u32 4294901760, %v12551_v33 }
 0x15c   :  { %25636 = vmatprep.subr.mxu0 %v3665_v62 }
 0x15d   :  { %v12641_v38 = vsub.f32 %v12551_v33, %v12554_v35  ;;  %v4130_v33 = vld [vmem:[%s33416_s3 + $0x8] sm:$0xff] }
 0x15f   :  { %v12642_v41 = vand.u32 4294901760, %v12641_v38 }
 0x161   :  { %v12643_v44 = vsub.f32 %v12641_v38, %v12642_v41 }
 0x162   :  { %25634 = vmatmul.mubr.f32.vlgmr.msra.gmra.mrb[0].mxu0 %v3654_v0 }
 0x163   :  { %25637 = vmatpush3.msra.mxu0 %v3665_v62  ;;  %25638 = vmatprep.mubr.f32.mxu0 %v29982_v50  ;;  %v12644_v47 = vand.u32 4294901760, %v12643_v44  ;;  %v4132_v44 = vld [vmem:[%s33416_s3 + $0x18] sm:$0xff] }
 0x164   :  { %25641 = vmatprep.subr.mxu0 %v3662_v6 }
 0x16a   :  { %25639 = vmatmul.mubr.f32.vlgmr.msra.gmra.mrb[0].mxu0 %v29992_v54 }
 0x16b   :  { %25642 = vmatpush3.msra.mxu0 %v3662_v6  ;;  %25643 = vmatprep.mubr.f32.mxu0 %v3641_v52  ;;  %v13053_v6 = vsel %vm41_vm0, %v24106_v51, 0 }
 0x16c   :  { %25646 = vmatprep.subr.mxu0 %v29984_v2 }
 0x172   :  { %25644 = vmatmul.mubr.f32.vlgmr.msra.gmra.mrb[0].mxu0 %v3651_v57 }
 0x173   :  { %25647 = vmatpush3.msra.mxu0 %v29984_v2  ;;  %25648 = vmatprep.mubr.f32.mxu0 %v3642_v55  ;;  %v13056_v55 = vand.u32 4294901760, %v13053_v6 }
 0x174   :  { %25651 = vmatprep.subr.mxu0 %v3663_v56 }
 0x175   :  { %v13143_v59 = vsub.f32 %v13053_v6, %v13056_v55  ;;  %v29784_v6 = vmov 0.0  }
 0x176   :  { %25669 = vmatprep.mubr.msk.f32.mxu1 %vm29783_vm8, %v29784_v6 }
 0x177   :  { %v13144_v62 = vand.u32 4294901760, %v13143_v59 }
 0x179   :  { %v13145_v5 = vsub.f32 %v13143_v59, %v13144_v62 }
 0x17a   :  { %25649 = vmatmul.mubr.f32.vlgmr.msra.gmra.mrb[0].mxu0 %v3652_v60 }
 0x17b   :  { %25652 = vmatpush3.msra.mxu0 %v3663_v56  ;;  %25653 = vmatprep.mubr.f32.mxu0 %v29982_v50  ;;  %v13146_v10 = vand.u32 4294901760, %v13145_v5 }
 0x17c   :  { %25656 = vmatprep.subr.mxu0 %v29984_v2 }
 0x182   :  { %25654 = vmatmul.mubr.f32.vlgmr.msra.gmra.mrb[0].mxu0 %v29992_v54 }
 0x183   :  { %25657 = vmatpush3.msra.mxu0 %v29984_v2  ;;  %25658 = vmatprep.mubr.f32.mxu0 %v29982_v50  ;;  %v13044_v50 = vrot.slane %v30009_v4, 2 }
 0x184   :  { %26717 = vmatprep.subr.mxu0 %v12058_v17 }
 0x185   :  { %v13045_v2 = vsel %vm1032_vm3, %v13043_v1, %v13044_v50  ;;  %v13047_v56 = vsel %vm1032_vm3, %v13044_v50, %v13046_v53 }
 0x186   :  { %v13048_v52 = vsel %vm36_vm2, %v13045_v2, 0  ;;  %v13050_v58 = vsel %vm36_vm2, %v13047_v56, 0 }
 0x187   :  { %v30057_v60 = vand.u32 4294901760, %v13050_v58 }
 0x189   :  { %v13132_v63 = vsub.f32 %v13050_v58, %v30057_v60 }
 0x18a   :  { %25659 = vmatmul.mubr.f32.vlgmr.msra.gmra.mrb[0].mxu0 %v29992_v54  ;;  %v30052_v54 = vand.u32 4294901760, %v13048_v52 }
 0x18b   :  { %26718 = vmatpush3.msra.mxu0 %v12058_v17  ;;  %26719 = vmatprep.mubr.f32.mxu0 %v12127_v28  ;;  %v13133_v7 = vand.u32 4294901760, %v13132_v63 }
 0x18c   :  { %26722 = vmatprep.subr.mxu0 %v12148_v29  ;;  %v13122_v57 = vsub.f32 %v13048_v52, %v30052_v54 }
 0x18d   :  { %v13134_v11 = vsub.f32 %v13132_v63, %v13133_v7 }
 0x18e   :  { %26720 = vmatmul.mubr.f32.vlgmr.msra.gmra.mrb[2].mxu0 %v12137_v30  ;;  %v13123_v61 = vand.u32 4294901760, %v13122_v57 }
 0x18f   :  { %26723 = vmatpush3.msra.mxu0 %v12148_v29  ;;  %26724 = vmatprep.mubr.f32.mxu0 %v12123_v15  ;;  %v13135_v12 = vand.u32 4294901760, %v13134_v11  ;;  %v24108_v11 = vld [vmem:[%s33414_s1 + $0x10] sm:$0xf] }
 0x190   :  { %26727 = vmatprep.subr.mxu0 %v12145_v20  ;;  %v13124_v0 = vsub.f32 %v13122_v57, %v13123_v61 }
 0x192   :  { %v13125_v9 = vand.u32 4294901760, %v13124_v0 }
 0x196   :  { %26725 = vmatmul.mubr.f32.vlgmr.msra.gmra.mrb[2].mxu0 %v12133_v18 }
 0x197   :  { %26728 = vmatpush3.msra.mxu0 %v12145_v20  ;;  %26729 = vmatprep.mubr.f32.mxu0 %v12124_v19  ;;  %v13552_v19 = vsel %vm36_vm2, %v13549_v16, 0 }
 0x198   :  { %26732 = vmatprep.subr.mxu0 %v12058_v17 }
 0x19e   :  { %26730 = vmatmul.mubr.f32.vlgmr.msra.gmra.mrb[2].mxu0 %v12134_v21  ;;  %v30073_v21 = vand.u32 4294901760, %v13552_v19 }
 0x19f   :  { %26733 = vmatpush3.msra.mxu0 %v12058_v17  ;;  %26734 = vmatprep.mubr.f32.mxu0 %v12125_v22 }
 0x1a0   :  { %26737 = vmatprep.subr.mxu0 %v12146_v23 }
 0x1a6   :  { %26735 = vmatmul.mubr.f32.vlgmr.msra.gmra.mrb[2].mxu0 %v12135_v24  ;;  %v30079_v24 = vsub.f32 %v13552_v19, %v30073_v21 }
 0x1a7   :  { %26738 = vmatpush3.msra.mxu0 %v12146_v23  ;;  %26739 = vmatprep.mubr.f32.mxu0 %v12123_v15 }
 0x1a8   :  { %26742 = vmatprep.subr.mxu0 %v12058_v17  ;;  %v13627_v27 = vand.u32 4294901760, %v30079_v24 }
 0x1aa   :  { %v13628_v30 = vsub.f32 %v30079_v24, %v13627_v27 }
 0x1ae   :  { %26740 = vmatmul.mubr.f32.vlgmr.msra.gmra.mrb[2].mxu0 %v12133_v18 }
 0x1af   :  { %26743 = vmatpush3.msra.mxu0 %v12058_v17  ;;  %26744 = vmatprep.mubr.f32.mxu0 %v12123_v15  ;;  %v24107_v15 = vld [vmem:[%s33414_s1 + $0xc] sm:$0xf]  ;;  %v13550_v17 = vrot.slane %v30017_v8, 3 }
 0x1b0   :  { %26747 = vmatprep.subr.mxu0 %v12554_v35 }
 0x1b1   :  { %v13551_v22 = vsel %vm1538_vm4, %v13548_v14, %v13550_v17  ;;  %v14061_v14 = vsel %vm41_vm0, %v24108_v11, 0 }
 0x1b2   :  { %v13554_v23 = vsel %vm36_vm2, %v13551_v22, 0  ;;  %v30178_v17 = vand.u32 4294901760, %v14061_v14 }
 0x1b3   :  { %v30084_v26 = vand.u32 4294901760, %v13554_v23 }
 0x1b5   :  { %v30091_v29 = vsub.f32 %v13554_v23, %v30084_v26 }
 0x1b6   :  { %26745 = vmatmul.mubr.f32.vlgmr.msra.gmra.mrb[2].mxu0 %v12133_v18  ;;  %v13557_v18 = vsel %vm41_vm0, %v24107_v15, 0 }
 0x1b7   :  { %26748 = vmatpush3.msra.mxu0 %v12554_v35  ;;  %26749 = vmatprep.mubr.f32.mxu0 %v12623_v46  ;;  %v30071_v20 = vand.u32 4294901760, %v13557_v18  ;;  %v13637_v37 = vand.u32 4294901760, %v30091_v29  ;;  %v4147_v46 = vand.u32 4294901760, %v4132_v44 }
 0x1b8   :  { %26752 = vmatprep.subr.mxu0 %v12644_v47 }
 0x1b9   :  { %v30082_v25 = vsub.f32 %v13557_v18, %v30071_v20  ;;  %v30133_v2 = vsub.f32 %v4132_v44, %v4147_v46 }
 0x1bb   :  { %v30088_v28 = vand.u32 4294901760, %v30082_v25  ;;  %v4240_v56 = vand.u32 4294901760, %v30133_v2 }
 0x1bd   :  { %v13649_v31 = vsub.f32 %v30082_v25, %v30088_v28 }
 0x1be   :  { %26750 = vmatmul.mubr.f32.vlgmr.msra.gmra.mrb[2].mxu0 %v12633_v49  ;;  %v13638_v49 = vsub.f32 %v30091_v29, %v13637_v37 }
 0x1bf   :  { %26753 = vmatpush3.msra.mxu0 %v12644_v47  ;;  %26754 = vmatprep.mubr.f32.mxu0 %v12619_v34 }
 0x1c0   :  { %26757 = vmatprep.subr.mxu0 %v12641_v38 }
 0x1c6   :  { %26755 = vmatmul.mubr.f32.vlgmr.msra.gmra.mrb[2].mxu0 %v12629_v39 }
 0x1c7   :  { %26758 = vmatpush3.msra.mxu0 %v12641_v38  ;;  %26759 = vmatprep.mubr.f32.mxu0 %v12620_v36  ;;  %v4141_v36 = vand.u32 4294901760, %v4130_v33 }
 0x1c8   :  { %26762 = vmatprep.subr.mxu0 %v12554_v35 }
 0x1ce   :  { %26760 = vmatmul.mubr.f32.vlgmr.msra.gmra.mrb[2].mxu0 %v12630_v42  ;;  %v13650_v42 = vand.u32 4294901760, %v13649_v31 }
 0x1cf   :  { %26763 = vmatpush3.msra.mxu0 %v12554_v35  ;;  %26764 = vmatprep.mubr.f32.mxu0 %v12621_v40  ;;  %v30113_v40 = vsub.f32 %v4130_v33, %v4141_v36 }
 0x1d0   :  { %26767 = vmatprep.subr.mxu0 %v12642_v41 }
 0x1d1   :  { %v4226_v48 = vand.u32 4294901760, %v30113_v40 }
 0x1d3   :  { %v4227_v52 = vsub.f32 %v30113_v40, %v4226_v48 }
 0x1d6   :  { %26765 = vmatmul.mubr.f32.vlgmr.msra.gmra.mrb[2].mxu0 %v12631_v45  ;;  %v4144_v45 = vand.u32 4294901760, %v4131_v43 }
 0x1d7   :  { %26768 = vmatpush3.msra.mxu0 %v12642_v41  ;;  %26769 = vmatprep.mubr.f32.mxu0 %v12619_v34  ;;  %v13629_v41 = vand.u32 4294901760, %v13628_v30 }
 0x1d8   :  { %26772 = vmatprep.subr.mxu0 %v12554_v35  ;;  %v30129_v1 = vpack.c.bf16 %v4147_v46, %v4144_v45  ;;  %v30131_v50 = vsub.f32 %v4131_v43, %v4144_v45  ;;  %v24109_v45 = vld [vmem:[%s33414_s1 + $0x14] sm:$0xf] }
 0x1da   :  { %v28029_v5 = vpack.c.bf16 %v30133_v2, %v30131_v50 }
 0x1de   :  { %26770 = vmatmul.mubr.f32.vlgmr.msra.gmra.mrb[2].mxu0 %v12629_v39 }
 0x1df   :  { %26773 = vmatpush3.msra.mxu0 %v12554_v35  ;;  %26774 = vmatprep.mubr.f32.mxu0 %v12619_v34  ;;  %v29782_v34 = vmov 0.0|0.0   ;;  %v4138_v35 = vand.u32 4294901760, %v4129_v32 }
 0x1e0   :  { %26777 = vmatprep.subr.mxu0 %v13056_v55  ;;  %28013 = vmatprep.subr.bf16.mxu1 %v29782_v34 }
 0x1e1   :  { %v30109_v38 = vpack.c.bf16 %v4141_v36, %v4138_v35 }
 0x1e3   :  { %28015 = vmatpush3.bf16.msra.mxu1 %v30109_v38 }
 0x1e4   :  { %28016 = vmatprep.subr.bf16.mxu1 %v29782_v34 }
 0x1e6   :  { %26775 = vmatmul.mubr.f32.vlgmr.msra.gmra.mrb[2].mxu0 %v12629_v39  ;;  %v30111_v39 = vsub.f32 %v4129_v32, %v4138_v35 }
 0x1e7   :  { %26778 = vmatpush3.msra.mxu0 %v13056_v55  ;;  %26779 = vmatprep.mubr.f32.mxu0 %v13125_v9  ;;  %v14052_v9 = vrot.slane %v30009_v4, 4 }
 0x1e8   :  { %26782 = vmatprep.subr.mxu0 %v13146_v10  ;;  %v4219_v47 = vand.u32 4294901760, %v30111_v39  ;;  %28018 = vmatpush3.bf16.msra.mxu1 %v30129_v1  ;;  %v28026_v0 = vpack.c.bf16 %v30113_v40, %v30111_v39  ;;  %v24042_v40 = vld [vmem:[%s33416_s3 + $0x20] sm:$0xff] }
 0x1e9   :  { %28019 = vmatprep.subr.bf16.mxu1 %v29782_v34  ;;  %v14055_v18 = vsel %vm41_vm0, %v14052_v9, %v14054_v13 }
 0x1ea   :  { %v4220_v51 = vsub.f32 %v30111_v39, %v4219_v47  ;;  %v30176_v16 = vpack.c.bf16 %v4226_v48, %v4219_v47  ;;  %v14058_v23 = vsel %vm36_vm2, %v14055_v18, 0  ;;  %v14558_v48 = vrot.slane %v30017_v8, 5 }
 0x1ec   :  { %v4221_v53 = vand.u32 4294901760, %v4220_v51  ;;  %v14565_v51 = vsel %vm41_vm0, %v24109_v45, 0 }
 0x1ee   :  { %26780 = vmatmul.mubr.f32.vlgmr.msra.gmra.mrb[2].mxu0 %v13135_v12 }
 0x1ef   :  { %26783 = vmatpush3.msra.mxu0 %v13146_v10  ;;  %26784 = vmatprep.mubr.f32.mxu0 %v30052_v54 }
 0x1f0   :  { %26787 = vmatprep.subr.mxu0 %v13143_v59 }
 0x1f6   :  { %26785 = vmatmul.mubr.f32.vlgmr.msra.gmra.mrb[2].mxu0 %v30057_v60 }
 0x1f7   :  { %26788 = vmatpush3.msra.mxu0 %v13143_v59  ;;  %26789 = vmatprep.mubr.f32.mxu0 %v13122_v57  ;;  %v13639_v57 = vand.u32 4294901760, %v13638_v49 }
 0x1f8   :  { %26792 = vmatprep.subr.mxu0 %v13056_v55 }
 0x1fe   :  { %26790 = vmatmul.mubr.f32.vlgmr.msra.gmra.mrb[2].mxu0 %v13132_v63 }
 0x1ff   :  { %26793 = vmatpush3.msra.mxu0 %v13056_v55  ;;  %26794 = vmatprep.mubr.f32.mxu0 %v13123_v61 }
 0x200   :  { %26797 = vmatprep.subr.mxu0 %v13144_v62 }
 0x206   :  { %26795 = vmatmul.mubr.f32.vlgmr.msra.gmra.mrb[2].mxu0 %v13133_v7  ;;  %v14051_v7 = vrot.slane %v30004_v3, 4 }
 0x207   :  { %26798 = vmatpush3.msra.mxu0 %v13144_v62  ;;  %26799 = vmatprep.mubr.f32.mxu0 %v30052_v54 }
 0x208   :  { %26802 = vmatprep.subr.mxu0 %v13056_v55  ;;  %v14053_v10 = vsel %vm41_vm0, %v14051_v7, %v14052_v9 }
 0x209   :  { %v14056_v12 = vsel %vm36_vm2, %v14053_v10, 0 }
 0x20a   :  { %v30174_v15 = vand.u32 4294901760, %v14056_v12 }
 0x20c   :  { %v14130_v22 = vsub.f32 %v14056_v12, %v30174_v15 }
 0x20e   :  { %26800 = vmatmul.mubr.f32.vlgmr.msra.gmra.mrb[2].mxu0 %v30057_v60 }
 0x20f   :  { %26803 = vmatpush3.msra.mxu0 %v13056_v55  ;;  %26804 = vmatprep.mubr.f32.mxu0 %v30052_v54  ;;  %v4228_v54 = vand.u32 4294901760, %v4227_v52  ;;  %v4233_v55 = vand.u32 4294901760, %v30131_v50 }
 0x210   :  { %26807 = vmatprep.subr.mxu0 %v30071_v20 }
 0x211   :  { %v30144_v58 = vpack.c.bf16 %v4228_v54, %v4221_v53  ;;  %v4234_v59 = vsub.f32 %v30131_v50, %v4233_v55  ;;  %v30183_v19 = vpack.c.bf16 %v4240_v56, %v4233_v55  ;;  %v30226_v54 = vand.u32 4294901760, %v14565_v51  ;;  %v24043_v50 = vld [vmem:[%s33416_s3 + $0x28] sm:$0xff] }
 0x213   :  { %v4235_v61 = vand.u32 4294901760, %v4234_v59 }
 0x216   :  { %26805 = vmatmul.mubr.f32.vlgmr.msra.gmra.mrb[2].mxu0 %v30057_v60  ;;  %v4241_v60 = vsub.f32 %v30133_v2, %v4240_v56 }
 0x217   :  { %26808 = vmatpush3.msra.mxu0 %v30071_v20  ;;  %26809 = vmatprep.mubr.f32.mxu0 %v13629_v41 }
 0x218   :  { %26812 = vmatprep.subr.mxu0 %v13650_v42  ;;  %v4242_v62 = vand.u32 4294901760, %v4241_v60 }
 0x21a   :  { %v30149_v63 = vpack.c.bf16 %v4242_v62, %v4235_v61  ;;  %v14655_v61 = vsub.f32 %v14565_v51, %v30226_v54  ;;  %v24110_v51 = vld [vmem:[%s33414_s1 + $0x18] sm:$0xf] }
 0x21c   :  { %v30236_v9 = vand.u32 4294901760, %v14655_v61 }
 0x21e   :  { %26810 = vmatmul.mubr.f32.vlgmr.msra.gmra.mrb[2].mxu0 %v13639_v57  ;;  %v14657_v13 = vsub.f32 %v14655_v61, %v30236_v9 }
 0x21f   :  { %26813 = vmatpush3.msra.mxu0 %v13650_v42  ;;  %26814 = vmatprep.mubr.f32.mxu0 %v30073_v21 }
 0x220   :  { %26817 = vmatprep.subr.mxu0 %v30082_v25 }
 0x226   :  { %26815 = vmatmul.mubr.f32.vlgmr.msra.gmra.mrb[2].mxu0 %v30084_v26 }
 0x227   :  { %26818 = vmatpush3.msra.mxu0 %v30082_v25  ;;  %26819 = vmatprep.mubr.f32.mxu0 %v30079_v24  ;;  %v14151_v24 = vsub.f32 %v14061_v14, %v30178_v17  ;;  %v30191_v25 = vand.u32 4294901760, %v14058_v23 }
 0x228   :  { %26822 = vmatprep.subr.mxu0 %v30071_v20 }
 0x229   :  { %v14152_v30 = vand.u32 4294901760, %v14151_v24 }
 0x22b   :  { %v14153_v31 = vsub.f32 %v14151_v24, %v14152_v30 }
 0x22d   :  { %v14154_v35 = vand.u32 4294901760, %v14153_v31 }
 0x22e   :  { %26820 = vmatmul.mubr.f32.vlgmr.msra.gmra.mrb[2].mxu0 %v30091_v29  ;;  %v14140_v29 = vsub.f32 %v14058_v23, %v30191_v25 }
 0x22f   :  { %26823 = vmatpush3.msra.mxu0 %v30071_v20  ;;  %26824 = vmatprep.mubr.f32.mxu0 %v13627_v27  ;;  %v14131_v27 = vand.u32 4294901760, %v14130_v22 }
 0x230   :  { %26827 = vmatprep.subr.mxu0 %v30088_v28  ;;  %v14141_v32 = vand.u32 4294901760, %v14140_v29 }
 0x232   :  { %v14142_v36 = vsub.f32 %v14140_v29, %v14141_v32 }
 0x236   :  { %26825 = vmatmul.mubr.f32.vlgmr.msra.gmra.mrb[2].mxu0 %v13637_v37  ;;  %v14143_v37 = vand.u32 4294901760, %v14142_v36 }
 0x237   :  { %26828 = vmatpush3.msra.mxu0 %v30088_v28  ;;  %26829 = vmatprep.mubr.f32.mxu0 %v30073_v21  ;;  %v14132_v28 = vsub.f32 %v14130_v22, %v14131_v27 }
 0x238   :  { %26832 = vmatprep.subr.mxu0 %v30071_v20 }
 0x239   :  { %v14133_v33 = vand.u32 4294901760, %v14132_v28 }
 0x23e   :  { %26830 = vmatmul.mubr.f32.vlgmr.msra.gmra.mrb[2].mxu0 %v30084_v26 }
 0x23f   :  { %26833 = vmatpush3.msra.mxu0 %v30071_v20  ;;  %26834 = vmatprep.mubr.f32.mxu0 %v30073_v21  ;;  %v14555_v20 = vrot.slane %v30004_v3, 5  ;;  %v14556_v21 = vrot.slane %v30009_v4, 5 }
 0x240   :  { %26837 = vmatprep.subr.mxu0 %v30178_v17 }
 0x241   :  { %v14557_v42 = vsel %vm2549_vm5, %v14555_v20, %v14556_v21  ;;  %v14559_v55 = vsel %vm2549_vm5, %v14556_v21, %v14558_v48 }
 0x242   :  { %v14560_v47 = vsel %vm36_vm2, %v14557_v42, 0  ;;  %v14562_v60 = vsel %vm36_vm2, %v14559_v55, 0 }
 0x243   :  { %v30224_v53 = vand.u32 4294901760, %v14560_v47  ;;  %v30234_v62 = vand.u32 4294901760, %v14562_v60 }
 0x245   :  { %v14634_v59 = vsub.f32 %v14560_v47, %v30224_v53  ;;  %v30240_v10 = vsub.f32 %v14562_v60, %v30234_v62 }
 0x246   :  { %26835 = vmatmul.mubr.f32.vlgmr.msra.gmra.mrb[2].mxu0 %v30084_v26  ;;  %v24041_v26 = vld [vmem:[%s33415_s2] ss:$0 sm:$0xff] }
 0x247   :  { %26838 = vmatpush3.msra.mxu0 %v30178_v17  ;;  %26839 = vmatprep.mubr.f32.mxu0 %v14133_v33  ;;  %v14635_v7 = vand.u32 4294901760, %v14634_v59  ;;  %v14645_v14 = vand.u32 4294901760, %v30240_v10 }
 0x248   :  { %26842 = vmatprep.subr.mxu0 %v14154_v35 }
 0x249   :  { %v14636_v12 = vsub.f32 %v14634_v59, %v14635_v7 }
 0x24b   :  { %v14637_v23 = vand.u32 4294901760, %v14636_v12 }
 0x24e   :  { %26840 = vmatmul.mubr.f32.vlgmr.msra.gmra.mrb[2].mxu0 %v14143_v37 }
 0x24f   :  { %26843 = vmatpush3.msra.mxu0 %v14154_v35  ;;  %26844 = vmatprep.mubr.f32.mxu0 %v30174_v15 }
 0x250   :  { %26847 = vmatprep.subr.mxu0 %v14151_v24 }
 0x256   :  { %26845 = vmatmul.mubr.f32.vlgmr.msra.gmra.mrb[2].mxu0 %v30191_v25 }
 0x257   :  { %26848 = vmatpush3.msra.mxu0 %v14151_v24  ;;  %26849 = vmatprep.mubr.f32.mxu0 %v14130_v22 }
 0x258   :  { %26852 = vmatprep.subr.mxu0 %v30178_v17 }
 0x25d   :  { %v25660_v41 = vpop.f32.mrb[0].mxu0 }
 0x25e   :  { %v30209_v43 = vadd.f32 %v25660_v41, %v24041_v26  ;;  %v4053_v44 = vpop.f32.mrb[1].mxu0  ;;  %26850 = vmatmul.mubr.f32.vlgmr.msra.gmra.mrb[2].mxu0 %v14140_v29  ;;  %v14646_v29 = vsub.f32 %v30240_v10, %v14645_v14  ;;  %v15060_v41 = vrot.slane %v30009_v4, 6 }
 0x25f   :  { %v30214_v46 = vadd.f32 %v24041_v26, %v4053_v44  ;;  %26853 = vmatpush3.msra.mxu0 %v30178_v17  ;;  %26854 = vmatprep.mubr.f32.mxu0 %v14131_v27  ;;  %v14658_v27 = vand.u32 4294901760, %v14657_v13  ;;  %v15059_v26 = vrot.slane %v30004_v3, 6 }
 0x260   :  { %26857 = vmatprep.subr.mxu0 %v14152_v30  ;;  %v14647_v31 = vand.u32 4294901760, %v14646_v29 }
 0x261   :  { %v30220_v49 = vmul.f32 0.70710677, %v30214_v46  ;;  %v4074_v45 = vmul.f32 0.5, %v30214_v46  ;;  %v15061_v48 = vsel %vm3055_vm6, %v15059_v26, %v15060_v41  ;;  %v15062_v46 = vrot.slane %v30017_v8, 6 }
 0x263   :  { %v4078_v52 = vand.u32 2147483647, %v30220_v49  ;;  %vm4118_vm9 = vcmp.ge.f32.partialorder %v30220_v49, 0.0  ;;  %v15064_v49 = vsel %vm36_vm2, %v15061_v48, 0 }
 0x265   :  { %v4080_v56 = vmul.f32 0.3275911, %v4078_v52  ;;  %v4106_v11 = vsub.f32 0.0, %v4078_v52 }
 0x266   :  { %26855 = vmatmul.mubr.f32.vlgmr.msra.gmra.mrb[2].mxu0 %v14141_v32 }
 0x267   :  { %v4082_v57 = vadd.f32 1.0, %v4080_v56  ;;  %26858 = vmatpush3.msra.mxu0 %v14152_v30  ;;  %26859 = vmatprep.mubr.f32.mxu0 %v30174_v15  ;;  %v4108_v22 = vmul.f32 %v4106_v11, %v4078_v52  ;;  %v15069_v56 = vsel %vm41_vm0, %v24110_v51, 0 }
 0x268   :  { %26862 = vmatprep.subr.mxu0 %v30178_v17 }
 0x269   :  { %29738 = vrcp.f32 %v4082_v57 }
 0x26e   :  { %26860 = vmatmul.mubr.f32.vlgmr.msra.gmra.mrb[2].mxu0 %v30191_v25 }
 0x26f   :  { %26863 = vmatpush3.msra.mxu0 %v30178_v17  ;;  %26864 = vmatprep.mubr.f32.mxu0 %v30174_v15  ;;  %v4110_v17 = vmul.f32 1.442695, %v4108_v22 }
 0x270   :  { %26867 = vmatprep.subr.mxu0 %v30226_v54 }
 0x271   :  { %29740 = vpow2.f32 %v4110_v17 }
 0x273   :  { %v29739_v18 = vpop.eup %29738 }
 0x274   :  { %v4088_v24 = vmul.f32 1.0614054, %v29739_v18 }
 0x276   :  { %v4090_v30 = vadd.f32 -1.4531521, %v4088_v24  ;;  %26865 = vmatmul.mubr.f32.vlgmr.msra.gmra.mrb[2].mxu0 %v30191_v25 }
 0x277   :  { %26868 = vmatpush3.msra.mxu0 %v30226_v54  ;;  %26869 = vmatprep.mubr.f32.mxu0 %v14637_v23 }
 0x278   :  { %v4092_v15 = vmul.f32 %v29739_v18, %v4090_v30  ;;  %26872 = vmatprep.subr.mxu0 %v14658_v27 }
 0x27a   :  { %v4094_v28 = vadd.f32 1.4214138, %v4092_v15 }
 0x27b   :  { %v29741_v37 = vpop.eup %29740 }
 0x27c   :  { %v4096_v32 = vmul.f32 %v29739_v18, %v4094_v28 }
 0x27e   :  { %v4098_v33 = vadd.f32 -0.28449672, %v4096_v32  ;;  %26870 = vmatmul.mubr.f32.vlgmr.msra.gmra.mrb[2].mxu0 %v14647_v31  ;;  %v15563_v32 = vrot.slane %v30004_v3, 7 }
 0x27f   :  { %26873 = vmatpush3.msra.mxu0 %v14658_v27  ;;  %26874 = vmatprep.mubr.f32.mxu0 %v30224_v53 }
 0x280   :  { %v4100_v35 = vmul.f32 %v29739_v18, %v4098_v33  ;;  %26877 = vmatprep.subr.mxu0 %v14655_v61  ;;  %v15564_v33 = vrot.slane %v30009_v4, 7 }
 0x282   :  { %v4102_v25 = vadd.f32 0.2548296, %v4100_v35  ;;  %v15565_v4 = vsel %vm3561_vm7, %v15563_v32, %v15564_v33 }
 0x283   :  { %v15568_v26 = vsel %vm36_vm2, %v15565_v4, 0 }
 0x284   :  { %v4104_v36 = vmul.f32 %v29739_v18, %v4102_v25  ;;  %v30403_v51 = vand.u32 4294901760, %v15568_v26 }
 0x286   :  { %v4114_v20 = vmul.f32 %v29741_v37, %v4104_v36  ;;  %26875 = vmatmul.mubr.f32.vlgmr.msra.gmra.mrb[2].mxu0 %v30234_v62 }
 0x287   :  { %26878 = vmatpush3.msra.mxu0 %v14655_v61  ;;  %26879 = vmatprep.mubr.f32.mxu0 %v14634_v59  ;;  %v30273_v59 = vand.u32 4294901760, %v15064_v49  ;;  %v30276_v61 = vand.u32 4294901760, %v15069_v56 }
 0x288   :  { %v4116_v21 = vsub.f32 1.0, %v4114_v20  ;;  %26882 = vmatprep.subr.mxu0 %v30226_v54 }
 0x289   :  { %v30282_v11 = vsub.f32 %v15064_v49, %v30273_v59  ;;  %v15159_v18 = vsub.f32 %v15069_v56, %v30276_v61 }
 0x28a   :  { %v4120_v42 = vsub.f32 0.0, %v4116_v21 }
 0x28b   :  { %v30290_v24 = vand.u32 4294901760, %v15159_v18 }
 0x28c   :  { %v4122_v44 = vsel %vm4118_vm9, %v4116_v21, %v4120_v42 }
 0x28d   :  { %v4124_v47 = vadd.f32 1.0, %v4122_v44 }
 0x28e   :  { %26880 = vmatmul.mubr.f32.vlgmr.msra.gmra.mrb[2].mxu0 %v30240_v10 }
 0x28f   :  { %v30262_v52 = vmul.f32 %v4124_v47, %v4074_v45  ;;  %26883 = vmatpush3.msra.mxu0 %v30226_v54  ;;  %26884 = vmatprep.mubr.f32.mxu0 %v14635_v7  ;;  %v15063_v7 = vsel %vm3055_vm6, %v15060_v41, %v15062_v46  ;;  %v15566_v41 = vrot.slane %v30017_v8, 7 }
 0x290   :  { %26887 = vmatprep.subr.mxu0 %v30236_v9  ;;  %v15066_v12 = vsel %vm36_vm2, %v15063_v7, 0  ;;  %v30429_v7 = vsub.f32 %v15568_v26, %v30403_v51 }
 0x291   :  { %v4135_v55 = vsel %vm4133_vm10, %v30262_v52, 0  ;;  %v30287_v23 = vand.u32 4294901760, %v15066_v12  ;;  %v4628_v2 = vrot.slane %v30262_v52, 1  ;;  %v15567_v49 = vsel %vm3561_vm7, %v15564_v33, %v15566_v41 }
 0x292   :  { %v30271_v57 = vand.u32 4294901760, %v4135_v55 }
 0x294   :  { %v4207_v60 = vsub.f32 %v4135_v55, %v30271_v57 }
 0x296   :  { %26885 = vmatmul.mubr.f32.vlgmr.msra.gmra.mrb[2].mxu0 %v14645_v14  ;;  %v4208_v10 = vand.u32 4294901760, %v4207_v60  ;;  %v15139_v14 = vand.u32 4294901760, %v30282_v11 }
 0x297   :  { %26888 = vmatpush3.msra.mxu0 %v30236_v9  ;;  %26889 = vmatprep.mubr.f32.mxu0 %v30224_v53  ;;  %v30298_v9 = vsub.f32 %v15066_v12, %v30287_v23 }
 0x298   :  { %v4209_v13 = vsub.f32 %v4207_v60, %v4208_v10  ;;  %26892 = vmatprep.subr.mxu0 %v30226_v54  ;;  %v15140_v27 = vsub.f32 %v30282_v11, %v15139_v14 }
 0x299   :  { %v15149_v30 = vand.u32 4294901760, %v30298_v9 }
 0x29a   :  { %v4210_v22 = vand.u32 4294901760, %v4209_v13  ;;  %v15141_v29 = vand.u32 4294901760, %v15140_v27 }
 0x29c   :  { %25670 = vmatmul.mubr.f32.vlgmr.msra.gmra.mrb[0].mxu1 %v4210_v22 }
 0x29d   :  { %28021 = vmatpush3.bf16.msra.mxu1 %v30144_v58  ;;  %25680 = vmatprep.mubr.msk.f32.mxu1 %vm29783_vm8, %v29784_v6  ;;  %v15161_v58 = vsub.f32 %v15159_v18, %v30290_v24 }
 0x29e   :  { %26890 = vmatmul.mubr.f32.vlgmr.msra.gmra.mrb[2].mxu0 %v30234_v62  ;;  %28022 = vmatprep.subr.bf16.mxu1 %v29782_v34 }
 0x29f   :  { %26893 = vmatpush3.msra.mxu0 %v30226_v54  ;;  %26894 = vmatprep.mubr.f32.mxu0 %v30224_v53  ;;  %v15162_v54 = vand.u32 4294901760, %v15161_v58  ;;  %v24044_v53 = vld [vmem:[%s33416_s3 + $0x30] sm:$0xff] }
 0x2a0   :  { %26897 = vmatprep.subr.mxu0 %v30276_v61  ;;  %v4638_v28 = vand.u32 4294901760, %v24044_v53 }
 0x2a1   :  { %28024 = vmatpush3.bf16.msra.mxu1 %v30149_v63  ;;  %v15150_v63 = vsub.f32 %v30298_v9, %v15149_v30 }
 0x2a2   :  { %28025 = vmatprep.subr.bf16.mxu1 %v29782_v34 }
 0x2a3   :  { %v15151_v39 = vand.u32 4294901760, %v15150_v63 }
 0x2a4   :  { %25681 = vmatmul.mubr.f32.vlgmr.msra.gmra.mrb[0].mxu1 %v30271_v57 }
 0x2a5   :  { %28027 = vmatpush3.bf16.msra.mxu1 %v28026_v0  ;;  %25691 = vmatprep.mubr.msk.f32.mxu1 %vm29783_vm8, %v29784_v6  ;;  %v4632_v0 = vand.u32 4294901760, %v24042_v40 }
 0x2a6   :  { %26895 = vmatmul.mubr.f32.vlgmr.msra.gmra.mrb[2].mxu0 %v30234_v62  ;;  %28028 = vmatprep.subr.bf16.mxu1 %v29782_v34  ;;  %v24045_v62 = vld [vmem:[%s33416_s3 + $0x38] sm:$0xff] }
 0x2a7   :  { %26898 = vmatpush3.msra.mxu0 %v30276_v61  ;;  %26899 = vmatprep.mubr.f32.mxu0 %v15141_v29  ;;  %v30354_v17 = vsub.f32 %v24042_v40, %v4632_v0  ;;  %v4641_v31 = vand.u32 4294901760, %v24045_v62 }
 0x2a8   :  { %26902 = vmatprep.subr.mxu0 %v15162_v54 }
 0x2a9   :  { %28030 = vmatpush3.bf16.msra.mxu1 %v28029_v5  ;;  %v4635_v5 = vand.u32 4294901760, %v24043_v50  ;;  %v4713_v25 = vand.u32 4294901760, %v30354_v17  ;;  %v30371_v36 = vsub.f32 %v24045_v62, %v4641_v31  ;;  %v30406_v8 = vpack.c.bf16 %v4641_v31, %v4638_v28  ;;  %v30494_v62 = vld [vmem:[%s33416_s3 + $0x98] sm:$0xff] }
 0x2aa   :  { %28031 = vmatprep.subr.bf16.mxu1 %v29782_v34  ;;  %v6123_v31 = vand.u32 4294901760, %v30494_v62 }
 0x2ab   :  { %v30356_v15 = vsub.f32 %v24043_v50, %v4635_v5  ;;  %v30386_v20 = vpack.c.bf16 %v4635_v5, %v4632_v0  ;;  %v4714_v21 = vsub.f32 %v30354_v17, %v4713_v25  ;;  %v4734_v45 = vand.u32 4294901760, %v30371_v36 }
 0x2ac   :  { %25692 = vmatmul.mubr.f32.vlgmr.msra.gmra.mrb[0].mxu1 %v4207_v60  ;;  %v30516_v4 = vsub.f32 %v30494_v62, %v6123_v31 }
 0x2ad   :  { %28033 = vmatpush3.bf16.msra.mxu1 %v30109_v38  ;;  %25702 = vmatprep.mubr.msk.f32.mxu1 %vm29783_vm8, %v29784_v6  ;;  %v4720_v3 = vand.u32 4294901760, %v30356_v15  ;;  %v4715_v46 = vand.u32 4294901760, %v4714_v21 }
 0x2ae   :  { %26900 = vmatmul.mubr.f32.vlgmr.msra.gmra.mrb[2].mxu0 %v15151_v39  ;;  %28034 = vmatprep.subr.bf16.mxu1 %v29782_v34 }
 0x2af   :  { %26903 = vmatpush3.msra.mxu0 %v15162_v54  ;;  %26904 = vmatprep.mubr.f32.mxu0 %v30273_v59  ;;  %v4721_v42 = vsub.f32 %v30356_v15, %v4720_v3  ;;  %v30462_v54 = vld [vmem:[%s33416_s3 + $0x80] sm:$0xff] }
 0x2b0   :  { %26907 = vmatprep.subr.mxu0 %v15159_v18  ;;  %v6114_v63 = vand.u32 4294901760, %v30462_v54 }
 0x2b1   :  { %28036 = vmatpush3.bf16.msra.mxu1 %v30129_v1  ;;  %v4722_v55 = vand.u32 4294901760, %v4721_v42 }
 0x2b2   :  { %28037 = vmatprep.subr.bf16.mxu1 %v29782_v34 }
 0x2b3   :  { %v28056_v12 = vpack.c.bf16 %v4722_v55, %v4715_v46 }
 0x2b4   :  { %25703 = vmatmul.mubr.f32.vlgmr.msra.gmra.mrb[0].mxu1 %v4208_v10  ;;  %v15570_v10 = vsel %vm36_vm2, %v15567_v49, 0  ;;  %v6216_v49 = vand.u32 4294901760, %v30516_v4 }
 0x2b5   :  { %28039 = vmatpush3.bf16.msra.mxu1 %v30176_v16  ;;  %25713 = vmatprep.mubr.msk.f32.mxu1 %vm29783_vm8, %v29784_v6  ;;  %v4629_v16 = vsel %vm4133_vm10, %v4628_v2, 0  ;;  %v30478_v2 = vsub.f32 %v30462_v54, %v6114_v63  ;;  %v24050_v54 = vld [vmem:[%s33416_s3 + $0x60] sm:$0xff] }
 0x2b6   :  { %26905 = vmatmul.mubr.f32.vlgmr.msra.gmra.mrb[2].mxu0 %v30287_v23  ;;  %28040 = vmatprep.subr.bf16.mxu1 %v29782_v34  ;;  %v30362_v35 = vand.u32 4294901760, %v4629_v16 }
 0x2b7   :  { %26908 = vmatpush3.msra.mxu0 %v15159_v18  ;;  %26909 = vmatprep.mubr.f32.mxu0 %v30282_v11 }
 0x2b8   :  { %26912 = vmatprep.subr.mxu0 %v30276_v61  ;;  %v30378_v37 = vsub.f32 %v4629_v16, %v30362_v35 }
 0x2b9   :  { %28042 = vmatpush3.bf16.msra.mxu1 %v30183_v19  ;;  %v30369_v19 = vsub.f32 %v24044_v53, %v4638_v28  ;;  %v30489_v53 = vld [vmem:[%s33416_s3 + $0x90] sm:$0xff] }
 0x2ba   :  { %28043 = vmatprep.subr.bf16.mxu1 %v29782_v34  ;;  %v4702_v48 = vand.u32 4294901760, %v30378_v37  ;;  %v6120_v28 = vand.u32 4294901760, %v30489_v53 }
 0x2bb   :  { %v4727_v44 = vand.u32 4294901760, %v30369_v19  ;;  %v28065_v16 = vpack.c.bf16 %v30371_v36, %v30369_v19 }
 0x2bc   :  { %25714 = vmatmul.mubr.f32.vlgmr.msra.gmra.mrb[0].mxu1 %v30271_v57  ;;  %v4703_v60 = vsub.f32 %v30378_v37, %v4702_v48  ;;  %v30511_v33 = vsub.f32 %v30489_v53, %v6120_v28  ;;  %v5620_v53 = vand.u32 4294901760, %v24050_v54 }
 0x2bd   :  { %28045 = vmatpush3.bf16.msra.mxu1 %v30109_v38  ;;  %25724 = vmatprep.mubr.msk.f32.mxu1 %vm29783_vm8, %v29784_v6  ;;  %v24111_v38 = vld [vmem:[%s33414_s1 + $0x1c] sm:$0xf]  ;;  %v4728_v56 = vsub.f32 %v30369_v19, %v4727_v44 }
 0x2be   :  { %26910 = vmatmul.mubr.f32.vlgmr.msra.gmra.mrb[2].mxu0 %v30298_v9  ;;  %28046 = vmatprep.subr.bf16.mxu1 %v29782_v34  ;;  %v15573_v47 = vsel %vm41_vm0, %v24111_v38, 0  ;;  %v4704_v22 = vand.u32 4294901760, %v4703_v60  ;;  %v24049_v19 = vld [vmem:[%s33416_s3 + $0x58] sm:$0xff] }
 0x2bf   :  { %26913 = vmatpush3.msra.mxu0 %v30276_v61  ;;  %26914 = vmatprep.mubr.f32.mxu0 %v15139_v14  ;;  %v4729_v13 = vand.u32 4294901760, %v4728_v56  ;;  %v30438_v14 = vand.u32 4294901760, %v15570_v10  ;;  %v6217_v56 = vsub.f32 %v30516_v4, %v6216_v49 }
 0x2c0   :  { %26917 = vmatprep.subr.mxu0 %v30290_v24 }
 0x2c1   :  { %28048 = vmatpush3.bf16.msra.mxu1 %v30129_v1  ;;  %v30408_v1 = vand.u32 4294901760, %v15573_v47  ;;  %v30449_v58 = vsub.f32 %v15570_v10, %v30438_v14  ;;  %v6218_v10 = vand.u32 4294901760, %v6217_v56 }
 0x2c2   :  { %28049 = vmatprep.subr.bf16.mxu1 %v29782_v34 }
 0x2c3   :  { %v30434_v11 = vsub.f32 %v15573_v47, %v30408_v1  ;;  %v15653_v40 = vand.u32 4294901760, %v30449_v58  ;;  %v6209_v47 = vand.u32 4294901760, %v30511_v33 }
 0x2c4   :  { %25725 = vmatmul.mubr.f32.vlgmr.msra.gmra.mrb[0].mxu1 %v30271_v57  ;;  %v4735_v57 = vsub.f32 %v30371_v36, %v4734_v45  ;;  %v30581_v36 = vpack.c.bf16 %v30516_v4, %v30511_v33 }
 0x2c5   :  { %28051 = vmatpush3.bf16.msra.mxu1 %v30386_v20  ;;  %25735 = vmatprep.mubr.msk.f32.mxu1 %vm29783_vm8, %v29784_v6  ;;  %v30442_v9 = vand.u32 4294901760, %v30434_v11  ;;  %v15654_v32 = vsub.f32 %v30449_v58, %v15653_v40  ;;  %v6210_v55 = vsub.f32 %v30511_v33, %v6209_v47 }
 0x2c6   :  { %26915 = vmatmul.mubr.f32.vlgmr.msra.gmra.mrb[2].mxu0 %v15149_v30  ;;  %28052 = vmatprep.subr.bf16.mxu1 %v29782_v34  ;;  %v4736_v18 = vand.u32 4294901760, %v4735_v57 }
 0x2c7   :  { %26918 = vmatpush3.msra.mxu0 %v30290_v24  ;;  %26919 = vmatprep.mubr.f32.mxu0 %v30273_v59  ;;  %v15643_v24 = vand.u32 4294901760, %v30429_v7  ;;  %v15665_v29 = vsub.f32 %v30434_v11, %v30442_v9  ;;  %v15655_v26 = vand.u32 4294901760, %v15654_v32  ;;  %v6211_v60 = vand.u32 4294901760, %v6210_v55 }
 0x2c8   :  { %26922 = vmatprep.subr.mxu0 %v30276_v61  ;;  %v28059_v27 = vpack.c.bf16 %v4736_v18, %v4729_v13  ;;  %v24046_v18 = vld [vmem:[%s33416_s3 + $0x40] sm:$0xff] }
 0x2c9   :  { %28054 = vmatpush3.bf16.msra.mxu1 %v30406_v8  ;;  %v15644_v30 = vsub.f32 %v30429_v7, %v15643_v24  ;;  %v15666_v5 = vand.u32 4294901760, %v15665_v29  ;;  %v30549_v13 = vpack.c.bf16 %v6218_v10, %v6211_v60  ;;  %v5135_v29 = vand.u32 4294901760, %v24049_v19 }
 0x2ca   :  { %28055 = vmatprep.subr.bf16.mxu1 %v29782_v34 }
 0x2cb   :  { %v15645_v50 = vand.u32 4294901760, %v15644_v30 }
 0x2cc   :  { %25736 = vmatmul.mubr.f32.vlgmr.msra.gmra.mrb[0].mxu1 %v4704_v22  ;;  %v24047_v22 = vld [vmem:[%s33416_s3 + $0x48] sm:$0xff] }
 0x2cd   :  { %28057 = vmatpush3.bf16.msra.mxu1 %v28056_v12  ;;  %25746 = vmatprep.mubr.msk.f32.mxu1 %vm29783_vm8, %v29784_v6  ;;  %v28074_v12 = vpack.c.bf16 %v4720_v3, %v4713_v25  ;;  %v5126_v25 = vand.u32 4294901760, %v24046_v18  ;;  %v5129_v3 = vand.u32 4294901760, %v24047_v22 }
 0x2ce   :  { %26920 = vmatmul.mubr.f32.vlgmr.msra.gmra.mrb[2].mxu0 %v30287_v23  ;;  %28058 = vmatprep.subr.bf16.mxu1 %v29782_v34 }
 0x2cf   :  { %26923 = vmatpush3.msra.mxu0 %v30276_v61  ;;  %26924 = vmatprep.mubr.f32.mxu0 %v30273_v59  ;;  %v30467_v61 = vld [vmem:[%s33416_s3 + $0x88] sm:$0xff]  ;;  %v28062_v59 = vpack.c.bf16 %v30356_v15, %v30354_v17  ;;  %v28077_v15 = vpack.c.bf16 %v4734_v45, %v4727_v44  ;;  %v30587_v45 = vsub.f32 %v24046_v18, %v5126_v25 }
 0x2d0   :  { %26927 = vmatprep.subr.mxu0 %v30408_v1  ;;  %v6117_v39 = vand.u32 4294901760, %v30467_v61 }
 0x2d1   :  { %28060 = vmatpush3.bf16.msra.mxu1 %v28059_v27  ;;  %v5122_v27 = vrot.slane %v30262_v52, 2 }
 0x2d2   :  { %28061 = vmatprep.subr.bf16.mxu1 %v29782_v34  ;;  %v30483_v0 = vsub.f32 %v30467_v61, %v6117_v39  ;;  %v24051_v61 = vld [vmem:[%s33416_s3 + $0x68] sm:$0xff] }
 0x2d3   :  { %v5123_v44 = vsel %vm4133_vm10, %v5122_v27, 0  ;;  %v5623_v62 = vand.u32 4294901760, %v24051_v61 }
 0x2d4   :  { %25747 = vmatmul.mubr.f32.vlgmr.msra.gmra.mrb[0].mxu1 %v30362_v35  ;;  %v6202_v38 = vand.u32 4294901760, %v30483_v0  ;;  %v30563_v17 = vpack.c.bf16 %v30483_v0, %v30478_v2 }
 0x2d5   :  { %28063 = vmatpush3.bf16.msra.mxu1 %v28062_v59  ;;  %25757 = vmatprep.mubr.msk.f32.mxu1 %vm29783_vm8, %v29784_v6  ;;  %v30592_v59 = vand.u32 4294901760, %v5123_v44  ;;  %v5707_v60 = vsub.f32 %v24051_v61, %v5623_v62  ;;  %v24061_v61 = vld [vmem:[%s33416_s3 + $0xb8] sm:$0xff] }
 0x2d6   :  { %26925 = vmatmul.mubr.f32.vlgmr.msra.gmra.mrb[2].mxu0 %v30287_v23  ;;  %28064 = vmatprep.subr.bf16.mxu1 %v29782_v34  ;;  %v6195_v23 = vand.u32 4294901760, %v30478_v2  ;;  %v6203_v41 = vsub.f32 %v30483_v0, %v6202_v38  ;;  %v30652_v0 = vpack.c.bf16 %v6216_v49, %v6209_v47  ;;  %v5700_v49 = vsub.f32 %v24050_v54, %v5620_v53  ;;  %v24060_v54 = vld [vmem:[%s33416_s3 + $0xb0] sm:$0xff] }
 0x2d7   :  { %26928 = vmatpush3.msra.mxu0 %v30408_v1  ;;  %26929 = vmatprep.mubr.f32.mxu0 %v15645_v50  ;;  %v30600_v50 = vsub.f32 %v24049_v19, %v5135_v29  ;;  %v30607_v32 = vsub.f32 %v5123_v44, %v30592_v59 }
 0x2d8   :  { %26932 = vmatprep.subr.mxu0 %v15666_v5  ;;  %v6196_v21 = vsub.f32 %v30478_v2, %v6195_v23  ;;  %v6204_v46 = vand.u32 4294901760, %v6203_v41 }
 0x2d9   :  { %28066 = vmatpush3.bf16.msra.mxu1 %v28065_v16 }
 0x2da   :  { %28067 = vmatprep.subr.bf16.mxu1 %v29782_v34  ;;  %v6197_v42 = vand.u32 4294901760, %v6196_v21 }
 0x2dc   :  { %25758 = vmatmul.mubr.f32.vlgmr.msra.gmra.mrb[0].mxu1 %v30378_v37  ;;  %v30540_v57 = vpack.c.bf16 %v6204_v46, %v6197_v42  ;;  %v24048_v37 = vld [vmem:[%s33416_s3 + $0x50] sm:$0xff]  ;;  %v5228_v42 = vand.u32 4294901760, %v30600_v50 }
 0x2dd   :  { %28069 = vmatpush3.bf16.msra.mxu1 %v30386_v20  ;;  %25768 = vmatprep.mubr.msk.f32.mxu1 %vm29783_vm8, %v29784_v6  ;;  %v5132_v30 = vand.u32 4294901760, %v24048_v37 }
 0x2de   :  { %26930 = vmatmul.mubr.f32.vlgmr.msra.gmra.mrb[2].mxu0 %v15655_v26  ;;  %28070 = vmatprep.subr.bf16.mxu1 %v29782_v34 }
 0x2df   :  { %26933 = vmatpush3.msra.mxu0 %v15666_v5  ;;  %26934 = vmatprep.mubr.f32.mxu0 %v30403_v51  ;;  %v5207_v5 = vand.u32 4294901760, %v30587_v45 }
 0x2e0   :  { %26937 = vmatprep.subr.mxu0 %v30434_v11 }
 0x2e1   :  { %28072 = vmatpush3.bf16.msra.mxu1 %v30406_v8  ;;  %v5208_v21 = vsub.f32 %v30587_v45, %v5207_v5 }
 0x2e2   :  { %28073 = vmatprep.subr.bf16.mxu1 %v29782_v34 }
 0x2e3   :  { %v5209_v46 = vand.u32 4294901760, %v5208_v21 }
 0x2e4   :  { %25769 = vmatmul.mubr.f32.vlgmr.msra.gmra.mrb[0].mxu1 %v4702_v48  ;;  %v30589_v48 = vsub.f32 %v24047_v22, %v5129_v3 }
 0x2e5   :  { %28075 = vmatpush3.bf16.msra.mxu1 %v28074_v12  ;;  %25779 = vmatprep.mubr.msk.f32.mxu1 %vm29783_vm8, %v29784_v6 }
 0x2e6   :  { %26935 = vmatmul.mubr.f32.vlgmr.msra.gmra.mrb[2].mxu0 %v30438_v14  ;;  %28076 = vmatprep.subr.bf16.mxu1 %v29782_v34  ;;  %v5214_v16 = vand.u32 4294901760, %v30589_v48 }
 0x2e7   :  { %26938 = vmatpush3.msra.mxu0 %v30434_v11  ;;  %26939 = vmatprep.mubr.f32.mxu0 %v30429_v7  ;;  %v30598_v11 = vsub.f32 %v24048_v37, %v5132_v30  ;;  %v5196_v7 = vand.u32 4294901760, %v30607_v32  ;;  %v28122_v37 = vpack.c.bf16 %v5623_v62, %v5620_v53  ;;  %v6614_v62 = vand.u32 4294901760, %v24060_v54 }
 0x2e8   :  { %26942 = vmatprep.subr.mxu0 %v30408_v1  ;;  %v5215_v26 = vsub.f32 %v30589_v48, %v5214_v16 }
 0x2e9   :  { %28078 = vmatpush3.bf16.msra.mxu1 %v28077_v15  ;;  %v5221_v41 = vand.u32 4294901760, %v30598_v11  ;;  %v5197_v2 = vsub.f32 %v30607_v32, %v5196_v7  ;;  %v28101_v4 = vpack.c.bf16 %v30600_v50, %v30598_v11  ;;  %v5701_v15 = vand.u32 4294901760, %v5700_v49 }
 0x2ea   :  { %28079 = vmatprep.subr.bf16.mxu1 %v29782_v34  ;;  %v5216_v55 = vand.u32 4294901760, %v5215_v26 }
 0x2eb   :  { %v5222_v56 = vsub.f32 %v30598_v11, %v5221_v41  ;;  %v5702_v19 = vsub.f32 %v5700_v49, %v5701_v15 }
 0x2ec   :  { %25780 = vmatmul.mubr.f32.vlgmr.msra.gmra.mrb[0].mxu1 %v30362_v35 }
 0x2ed   :  { %28081 = vmatpush3.bf16.msra.mxu1 %v30386_v20  ;;  %25790 = vmatprep.mubr.msk.f32.mxu1 %vm29783_vm8, %v29784_v6  ;;  %v30612_v20 = vpack.c.bf16 %v5129_v3, %v5126_v25  ;;  %v5708_v25 = vand.u32 4294901760, %v5707_v60  ;;  %v5703_v11 = vand.u32 4294901760, %v5702_v19 }
 0x2ee   :  { %26940 = vmatmul.mubr.f32.vlgmr.msra.gmra.mrb[2].mxu0 %v30449_v58  ;;  %28082 = vmatprep.subr.bf16.mxu1 %v29782_v34  ;;  %v28092_v58 = vpack.c.bf16 %v5216_v55, %v5209_v46  ;;  %v6110_v46 = vrot.slane %v30262_v52, 4 }
 0x2ef   :  { %26943 = vmatpush3.msra.mxu0 %v30408_v1  ;;  %26944 = vmatprep.mubr.f32.mxu0 %v15643_v24  ;;  %v30627_v24 = vpack.c.bf16 %v5135_v29, %v5132_v30  ;;  %v5709_v44 = vsub.f32 %v5707_v60, %v5708_v25 }
 0x2f0   :  { %26947 = vmatprep.subr.mxu0 %v30442_v9 }
 0x2f1   :  { %28084 = vmatpush3.bf16.msra.mxu1 %v30406_v8  ;;  %v30633_v8 = vpack.c.bf16 %v6202_v38, %v6195_v23  ;;  %v5198_v38 = vand.u32 4294901760, %v5197_v2 }
 0x2f2   :  { %28085 = vmatprep.subr.bf16.mxu1 %v29782_v34 }
 0x2f4   :  { %25791 = vmatmul.mubr.f32.vlgmr.msra.gmra.mrb[0].mxu1 %v30362_v35  ;;  %v5229_v35 = vsub.f32 %v30600_v50, %v5228_v42  ;;  %v5710_v50 = vand.u32 4294901760, %v5709_v44 }
 0x2f5   :  { %28087 = vmatpush3.bf16.msra.mxu1 %v30612_v20  ;;  %25801 = vmatprep.mubr.msk.f32.mxu1 %vm29783_vm8, %v29784_v6 }
 0x2f6   :  { %26945 = vmatmul.mubr.f32.vlgmr.msra.gmra.mrb[2].mxu0 %v15653_v40  ;;  %28088 = vmatprep.subr.bf16.mxu1 %v29782_v34  ;;  %v5223_v40 = vand.u32 4294901760, %v5222_v56  ;;  %v5230_v23 = vand.u32 4294901760, %v5229_v35  ;;  %v6111_v56 = vsel %vm4133_vm10, %v6110_v46, 0  ;;  %v24064_v46 = vld [vmem:[%s33416_s3 + $0xd0] sm:$0xff] }
 0x2f7   :  { %26948 = vmatpush3.msra.mxu0 %v30442_v9  ;;  %26949 = vmatprep.mubr.f32.mxu0 %v30403_v51  ;;  %v28098_v9 = vpack.c.bf16 %v30589_v48, %v30587_v45  ;;  %v30762_v35 = vand.u32 4294901760, %v6111_v56 }
 0x2f8   :  { %26952 = vmatprep.subr.mxu0 %v30408_v1  ;;  %v28095_v33 = vpack.c.bf16 %v5230_v23, %v5223_v40 }
 0x2f9   :  { %28090 = vmatpush3.bf16.msra.mxu1 %v30627_v24  ;;  %v6183_v2 = vsub.f32 %v6111_v56, %v30762_v35 }
 0x2fa   :  { %28091 = vmatprep.subr.bf16.mxu1 %v29782_v34 }
 0x2fc   :  { %25802 = vmatmul.mubr.f32.vlgmr.msra.gmra.mrb[0].mxu1 %v5198_v38  ;;  %v24058_v38 = vld [vmem:[%s33416_s3 + $0xa0] sm:$0xff] }
 0x2fd   :  { %28093 = vmatpush3.bf16.msra.mxu1 %v28092_v58  ;;  %25812 = vmatprep.mubr.msk.f32.mxu1 %vm29783_vm8, %v29784_v6  ;;  %v6184_v58 = vand.u32 4294901760, %v6183_v2 }
 0x2fe   :  { %26950 = vmatmul.mubr.f32.vlgmr.msra.gmra.mrb[2].mxu0 %v30438_v14  ;;  %28094 = vmatprep.subr.bf16.mxu1 %v29782_v34 }
 0x2ff   :  { %26953 = vmatpush3.msra.mxu0 %v30408_v1  ;;  %26954 = vmatprep.mubr.f32.mxu0 %v30403_v51  ;;  %v30678_v51 = vpack.c.bf16 %v6117_v39, %v6114_v63  ;;  %v30690_v1 = vpack.c.bf16 %v6123_v31, %v6120_v28  ;;  %v5616_v63 = vrot.slane %v30262_v52, 3  ;;  %v28113_v39 = vpack.c.bf16 %v5228_v42, %v5221_v41  ;;  %v24052_v28 = vld [vmem:[%s33416_s3 + $0x70] sm:$0xff]  ;;  %v24053_v31 = vld [vmem:[%s33416_s3 + $0x78] sm:$0xff] }
 0x300   :  { %28733 = vmatprep.subr.bf16.mxu0 %v29782_v34  ;;  %v5626_v10 = vand.u32 4294901760, %v24052_v28  ;;  %v5629_v12 = vand.u32 4294901760, %v24053_v31  ;;  %v28134_v42 = vpack.c.bf16 %v5707_v60, %v5700_v49  ;;  %v6185_v40 = vsub.f32 %v6183_v2, %v6184_v58 }
 0x301   :  { %28096 = vmatpush3.bf16.msra.mxu1 %v28095_v33  ;;  %v5617_v47 = vsel %vm4133_vm10, %v5616_v63, 0  ;;  %v24059_v33 = vld [vmem:[%s33416_s3 + $0xa8] sm:$0xff] }
 0x302   :  { %28097 = vmatprep.subr.bf16.mxu1 %v29782_v34  ;;  %v30728_v18 = vand.u32 4294901760, %v5617_v47  ;;  %v5714_v22 = vsub.f32 %v24052_v28, %v5626_v10  ;;  %v5721_v27 = vsub.f32 %v24053_v31, %v5629_v12  ;;  %v28125_v29 = vpack.c.bf16 %v5629_v12, %v5626_v10 }
 0x303   :  { %v6186_v23 = vand.u32 4294901760, %v6185_v40  ;;  %v6617_v28 = vand.u32 4294901760, %v24061_v61 }
 0x304   :  { %25813 = vmatmul.mubr.f32.vlgmr.msra.gmra.mrb[0].mxu1 %v30592_v59  ;;  %v5689_v3 = vsub.f32 %v5617_v47, %v30728_v18  ;;  %v5715_v45 = vand.u32 4294901760, %v5714_v22  ;;  %v5722_v48 = vand.u32 4294901760, %v5721_v27  ;;  %v6702_v47 = vsub.f32 %v24060_v54, %v6614_v62 }
 0x305   :  { %28099 = vmatpush3.bf16.msra.mxu1 %v28098_v9  ;;  %25823 = vmatprep.mubr.msk.f32.mxu1 %vm29783_vm8, %v29784_v6  ;;  %v6604_v9 = vrot.slane %v30262_v52, 5  ;;  %v6709_v49 = vsub.f32 %v24061_v61, %v6617_v28  ;;  %v30907_v54 = vmul.f32 0.70710677, %v30209_v43 }
 0x306   :  { %26955 = vmatmul.mubr.f32.vlgmr.msra.gmra.mrb[2].mxu0 %v30438_v14  ;;  %28100 = vmatprep.subr.bf16.mxu1 %v29782_v34  ;;  %v28110_v14 = vpack.c.bf16 %v5214_v16, %v5207_v5  ;;  %v5690_v30 = vand.u32 4294901760, %v5689_v3  ;;  %v5716_v5 = vsub.f32 %v5714_v22, %v5715_v45  ;;  %v5723_v16 = vsub.f32 %v5721_v27, %v5722_v48 }
 0x307   :  { %28735 = vmatpush3.bf16.msra.mxu0 %v30678_v51  ;;  %27229 = vmatprep.mubr.msk.f32.mxu0 %vm29783_vm8, %v29784_v6  ;;  %v28149_v55 = vpack.c.bf16 %v5722_v48, %v5715_v45  ;;  %v6605_v63 = vsel %vm4133_vm10, %v6604_v9, 0  ;;  %vm4119_vm11 = vcmp.ge.f32.partialorder %v30907_v54, 0.0 }
 0x308   :  { %28736 = vmatprep.subr.bf16.mxu0 %v29782_v34  ;;  %v5717_v21 = vand.u32 4294901760, %v5716_v5  ;;  %v5724_v26 = vand.u32 4294901760, %v5723_v16  ;;  %v30816_v31 = vand.u32 4294901760, %v6605_v63 }
 0x309   :  { %28102 = vmatpush3.bf16.msra.mxu1 %v28101_v4  ;;  %v6608_v4 = vand.u32 4294901760, %v24058_v38 }
 0x30a   :  { %28103 = vmatprep.subr.bf16.mxu1 %v29782_v34  ;;  %v6677_v12 = vsub.f32 %v6605_v63, %v30816_v31 }
 0x30b   :  { %28738 = vmatpush3.bf16.msra.mxu0 %v30690_v1 }
 0x30c   :  { %25824 = vmatmul.mubr.f32.vlgmr.msra.gmra.mrb[0].mxu1 %v30607_v32  ;;  %28739 = vmatprep.subr.bf16.mxu0 %v29782_v34  ;;  %v5691_v32 = vsub.f32 %v5689_v3, %v5690_v30 }
 0x30d   :  { %28105 = vmatpush3.bf16.msra.mxu1 %v30612_v20  ;;  %25834 = vmatprep.mubr.msk.f32.mxu1 %vm29783_vm8, %v29784_v6 }
 0x30e   :  { %28106 = vmatprep.subr.bf16.mxu1 %v29782_v34  ;;  %v5692_v41 = vand.u32 4294901760, %v5691_v32 }
 0x311   :  { %28108 = vmatpush3.bf16.msra.mxu1 %v30627_v24 }
 0x312   :  { %28109 = vmatprep.subr.bf16.mxu1 %v29782_v34 }
 0x314   :  { %25835 = vmatmul.mubr.f32.vlgmr.msra.gmra.mrb[0].mxu1 %v5196_v7  ;;  %v28137_v7 = vpack.c.bf16 %v5721_v27, %v5714_v22 }
 0x315   :  { %28111 = vmatpush3.bf16.msra.mxu1 %v28110_v14  ;;  %25845 = vmatprep.mubr.msk.f32.mxu1 %vm29783_vm8, %v29784_v6  ;;  %v6611_v14 = vand.u32 4294901760, %v24059_v33 }
 0x316   :  { %28112 = vmatprep.subr.bf16.mxu1 %v29782_v34 }
 0x317   :  { %v6695_v53 = vsub.f32 %v24059_v33, %v6611_v14 }
 0x319   :  { %28114 = vmatpush3.bf16.msra.mxu1 %v28113_v39  ;;  %v6688_v39 = vsub.f32 %v24058_v38, %v6608_v4  ;;  %v6696_v10 = vand.u32 4294901760, %v6695_v53 }
 0x31a   :  { %28115 = vmatprep.subr.bf16.mxu1 %v29782_v34 }
 0x31b   :  { %v6689_v60 = vand.u32 4294901760, %v6688_v39  ;;  %v6697_v27 = vsub.f32 %v6695_v53, %v6696_v10  ;;  %v30846_v32 = vpack.c.bf16 %v6695_v53, %v6688_v39 }
 0x31c   :  { %25846 = vmatmul.mubr.f32.vlgmr.msra.gmra.mrb[0].mxu1 %v30592_v59 }
 0x31d   :  { %28117 = vmatpush3.bf16.msra.mxu1 %v30612_v20  ;;  %25856 = vmatprep.mubr.msk.f32.mxu1 %vm29783_vm8, %v29784_v6  ;;  %v28128_v20 = vpack.c.bf16 %v5710_v50, %v5703_v11  ;;  %v6690_v22 = vsub.f32 %v6688_v39, %v6689_v60  ;;  %v6698_v44 = vand.u32 4294901760, %v6697_v27 }
 0x31e   :  { %28118 = vmatprep.subr.bf16.mxu1 %v29782_v34 }
 0x31f   :  { %v6691_v19 = vand.u32 4294901760, %v6690_v22 }
 0x321   :  { %28120 = vmatpush3.bf16.msra.mxu1 %v30627_v24  ;;  %v28146_v24 = vpack.c.bf16 %v5708_v25, %v5701_v15  ;;  %v6703_v15 = vand.u32 4294901760, %v6702_v47  ;;  %v6710_v25 = vand.u32 4294901760, %v6709_v49 }
 0x322   :  { %28121 = vmatprep.subr.bf16.mxu1 %v29782_v34 }
 0x323   :  { %v6704_v45 = vsub.f32 %v6702_v47, %v6703_v15  ;;  %v6711_v48 = vsub.f32 %v6709_v49, %v6710_v25 }
 0x324   :  { %25857 = vmatmul.mubr.f32.vlgmr.msra.gmra.mrb[0].mxu1 %v30592_v59  ;;  %v28131_v59 = vpack.c.bf16 %v5724_v26, %v5717_v21  ;;  %v30863_v21 = vpack.c.bf16 %v6696_v10, %v6689_v60  ;;  %v24062_v26 = vld [vmem:[%s33416_s3 + $0xc0] sm:$0xff] }
 0x325   :  { %28123 = vmatpush3.bf16.msra.mxu1 %v28122_v37  ;;  %25867 = vmatprep.mubr.msk.f32.mxu1 %vm29783_vm8, %v29784_v6  ;;  %v6705_v11 = vand.u32 4294901760, %v6704_v45  ;;  %v6712_v50 = vand.u32 4294901760, %v6711_v48 }
 0x326   :  { %28124 = vmatprep.subr.bf16.mxu1 %v29782_v34 }
 0x327   :  { %v30840_v16 = vpack.c.bf16 %v6712_v50, %v6705_v11 }
 0x329   :  { %28126 = vmatpush3.bf16.msra.mxu1 %v28125_v29 }
 0x32a   :  { %28127 = vmatprep.subr.bf16.mxu1 %v29782_v34 }
 0x32c   :  { %25868 = vmatmul.mubr.f32.vlgmr.msra.gmra.mrb[0].mxu1 %v5692_v41  ;;  %v24063_v41 = vld [vmem:[%s33416_s3 + $0xc8] sm:$0xff] }
 0x32d   :  { %28129 = vmatpush3.bf16.msra.mxu1 %v28128_v20  ;;  %25878 = vmatprep.mubr.msk.f32.mxu1 %vm29783_vm8, %v29784_v6  ;;  %v30851_v20 = vpack.c.bf16 %v6709_v49, %v6702_v47  ;;  %v30918_v47 = vand.u32 2147483647, %v30907_v54 }
 0x32e   :  { %28130 = vmatprep.subr.bf16.mxu1 %v29782_v34 }
 0x331   :  { %28132 = vmatpush3.bf16.msra.mxu1 %v28131_v59  ;;  %v7098_v59 = vrot.slane %v30262_v52, 6 }
 0x332   :  { %28133 = vmatprep.subr.bf16.mxu1 %v29782_v34 }
 0x333   :  { %v7099_v56 = vsel %vm4133_vm10, %v7098_v59, 0  ;;  %v24067_v59 = vld [vmem:[%s33416_s3 + $0xe8] sm:$0xff] }
 0x334   :  { %25879 = vmatmul.mubr.f32.vlgmr.msra.gmra.mrb[0].mxu1 %v30728_v18 }
 0x335   :  { %28135 = vmatpush3.bf16.msra.mxu1 %v28134_v42  ;;  %25889 = vmatprep.mubr.msk.f32.mxu1 %vm29783_vm8, %v29784_v6  ;;  %v30874_v42 = vpack.c.bf16 %v6710_v25, %v6703_v15  ;;  %v4081_v15 = vmul.f32 0.3275911, %v30918_v47 }
 0x336   :  { %28136 = vmatprep.subr.bf16.mxu1 %v29782_v34 }
 0x339   :  { %28138 = vmatpush3.bf16.msra.mxu1 %v28137_v7  ;;  %v7102_v7 = vand.u32 4294901760, %v24062_v26 }
 0x33a   :  { %28139 = vmatprep.subr.bf16.mxu1 %v29782_v34 }
 0x33c   :  { %25890 = vmatmul.mubr.f32.vlgmr.msra.gmra.mrb[0].mxu1 %v5689_v3  ;;  %v6678_v3 = vand.u32 4294901760, %v6677_v12 }
 0x33d   :  { %28141 = vmatpush3.bf16.msra.mxu1 %v28122_v37  ;;  %25900 = vmatprep.mubr.msk.f32.mxu1 %vm29783_vm8, %v29784_v6 }
 0x33e   :  { %28142 = vmatprep.subr.bf16.mxu1 %v29782_v34 }
 0x341   :  { %28144 = vmatpush3.bf16.msra.mxu1 %v28125_v29 }
 0x342   :  { %28145 = vmatprep.subr.bf16.mxu1 %v29782_v34 }
 0x344   :  { %25901 = vmatmul.mubr.f32.vlgmr.msra.gmra.mrb[0].mxu1 %v5690_v30  ;;  %v6679_v30 = vsub.f32 %v6677_v12, %v6678_v3 }
 0x345   :  { %28147 = vmatpush3.bf16.msra.mxu1 %v28146_v24  ;;  %25911 = vmatprep.mubr.msk.f32.mxu1 %vm29783_vm8, %v29784_v6  ;;  %v7105_v24 = vand.u32 4294901760, %v24063_v41 }
 0x346   :  { %28148 = vmatprep.subr.bf16.mxu1 %v29782_v34  ;;  %v6680_v5 = vand.u32 4294901760, %v6679_v30 }
 0x347   :  { %v30909_v61 = vpack.c.bf16 %v7105_v24, %v7102_v7 }
 0x349   :  { %28150 = vmatpush3.bf16.msra.mxu1 %v28149_v55  ;;  %v24065_v55 = vld [vmem:[%s33416_s3 + $0xd8] sm:$0xff] }
 0x34a   :  { %28151 = vmatprep.subr.bf16.mxu1 %v29782_v34  ;;  %v7111_v40 = vand.u32 4294901760, %v24065_v55 }
 0x34c   :  { %25912 = vmatmul.mubr.f32.vlgmr.msra.gmra.mrb[0].mxu1 %v30728_v18  ;;  %v30900_v33 = vsub.f32 %v24065_v55, %v7111_v40 }
 0x34d   :  { %28153 = vmatpush3.bf16.msra.mxu1 %v28122_v37  ;;  %25922 = vmatprep.mubr.msk.f32.mxu1 %vm29783_vm8, %v29784_v6  ;;  %v30829_v37 = vpack.c.bf16 %v6617_v28, %v6614_v62 }
 0x34e   :  { %28154 = vmatprep.subr.bf16.mxu1 %v29782_v34  ;;  %v7204_v62 = vand.u32 4294901760, %v30900_v33 }
 0x350   :  { %v7205_v22 = vsub.f32 %v30900_v33, %v7204_v62 }
 0x351   :  { %28156 = vmatpush3.bf16.msra.mxu1 %v28125_v29  ;;  %v30836_v29 = vpack.c.bf16 %v6698_v44, %v6691_v19  ;;  %v4083_v44 = vadd.f32 1.0, %v4081_v15 }
 0x352   :  { %28157 = vmatprep.subr.bf16.mxu1 %v29782_v34 }
 0x353   :  { %29742 = vrcp.f32 %v4083_v44 }
 0x354   :  { %25923 = vmatmul.mubr.f32.vlgmr.msra.gmra.mrb[0].mxu1 %v30728_v18  ;;  %v30824_v18 = vpack.c.bf16 %v6611_v14, %v6608_v4 }
 0x355   :  { %28159 = vmatpush3.bf16.msra.mxu1 %v30678_v51  ;;  %25933 = vmatprep.mubr.msk.f32.mxu1 %vm29783_vm8, %v29784_v6 }
 0x356   :  { %28160 = vmatprep.subr.bf16.mxu1 %v29782_v34 }
 0x359   :  { %28162 = vmatpush3.bf16.msra.mxu1 %v30690_v1 }
 0x35a   :  { %28163 = vmatprep.subr.bf16.mxu1 %v29782_v34 }
 0x35c   :  { %25934 = vmatmul.mubr.f32.vlgmr.msra.gmra.mrb[0].mxu1 %v6186_v23  ;;  %v30892_v23 = vand.u32 4294901760, %v7099_v56 }
 0x35d   :  { %28165 = vmatpush3.bf16.msra.mxu1 %v30540_v57  ;;  %25944 = vmatprep.mubr.msk.f32.mxu1 %vm29783_vm8, %v29784_v6  ;;  %v30950_v11 = vpop.eup %29742 }
 0x35e   :  { %28166 = vmatprep.subr.bf16.mxu1 %v29782_v34  ;;  %v7171_v14 = vsub.f32 %v7099_v56, %v30892_v23  ;;  %v4089_v50 = vmul.f32 1.0614054, %v30950_v11  ;;  %v7599_v56 = vand.u32 4294901760, %v24067_v59 }
 0x360   :  { %v7172_v28 = vand.u32 4294901760, %v7171_v14 }
 0x361   :  { %28168 = vmatpush3.bf16.msra.mxu1 %v30549_v13 }
 0x362   :  { %28169 = vmatprep.subr.bf16.mxu1 %v29782_v34  ;;  %v7173_v27 = vsub.f32 %v7171_v14, %v7172_v28 }
 0x364   :  { %25945 = vmatmul.mubr.f32.vlgmr.msra.gmra.mrb[0].mxu1 %v30762_v35  ;;  %v7174_v19 = vand.u32 4294901760, %v7173_v27 }
 0x365   :  { %28171 = vmatpush3.bf16.msra.mxu1 %v30563_v17  ;;  %25955 = vmatprep.mubr.msk.f32.mxu1 %vm29783_vm8, %v29784_v6 }
 0x366   :  { %28172 = vmatprep.subr.bf16.mxu1 %v29782_v34 }
 0x369   :  { %28174 = vmatpush3.bf16.msra.mxu1 %v30581_v36 }
 0x36a   :  { %28175 = vmatprep.subr.bf16.mxu1 %v29782_v34 }
 0x36c   :  { %25956 = vmatmul.mubr.f32.vlgmr.msra.gmra.mrb[0].mxu1 %v6183_v2  ;;  %v30889_v2 = vsub.f32 %v24063_v41, %v7105_v24  ;;  %v24066_v41 = vld [vmem:[%s33416_s3 + $0xe0] sm:$0xff] }
 0x36d   :  { %28177 = vmatpush3.bf16.msra.mxu1 %v30678_v51  ;;  %25966 = vmatprep.mubr.msk.f32.mxu1 %vm29783_vm8, %v29784_v6 }
 0x36e   :  { %28178 = vmatprep.subr.bf16.mxu1 %v29782_v34  ;;  %v7190_v4 = vand.u32 4294901760, %v30889_v2 }
 0x370   :  { %v7191_v39 = vsub.f32 %v30889_v2, %v7190_v4 }
 0x371   :  { %28180 = vmatpush3.bf16.msra.mxu1 %v30690_v1 }
 0x372   :  { %28181 = vmatprep.subr.bf16.mxu1 %v29782_v34  ;;  %v7192_v10 = vand.u32 4294901760, %v7191_v39 }
 0x374   :  { %25967 = vmatmul.mubr.f32.vlgmr.msra.gmra.mrb[0].mxu1 %v6184_v58  ;;  %v7108_v58 = vand.u32 4294901760, %v24064_v46 }
 0x375   :  { %28183 = vmatpush3.bf16.msra.mxu1 %v30633_v8  ;;  %25977 = vmatprep.mubr.msk.f32.mxu1 %vm29783_vm8, %v29784_v6 }
 0x376   :  { %28184 = vmatprep.subr.bf16.mxu1 %v29782_v34  ;;  %v30898_v38 = vsub.f32 %v24064_v46, %v7108_v58  ;;  %v30921_v49 = vpack.c.bf16 %v7111_v40, %v7108_v58  ;;  %v7596_v46 = vand.u32 4294901760, %v24066_v41 }
 0x378   :  { %v7197_v53 = vand.u32 4294901760, %v30898_v38  ;;  %v28245_v30 = vpack.c.bf16 %v30900_v33, %v30898_v38  ;;  %v30985_v33 = vsub.f32 %v24066_v41, %v7596_v46 }
 0x379   :  { %28186 = vmatpush3.bf16.msra.mxu1 %v30652_v0 }
 0x37a   :  { %28187 = vmatprep.subr.bf16.mxu1 %v29782_v34  ;;  %v28257_v55 = vpack.c.bf16 %v7204_v62, %v7197_v53 }
 0x37c   :  { %25978 = vmatmul.mubr.f32.vlgmr.msra.gmra.mrb[0].mxu1 %v30762_v35 }
 0x37d   :  { %28189 = vmatpush3.bf16.msra.mxu1 %v30678_v51  ;;  %25988 = vmatprep.mubr.msk.f32.mxu1 %vm29783_vm8, %v29784_v6 }
 0x37e   :  { %28190 = vmatprep.subr.bf16.mxu1 %v29782_v34 }
 0x381   :  { %28192 = vmatpush3.bf16.msra.mxu1 %v30690_v1 }
 0x382   :  { %28193 = vmatprep.subr.bf16.mxu1 %v29782_v34 }
 0x384   :  { %25989 = vmatmul.mubr.f32.vlgmr.msra.gmra.mrb[0].mxu1 %v30762_v35  ;;  %v30887_v35 = vsub.f32 %v24062_v26, %v7102_v7  ;;  %v7592_v7 = vrot.slane %v30262_v52, 7  ;;  %v24069_v52 = vld [vmem:[%s33416_s3 + $0xf8] sm:$0xff] }
 0x385   :  { %28195 = vmatpush3.bf16.msra.mxu1 %v30824_v18  ;;  %25999 = vmatprep.mubr.msk.f32.mxu1 %vm29783_vm8, %v29784_v6 }
 0x386   :  { %28196 = vmatprep.subr.bf16.mxu1 %v29782_v34  ;;  %v7183_v9 = vand.u32 4294901760, %v30887_v35  ;;  %v30940_v48 = vpack.c.bf16 %v30889_v2, %v30887_v35  ;;  %v24112_v2 = vld [vmem:[%s33415_s2] ss:$0 sm:$0xff]  ;;  %v7593_v58 = vsel %vm4133_vm10, %v7592_v7, 0 }
 0x387   :  { %v30992_v62 = vand.u32 4294901760, %v7593_v58 }
 0x388   :  { %v7184_v63 = vsub.f32 %v30887_v35, %v7183_v9  ;;  %v30959_v26 = vpack.c.bf16 %v7190_v4, %v7183_v9  ;;  %v24068_v35 = vld [vmem:[%s33416_s3 + $0xf0] sm:$0xff]  ;;  %v30987_v4 = vsub.f32 %v24067_v59, %v7599_v56 }
 0x389   :  { %28198 = vmatpush3.bf16.msra.mxu1 %v30829_v37 }
 0x38a   :  { %28199 = vmatprep.subr.bf16.mxu1 %v29782_v34  ;;  %v7185_v60 = vand.u32 4294901760, %v7184_v63  ;;  %v7605_v63 = vand.u32 4294901760, %v24069_v52 }
 0x38c   :  { %26000 = vmatmul.mubr.f32.vlgmr.msra.gmra.mrb[0].mxu1 %v6680_v5  ;;  %v4091_v5 = vadd.f32 -1.4531521, %v4089_v50  ;;  %v31008_v15 = vsub.f32 %v24069_v52, %v7605_v63 }
 0x38d   :  { %28201 = vmatpush3.bf16.msra.mxu1 %v30836_v29  ;;  %26010 = vmatprep.mubr.msk.f32.mxu1 %vm29783_vm8, %v29784_v6 }
 0x38e   :  { %28202 = vmatprep.subr.bf16.mxu1 %v29782_v34  ;;  %v4093_v24 = vmul.f32 %v30950_v11, %v4091_v5  ;;  %v7698_v59 = vand.u32 4294901760, %v31008_v15 }
 0x390   :  { %v4095_v40 = vadd.f32 1.4214138, %v4093_v24  ;;  %v7699_v52 = vsub.f32 %v31008_v15, %v7698_v59 }
 0x391   :  { %28204 = vmatpush3.bf16.msra.mxu1 %v30840_v16 }
 0x392   :  { %28205 = vmatprep.subr.bf16.mxu1 %v29782_v34 }
 0x394   :  { %26011 = vmatmul.mubr.f32.vlgmr.msra.gmra.mrb[0].mxu1 %v30816_v31 }
 0x395   :  { %28207 = vmatpush3.bf16.msra.mxu1 %v30846_v32  ;;  %26021 = vmatprep.mubr.msk.f32.mxu1 %vm29783_vm8, %v29784_v6 }
 0x396   :  { %28208 = vmatprep.subr.bf16.mxu1 %v29782_v34 }
 0x399   :  { %28210 = vmatpush3.bf16.msra.mxu1 %v30851_v20 }
 0x39a   :  { %28211 = vmatprep.subr.bf16.mxu1 %v29782_v34 }
 0x39c   :  { %26022 = vmatmul.mubr.f32.vlgmr.msra.gmra.mrb[0].mxu1 %v6677_v12  ;;  %v7198_v12 = vsub.f32 %v30898_v38, %v7197_v53  ;;  %v4107_v38 = vsub.f32 0.0, %v30918_v47 }
 0x39d   :  { %28213 = vmatpush3.bf16.msra.mxu1 %v30824_v18  ;;  %26032 = vmatprep.mubr.msk.f32.mxu1 %vm29783_vm8, %v29784_v6 }
 0x39e   :  { %28214 = vmatprep.subr.bf16.mxu1 %v29782_v34  ;;  %v7199_v25 = vand.u32 4294901760, %v7198_v12  ;;  %v7677_v12 = vand.u32 4294901760, %v30985_v33 }
 0x3a1   :  { %28216 = vmatpush3.bf16.msra.mxu1 %v30829_v37 }
 0x3a2   :  { %28217 = vmatprep.subr.bf16.mxu1 %v29782_v34 }
 0x3a4   :  { %26033 = vmatmul.mubr.f32.vlgmr.msra.gmra.mrb[0].mxu1 %v6678_v3  ;;  %v7206_v3 = vand.u32 4294901760, %v7205_v22 }
 0x3a5   :  { %28219 = vmatpush3.bf16.msra.mxu1 %v30863_v21  ;;  %26043 = vmatprep.mubr.msk.f32.mxu1 %vm29783_vm8, %v29784_v6 }
 0x3a6   :  { %28220 = vmatprep.subr.bf16.mxu1 %v29782_v34  ;;  %v28239_v45 = vpack.c.bf16 %v7206_v3, %v7199_v25  ;;  %v7684_v25 = vand.u32 4294901760, %v30987_v4 }
 0x3a8   :  { %v7685_v5 = vsub.f32 %v30987_v4, %v7684_v25  ;;  %v28290_v54 = vpack.c.bf16 %v7684_v25, %v7677_v12  ;;  %v24072_v25 = vld [vmem:[%s33416_s3 + $0x110] sm:$0xff] }
 0x3a9   :  { %28222 = vmatpush3.bf16.msra.mxu1 %v30874_v42 }
 0x3aa   :  { %28223 = vmatprep.subr.bf16.mxu1 %v29782_v34 }
 0x3ac   :  { %26044 = vmatmul.mubr.f32.vlgmr.msra.gmra.mrb[0].mxu1 %v30816_v31 }
 0x3ad   :  { %28225 = vmatpush3.bf16.msra.mxu1 %v30824_v18  ;;  %26054 = vmatprep.mubr.msk.f32.mxu1 %vm29783_vm8, %v29784_v6 }
 0x3ae   :  { %28226 = vmatprep.subr.bf16.mxu1 %v29782_v34 }
 0x3b1   :  { %28228 = vmatpush3.bf16.msra.mxu1 %v30829_v37 }
 0x3b2   :  { %28229 = vmatprep.subr.bf16.mxu1 %v29782_v34 }
 0x3b4   :  { %26055 = vmatmul.mubr.f32.vlgmr.msra.gmra.mrb[0].mxu1 %v30816_v31  ;;  %v30931_v31 = vpack.c.bf16 %v7192_v10, %v7185_v60  ;;  %v4097_v60 = vmul.f32 %v30950_v11, %v4095_v40  ;;  %v4109_v10 = vmul.f32 %v4107_v38, %v30918_v47  ;;  %v31013_v47 = vsub.f32 %v7593_v58, %v30992_v62 }
 0x3b5   :  { %28231 = vmatpush3.bf16.msra.mxu1 %v30909_v61  ;;  %26065 = vmatprep.mubr.msk.f32.mxu1 %vm29783_vm8, %v29784_v6  ;;  %v7700_v38 = vand.u32 4294901760, %v7699_v52 }
 0x3b6   :  { %28232 = vmatprep.subr.bf16.mxu1 %v29782_v34  ;;  %v4112_v44 = vmul.f32 1.442695, %v4109_v10  ;;  %v7666_v7 = vand.u32 4294901760, %v31013_v47 }
 0x3b8   :  { %29744 = vpow2.f32 %v4112_v44 }
 0x3b9   :  { %28234 = vmatpush3.bf16.msra.mxu1 %v30921_v49 }
 0x3ba   :  { %28235 = vmatprep.subr.bf16.mxu1 %v29782_v34 }
 0x3bc   :  { %26066 = vmatmul.mubr.f32.vlgmr.msra.gmra.mrb[0].mxu1 %v7174_v19  ;;  %v4099_v19 = vadd.f32 -0.28449672, %v4097_v60 }
 0x3bd   :  { %28237 = vmatpush3.bf16.msra.mxu1 %v30931_v31  ;;  %26076 = vmatprep.mubr.msk.f32.mxu1 %vm29783_vm8, %v29784_v6 }
 0x3be   :  { %28238 = vmatprep.subr.bf16.mxu1 %v29782_v34 }
 0x3c1   :  { %28240 = vmatpush3.bf16.msra.mxu1 %v28239_v45  ;;  %v31016_v45 = vpack.c.bf16 %v7599_v56, %v7596_v46  ;;  %v4101_v46 = vmul.f32 %v30950_v11, %v4099_v19  ;;  %v7686_v56 = vand.u32 4294901760, %v7685_v5 }
 0x3c2   :  { %28241 = vmatprep.subr.bf16.mxu1 %v29782_v34  ;;  %v29745_v60 = vpop.eup %29744 }
 0x3c4   :  { %26077 = vmatmul.mubr.f32.vlgmr.msra.gmra.mrb[0].mxu1 %v30892_v23 }
 0x3c5   :  { %28243 = vmatpush3.bf16.msra.mxu1 %v30940_v48  ;;  %26087 = vmatprep.mubr.msk.f32.mxu1 %vm29783_vm8, %v29784_v6 }
 0x3c6   :  { %28244 = vmatprep.subr.bf16.mxu1 %v29782_v34 }
 0x3c9   :  { %28246 = vmatpush3.bf16.msra.mxu1 %v28245_v30  ;;  %v7678_v30 = vsub.f32 %v30985_v33, %v7677_v12 }
 0x3ca   :  { %28247 = vmatprep.subr.bf16.mxu1 %v29782_v34 }
 0x3cc   :  { %26088 = vmatmul.mubr.f32.vlgmr.msra.gmra.mrb[0].mxu1 %v7171_v14  ;;  %v7602_v14 = vand.u32 4294901760, %v24068_v35 }
 0x3cd   :  { %28249 = vmatpush3.bf16.msra.mxu1 %v30909_v61  ;;  %26098 = vmatprep.mubr.msk.f32.mxu1 %vm29783_vm8, %v29784_v6 }
 0x3ce   :  { %28250 = vmatprep.subr.bf16.mxu1 %v29782_v34  ;;  %v31006_v27 = vsub.f32 %v24068_v35, %v7602_v14 }
 0x3d0   :  { %v7691_v41 = vand.u32 4294901760, %v31006_v27 }
 0x3d1   :  { %28252 = vmatpush3.bf16.msra.mxu1 %v30921_v49 }
 0x3d2   :  { %28253 = vmatprep.subr.bf16.mxu1 %v29782_v34  ;;  %v7692_v35 = vsub.f32 %v31006_v27, %v7691_v41 }
 0x3d4   :  { %26099 = vmatmul.mubr.f32.vlgmr.msra.gmra.mrb[0].mxu1 %v7172_v28  ;;  %v7693_v40 = vand.u32 4294901760, %v7692_v35 }
 0x3d5   :  { %28255 = vmatpush3.bf16.msra.mxu1 %v30959_v26  ;;  %26109 = vmatprep.mubr.msk.f32.mxu1 %vm29783_vm8, %v29784_v6 }
 0x3d6   :  { %28256 = vmatprep.subr.bf16.mxu1 %v29782_v34 }
 0x3d9   :  { %28258 = vmatpush3.bf16.msra.mxu1 %v28257_v55  ;;  %v26956_v9 = vpop.f32.mrb[2].mxu0  ;;  %v31031_v55 = vpack.c.bf16 %v7605_v63, %v7602_v14 }
 0x3da   :  { %v30989_v39 = vadd.f32 %v26956_v9, %v24112_v2  ;;  %v16054_v53 = vpop.f32.mrb[3].mxu0  ;;  %28259 = vmatprep.subr.bf16.mxu1 %v29782_v34 }
 0x3db   :  { %v30994_v28 = vadd.f32 %v24112_v2, %v16054_v53  ;;  %v4103_v2 = vadd.f32 0.2548296, %v4101_v46  ;;  %v28275_v53 = vpack.c.bf16 %v7700_v38, %v7693_v40 }
 0x3dc   :  { %26110 = vmatmul.mubr.f32.vlgmr.msra.gmra.mrb[0].mxu1 %v30892_v23 }
 0x3dd   :  { %v31001_v22 = vmul.f32 0.70710677, %v30994_v28  ;;  %28261 = vmatpush3.bf16.msra.mxu1 %v30909_v61  ;;  %26120 = vmatprep.mubr.msk.f32.mxu1 %vm29783_vm8, %v29784_v6  ;;  %v4105_v63 = vmul.f32 %v30950_v11, %v4103_v2 }
 0x3de   :  { %28262 = vmatprep.subr.bf16.mxu1 %v29782_v34 }
 0x3df   :  { %v16079_v3 = vand.u32 2147483647, %v31001_v22  ;;  %v4115_v44 = vmul.f32 %v29745_v60, %v4105_v63  ;;  %v24070_v63 = vld [vmem:[%s33416_s3 + $0x100] sm:$0xff]  ;;  %v24071_v60 = vld [vmem:[%s33416_s3 + $0x108] sm:$0xff]  ;;  %vm16119_vm12 = vcmp.ge.f32.partialorder %v31001_v22, 0.0 }
 0x3e0   :  { %v8093_v12 = vand.u32 4294901760, %v24071_v60 }
 0x3e1   :  { %v16081_v50 = vmul.f32 0.3275911, %v16079_v3  ;;  %28264 = vmatpush3.bf16.msra.mxu1 %v30921_v49  ;;  %v7679_v49 = vand.u32 4294901760, %v7678_v30  ;;  %v16107_v14 = vsub.f32 0.0, %v16079_v3 }
 0x3e2   :  { %28265 = vmatprep.subr.bf16.mxu1 %v29782_v34 }
 0x3e3   :  { %v16083_v24 = vadd.f32 1.0, %v16081_v50  ;;  %v28272_v58 = vpack.c.bf16 %v7686_v56, %v7679_v49  ;;  %v16109_v19 = vmul.f32 %v16107_v14, %v16079_v3  ;;  %v28278_v50 = vpack.c.bf16 %v30987_v4, %v30985_v33 }
 0x3e4   :  { %26121 = vmatmul.mubr.f32.vlgmr.msra.gmra.mrb[0].mxu1 %v30892_v23  ;;  %v7667_v23 = vsub.f32 %v31013_v47, %v7666_v7  ;;  %v28281_v49 = vpack.c.bf16 %v31008_v15, %v31006_v27  ;;  %v4075_v14 = vmul.f32 0.5, %v30209_v43  ;;  %v8090_v33 = vand.u32 4294901760, %v24070_v63 }
 0x3e5   :  { %29746 = vrcp.f32 %v16083_v24  ;;  %28267 = vmatpush3.bf16.msra.mxu1 %v31016_v45  ;;  %26131 = vmatprep.mubr.msk.f32.mxu1 %vm29783_vm8, %v29784_v6  ;;  %v16111_v11 = vmul.f32 1.442695, %v16109_v19  ;;  %v4117_v24 = vsub.f32 1.0, %v4115_v44  ;;  %v28293_v4 = vpack.c.bf16 %v7698_v59, %v7691_v41 }
 0x3e6   :  { %28268 = vmatprep.subr.bf16.mxu1 %v29782_v34  ;;  %v7668_v9 = vand.u32 4294901760, %v7667_v23  ;;  %v31101_v41 = vsub.f32 %v24070_v63, %v8090_v33  ;;  %v8096_v59 = vand.u32 4294901760, %v24072_v25 }
 0x3e7   :  { %29748 = vpow2.f32 %v16111_v11  ;;  %v4121_v56 = vsub.f32 0.0, %v4117_v24 }
 0x3e8   :  { %v31112_v22 = vsub.f32 %v24072_v25, %v8096_v59 }
 0x3e9   :  { %28270 = vmatpush3.bf16.msra.mxu1 %v31031_v55  ;;  %v4123_v23 = vsel %vm4119_vm11, %v4117_v24, %v4121_v56 }
 0x3ea   :  { %28271 = vmatprep.subr.bf16.mxu1 %v29782_v34  ;;  %v4125_v40 = vadd.f32 1.0, %v4123_v23 }
 0x3ec   :  { %26132 = vmatmul.mubr.f32.vlgmr.msra.gmra.mrb[0].mxu1 %v7668_v9 }
 0x3ed   :  { %28273 = vmatpush3.bf16.msra.mxu1 %v28272_v58  ;;  %26142 = vmatprep.mubr.msk.f32.mxu1 %vm29783_vm8, %v29784_v6 }
 0x3ee   :  { %28274 = vmatprep.subr.bf16.mxu1 %v29782_v34 }
 0x3ef   :  { %v29747_v10 = vpop.eup %29746 }
 0x3f0   :  { %v16089_v30 = vmul.f32 1.0614054, %v29747_v10 }
 0x3f1   :  { %28276 = vmatpush3.bf16.msra.mxu1 %v28275_v53  ;;  %v29749_v9 = vpop.eup %29748 }
 0x3f2   :  { %v16091_v5 = vadd.f32 -1.4531521, %v16089_v30  ;;  %28277 = vmatprep.subr.bf16.mxu1 %v29782_v34  ;;  %v31104_v30 = vsub.f32 %v24071_v60, %v8093_v12 }
 0x3f4   :  { %v16093_v46 = vmul.f32 %v29747_v10, %v16091_v5  ;;  %26143 = vmatmul.mubr.f32.vlgmr.msra.gmra.mrb[0].mxu1 %v30992_v62 }
 0x3f5   :  { %28279 = vmatpush3.bf16.msra.mxu1 %v28278_v50  ;;  %26153 = vmatprep.mubr.msk.f32.mxu1 %vm29783_vm8, %v29784_v6 }
 0x3f6   :  { %v16095_v3 = vadd.f32 1.4214138, %v16093_v46  ;;  %28280 = vmatprep.subr.bf16.mxu1 %v29782_v34  ;;  %v8171_v46 = vand.u32 4294901760, %v31101_v41 }
 0x3f8   :  { %v16097_v35 = vmul.f32 %v29747_v10, %v16095_v3 }
 0x3f9   :  { %28282 = vmatpush3.bf16.msra.mxu1 %v28281_v49  ;;  %v8178_v49 = vand.u32 4294901760, %v31104_v30 }
 0x3fa   :  { %v16099_v52 = vadd.f32 -0.28449672, %v16097_v35  ;;  %28283 = vmatprep.subr.bf16.mxu1 %v29782_v34  ;;  %v31127_v35 = vpack.c.bf16 %v8093_v12, %v8090_v33 }
 0x3fb   :  { %v8179_v23 = vsub.f32 %v31104_v30, %v8178_v49 }
 0x3fc   :  { %v16101_v2 = vmul.f32 %v29747_v10, %v16099_v52  ;;  %26154 = vmatmul.mubr.f32.vlgmr.msra.gmra.mrb[0].mxu1 %v31013_v47  ;;  %v24073_v47 = vld [vmem:[%s33416_s3 + $0x118] sm:$0xff]  ;;  %v8172_v52 = vsub.f32 %v31101_v41, %v8171_v46 }
 0x3fd   :  { %28285 = vmatpush3.bf16.msra.mxu1 %v31016_v45  ;;  %26164 = vmatprep.mubr.msk.f32.mxu1 %vm29783_vm8, %v29784_v6  ;;  %v8099_v50 = vand.u32 4294901760, %v24073_v47 }
 0x3fe   :  { %v16103_v58 = vadd.f32 0.2548296, %v16101_v2  ;;  %28286 = vmatprep.subr.bf16.mxu1 %v29782_v34  ;;  %v8185_v2 = vand.u32 4294901760, %v31112_v22 }
 0x400   :  { %v16105_v38 = vmul.f32 %v29747_v10, %v16103_v58  ;;  %v31081_v10 = vmul.f32 %v4125_v40, %v4075_v14  ;;  %v8173_v14 = vand.u32 4294901760, %v8172_v52  ;;  %v8186_v63 = vsub.f32 %v31112_v22, %v8185_v2 }
 0x401   :  { %28288 = vmatpush3.bf16.msra.mxu1 %v31031_v55 }
 0x402   :  { %v16115_v53 = vmul.f32 %v29749_v9, %v16105_v38  ;;  %28289 = vmatprep.subr.bf16.mxu1 %v29782_v34  ;;  %v8087_v27 = vsel %vm4133_vm10, %v31081_v10, 0 }
 0x403   :  { %v31107_v5 = vand.u32 4294901760, %v8087_v27 }
 0x404   :  { %v16117_v43 = vsub.f32 1.0, %v16115_v53  ;;  %26165 = vmatmul.mubr.f32.vlgmr.msra.gmra.mrb[0].mxu1 %v7666_v7  ;;  %v16075_v7 = vmul.f32 0.5, %v30994_v28  ;;  %v31117_v28 = vsub.f32 %v24073_v47, %v8099_v50  ;;  %v24074_v47 = vld [vmem:[%s33416_s3 + $0x120] sm:$0xff] }
 0x405   :  { %28291 = vmatpush3.bf16.msra.mxu1 %v28290_v54  ;;  %26175 = vmatprep.mubr.msk.f32.mxu1 %vm29783_vm8, %v29784_v6  ;;  %v31124_v3 = vsub.f32 %v8087_v27, %v31107_v5  ;;  %v8180_v54 = vand.u32 4294901760, %v8179_v23  ;;  %v24075_v27 = vld [vmem:[%s33416_s3 + $0x128] sm:$0xff] }
 0x406   :  { %v16121_v19 = vsub.f32 0.0, %v16117_v43  ;;  %28292 = vmatprep.subr.bf16.mxu1 %v29782_v34  ;;  %v8192_v58 = vand.u32 4294901760, %v31117_v28 }
 0x407   :  { %v8160_v38 = vand.u32 4294901760, %v31124_v3  ;;  %v28308_v33 = vpack.c.bf16 %v8180_v54, %v8173_v14 }
 0x408   :  { %v16123_v15 = vsel %vm16119_vm12, %v16117_v43, %v16121_v19  ;;  %v8193_v53 = vsub.f32 %v31117_v28, %v8192_v58 }
 0x409   :  { %v16125_v44 = vadd.f32 1.0, %v16123_v15  ;;  %28294 = vmatpush3.bf16.msra.mxu1 %v28293_v4  ;;  %v8161_v60 = vsub.f32 %v31124_v3, %v8160_v38  ;;  %v8187_v4 = vand.u32 4294901760, %v8186_v63  ;;  %v8580_v15 = vrot.slane %v31081_v10, 1 }
 0x40a   :  { %28295 = vmatprep.subr.bf16.mxu1 %v29782_v34  ;;  %v8194_v12 = vand.u32 4294901760, %v8193_v53 }
 0x40b   :  { %v31109_v11 = vmul.f32 %v16125_v44, %v16075_v7  ;;  %v8162_v25 = vand.u32 4294901760, %v8161_v60  ;;  %v24076_v44 = vld [vmem:[%s33416_s3 + $0x130] sm:$0xff] }
 0x40c   :  { %26176 = vmatmul.mubr.f32.vlgmr.msra.gmra.mrb[0].mxu1 %v30992_v62  ;;  %v28311_v19 = vpack.c.bf16 %v8194_v12, %v8187_v4 }
 0x40d   :  { %28297 = vmatpush3.bf16.msra.mxu1 %v31016_v45  ;;  %26186 = vmatprep.mubr.msk.f32.mxu1 %vm29783_vm8, %v29784_v6  ;;  %v18106_v24 = vrot.slane %v31109_v11, 4 }
 0x40e   :  { %28298 = vmatprep.subr.bf16.mxu1 %v29782_v34 }
 0x40f   :  { %v18107_v56 = vsel %vm4133_vm10, %v18106_v24, 0 }
 0x410   :  { %v31129_v45 = vand.u32 4294901760, %v18107_v56 }
 0x411   :  { %28300 = vmatpush3.bf16.msra.mxu1 %v31031_v55  ;;  %v31144_v55 = vpack.c.bf16 %v8099_v50, %v8096_v59  ;;  %v8587_v59 = vand.u32 4294901760, %v24075_v27  ;;  %v8581_v50 = vsel %vm4133_vm10, %v8580_v15, 0 }
 0x412   :  { %28301 = vmatprep.subr.bf16.mxu1 %v29782_v34  ;;  %v18179_v40 = vsub.f32 %v18107_v56, %v31129_v45 }
 0x413   :  { %v31239_v24 = vsub.f32 %v24075_v27, %v8587_v59 }
 0x414   :  { %26187 = vmatmul.mubr.f32.vlgmr.msra.gmra.mrb[0].mxu1 %v30992_v62  ;;  %v18180_v9 = vand.u32 4294901760, %v18179_v40 }
 0x415   :  { %28303 = vmatpush3.bf16.msra.mxu1 %v31127_v35  ;;  %26197 = vmatprep.mubr.msk.f32.mxu1 %vm29783_vm8, %v29784_v6  ;;  %v8672_v23 = vand.u32 4294901760, %v31239_v24 }
 0x416   :  { %28304 = vmatprep.subr.bf16.mxu1 %v29782_v34  ;;  %v18181_v62 = vsub.f32 %v18179_v40, %v18180_v9 }
 0x418   :  { %v18182_v43 = vand.u32 4294901760, %v18181_v62 }
 0x419   :  { %28306 = vmatpush3.bf16.msra.mxu1 %v31144_v55 }
 0x41a   :  { %27230 = vmatmul.mubr.f32.vlgmr.msra.gmra.mrb[4].mxu0 %v18182_v43  ;;  %28307 = vmatprep.subr.bf16.mxu1 %v29782_v34 }
 0x41b   :  { %28741 = vmatpush3.bf16.msra.mxu0 %v30540_v57  ;;  %27240 = vmatprep.mubr.msk.f32.mxu0 %vm29783_vm8, %v29784_v6  ;;  %v28314_v57 = vpack.c.bf16 %v31104_v30, %v31101_v41  ;;  %v28329_v41 = vpack.c.bf16 %v8192_v58, %v8185_v2  ;;  %v24077_v30 = vld [vmem:[%s33416_s3 + $0x138] sm:$0xff] }
 0x41c   :  { %26198 = vmatmul.mubr.f32.vlgmr.msra.gmra.mrb[0].mxu1 %v8162_v25  ;;  %28742 = vmatprep.subr.bf16.mxu0 %v29782_v34 }
 0x41d   :  { %28309 = vmatpush3.bf16.msra.mxu1 %v28308_v33  ;;  %26208 = vmatprep.mubr.msk.f32.mxu1 %vm29783_vm8, %v29784_v6 }
 0x41e   :  { %28310 = vmatprep.subr.bf16.mxu1 %v29782_v34 }
 0x41f   :  { %28744 = vmatpush3.bf16.msra.mxu0 %v30549_v13  ;;  %v28317_v13 = vpack.c.bf16 %v31117_v28, %v31112_v22 }
 0x420   :  { %28745 = vmatprep.subr.bf16.mxu0 %v29782_v34 }
 0x421   :  { %28312 = vmatpush3.bf16.msra.mxu1 %v28311_v19  ;;  %v24078_v19 = vld [vmem:[%s33416_s3 + $0x140] sm:$0xff] }
 0x422   :  { %27241 = vmatmul.mubr.f32.vlgmr.msra.gmra.mrb[4].mxu0 %v31129_v45  ;;  %28313 = vmatprep.subr.bf16.mxu1 %v29782_v34 }
 0x423   :  { %28747 = vmatpush3.bf16.msra.mxu0 %v30563_v17  ;;  %27251 = vmatprep.mubr.msk.f32.mxu0 %vm29783_vm8, %v29784_v6  ;;  %v28326_v17 = vpack.c.bf16 %v8178_v49, %v8171_v46  ;;  %v8590_v46 = vand.u32 4294901760, %v24076_v44  ;;  %v8593_v49 = vand.u32 4294901760, %v24077_v30 }
 0x424   :  { %26209 = vmatmul.mubr.f32.vlgmr.msra.gmra.mrb[0].mxu1 %v31107_v5  ;;  %28748 = vmatprep.subr.bf16.mxu0 %v29782_v34 }
 0x425   :  { %28315 = vmatpush3.bf16.msra.mxu1 %v28314_v57  ;;  %26219 = vmatprep.mubr.msk.f32.mxu1 %vm29783_vm8, %v29784_v6  ;;  %v31256_v56 = vsub.f32 %v24076_v44, %v8590_v46  ;;  %v31258_v52 = vsub.f32 %v24077_v30, %v8593_v49  ;;  %v24079_v57 = vld [vmem:[%s33416_s3 + $0x148] sm:$0xff] }
 0x426   :  { %28316 = vmatprep.subr.bf16.mxu1 %v29782_v34  ;;  %v9081_v27 = vand.u32 4294901760, %v24079_v57 }
 0x427   :  { %28750 = vmatpush3.bf16.msra.mxu0 %v30581_v36  ;;  %v18599_v36 = vrot.slane %v31109_v11, 5 }
 0x428   :  { %28751 = vmatprep.subr.bf16.mxu0 %v29782_v34 }
 0x429   :  { %28318 = vmatpush3.bf16.msra.mxu1 %v28317_v13  ;;  %v18600_v7 = vsel %vm4133_vm10, %v18599_v36, 0  ;;  %v9074_v13 = vrot.slane %v31081_v10, 2  ;;  %v24136_v36 = vld [vmem:[%s33416_s3 + $0xd8] sm:$0xff] }
 0x42a   :  { %27252 = vmatmul.mubr.f32.vlgmr.msra.gmra.mrb[4].mxu0 %v18179_v40  ;;  %28319 = vmatprep.subr.bf16.mxu1 %v29782_v34  ;;  %v31235_v22 = vand.u32 4294901760, %v18600_v7 }
 0x42b   :  { %28753 = vmatpush3.bf16.msra.mxu0 %v30678_v51  ;;  %27262 = vmatprep.mubr.msk.f32.mxu0 %vm29783_vm8, %v29784_v6  ;;  %v9075_v44 = vsel %vm4133_vm10, %v9074_v13, 0 }
 0x42c   :  { %26220 = vmatmul.mubr.f32.vlgmr.msra.gmra.mrb[0].mxu1 %v31124_v3  ;;  %28754 = vmatprep.subr.bf16.mxu0 %v29782_v34  ;;  %v31243_v3 = vand.u32 4294901760, %v8581_v50 }
 0x42d   :  { %28321 = vmatpush3.bf16.msra.mxu1 %v31127_v35  ;;  %26230 = vmatprep.mubr.msk.f32.mxu1 %vm29783_vm8, %v29784_v6 }
 0x42e   :  { %28322 = vmatprep.subr.bf16.mxu1 %v29782_v34  ;;  %v31264_v2 = vsub.f32 %v8581_v50, %v31243_v3 }
 0x42f   :  { %28756 = vmatpush3.bf16.msra.mxu0 %v30690_v1 }
 0x430   :  { %28757 = vmatprep.subr.bf16.mxu0 %v29782_v34  ;;  %v8654_v14 = vand.u32 4294901760, %v31264_v2 }
 0x431   :  { %28324 = vmatpush3.bf16.msra.mxu1 %v31144_v55 }
 0x432   :  { %27263 = vmatmul.mubr.f32.vlgmr.msra.gmra.mrb[4].mxu0 %v18180_v9  ;;  %28325 = vmatprep.subr.bf16.mxu1 %v29782_v34  ;;  %v8679_v9 = vand.u32 4294901760, %v31256_v56  ;;  %v8655_v62 = vsub.f32 %v31264_v2, %v8654_v14 }
 0x433   :  { %28759 = vmatpush3.bf16.msra.mxu0 %v30633_v8  ;;  %27273 = vmatprep.mubr.msk.f32.mxu0 %vm29783_vm8, %v29784_v6  ;;  %v8584_v8 = vand.u32 4294901760, %v24074_v47 }
 0x434   :  { %26231 = vmatmul.mubr.f32.vlgmr.msra.gmra.mrb[0].mxu1 %v8160_v38  ;;  %28760 = vmatprep.subr.bf16.mxu0 %v29782_v34  ;;  %v8673_v38 = vsub.f32 %v31239_v24, %v8672_v23  ;;  %v8680_v53 = vsub.f32 %v31256_v56, %v8679_v9  ;;  %v8656_v12 = vand.u32 4294901760, %v8655_v62 }
 0x435   :  { %28327 = vmatpush3.bf16.msra.mxu1 %v28326_v17  ;;  %26241 = vmatprep.mubr.msk.f32.mxu1 %vm29783_vm8, %v29784_v6  ;;  %v31237_v28 = vsub.f32 %v24074_v47, %v8584_v8  ;;  %v24135_v17 = vld [vmem:[%s33416_s3 + $0xd0] sm:$0xff]  ;;  %v9078_v47 = vand.u32 4294901760, %v24078_v19 }
 0x436   :  { %28328 = vmatprep.subr.bf16.mxu1 %v29782_v34  ;;  %v8674_v63 = vand.u32 4294901760, %v8673_v38  ;;  %v8681_v33 = vand.u32 4294901760, %v8680_v53 }
 0x437   :  { %28762 = vmatpush3.bf16.msra.mxu0 %v30652_v0  ;;  %v31251_v0 = vsub.f32 %v18600_v7, %v31235_v22  ;;  %v19105_v7 = vand.u32 4294901760, %v24136_v36  ;;  %v31395_v50 = vsub.f32 %v24078_v19, %v9078_v47 }
 0x438   :  { %28763 = vmatprep.subr.bf16.mxu0 %v29782_v34 }
 0x439   :  { %28330 = vmatpush3.bf16.msra.mxu1 %v28329_v41  ;;  %v18673_v58 = vand.u32 4294901760, %v31251_v0  ;;  %v24080_v41 = vld [vmem:[%s33416_s3 + $0x150] sm:$0xff] }
 0x43a   :  { %27274 = vmatmul.mubr.f32.vlgmr.msra.gmra.mrb[4].mxu0 %v31129_v45  ;;  %28331 = vmatprep.subr.bf16.mxu1 %v29782_v34 }
 0x43b   :  { %28765 = vmatpush3.bf16.msra.mxu0 %v30678_v51  ;;  %27284 = vmatprep.mubr.msk.f32.mxu0 %vm29783_vm8, %v29784_v6  ;;  %v8665_v51 = vand.u32 4294901760, %v31237_v28  ;;  %v18674_v54 = vsub.f32 %v31251_v0, %v18673_v58 }
 0x43c   :  { %26242 = vmatmul.mubr.f32.vlgmr.msra.gmra.mrb[0].mxu1 %v31107_v5  ;;  %28766 = vmatprep.subr.bf16.mxu0 %v29782_v34 }
 0x43d   :  { %28333 = vmatpush3.bf16.msra.mxu1 %v31127_v35  ;;  %26252 = vmatprep.mubr.msk.f32.mxu1 %vm29783_vm8, %v29784_v6  ;;  %v31268_v35 = vpack.c.bf16 %v8587_v59, %v8584_v8  ;;  %v8666_v40 = vsub.f32 %v31237_v28, %v8665_v51  ;;  %v18675_v60 = vand.u32 4294901760, %v18674_v54  ;;  %v24081_v8 = vld [vmem:[%s33416_s3 + $0x158] sm:$0xff]  ;;  %v19102_v59 = vand.u32 4294901760, %v24135_v17 }
 0x43e   :  { %28334 = vmatprep.subr.bf16.mxu1 %v29782_v34 }
 0x43f   :  { %28768 = vmatpush3.bf16.msra.mxu0 %v30690_v1  ;;  %v8686_v1 = vand.u32 4294901760, %v31258_v52 }
 0x440   :  { %28769 = vmatprep.subr.bf16.mxu0 %v29782_v34 }
 0x441   :  { %28336 = vmatpush3.bf16.msra.mxu1 %v31144_v55  ;;  %v31288_v55 = vpack.c.bf16 %v8593_v49, %v8590_v46  ;;  %v9087_v46 = vand.u32 4294901760, %v24081_v8  ;;  %v31406_v49 = vsub.f32 %v24135_v17, %v19102_v59 }
 0x442   :  { %27285 = vmatmul.mubr.f32.vlgmr.msra.gmra.mrb[4].mxu0 %v31129_v45  ;;  %28337 = vmatprep.subr.bf16.mxu1 %v29782_v34  ;;  %v8667_v45 = vand.u32 4294901760, %v8666_v40 }
 0x443   :  { %28771 = vmatpush3.bf16.msra.mxu0 %v30824_v18  ;;  %27295 = vmatprep.mubr.msk.f32.mxu0 %vm29783_vm8, %v29784_v6 }
 0x444   :  { %26253 = vmatmul.mubr.f32.vlgmr.msra.gmra.mrb[0].mxu1 %v31107_v5  ;;  %28772 = vmatprep.subr.bf16.mxu0 %v29782_v34  ;;  %v8687_v5 = vsub.f32 %v31258_v52, %v8686_v1  ;;  %v28344_v43 = vpack.c.bf16 %v8674_v63, %v8667_v45  ;;  %v31452_v63 = vpack.c.bf16 %v19105_v7, %v19102_v59 }
 0x445   :  { %28339 = vmatpush3.bf16.msra.mxu1 %v31268_v35  ;;  %26263 = vmatprep.mubr.msk.f32.mxu1 %vm29783_vm8, %v29784_v6 }
 0x446   :  { %28340 = vmatprep.subr.bf16.mxu1 %v29782_v34  ;;  %v8688_v4 = vand.u32 4294901760, %v8687_v5 }
 0x447   :  { %28774 = vmatpush3.bf16.msra.mxu0 %v30829_v37 }
 0x448   :  { %28775 = vmatprep.subr.bf16.mxu0 %v29782_v34  ;;  %v28347_v25 = vpack.c.bf16 %v8688_v4, %v8681_v33 }
 0x449   :  { %28342 = vmatpush3.bf16.msra.mxu1 %v31288_v55 }
 0x44a   :  { %27296 = vmatmul.mubr.f32.vlgmr.msra.gmra.mrb[4].mxu0 %v18675_v60  ;;  %28343 = vmatprep.subr.bf16.mxu1 %v29782_v34 }
 0x44b   :  { %28777 = vmatpush3.bf16.msra.mxu0 %v30836_v29  ;;  %27306 = vmatprep.mubr.msk.f32.mxu0 %vm29783_vm8, %v29784_v6  ;;  %v28350_v29 = vpack.c.bf16 %v31239_v24, %v31237_v28  ;;  %v31397_v28 = vsub.f32 %v24079_v57, %v9081_v27  ;;  %v9084_v24 = vand.u32 4294901760, %v24080_v41 }
 0x44c   :  { %26264 = vmatmul.mubr.f32.vlgmr.msra.gmra.mrb[0].mxu1 %v8656_v12  ;;  %28778 = vmatprep.subr.bf16.mxu0 %v29782_v34 }
 0x44d   :  { %28345 = vmatpush3.bf16.msra.mxu1 %v28344_v43  ;;  %26274 = vmatprep.mubr.msk.f32.mxu1 %vm29783_vm8, %v29784_v6  ;;  %v31467_v62 = vpack.c.bf16 %v9087_v46, %v9084_v24 }
 0x44e   :  { %28346 = vmatprep.subr.bf16.mxu1 %v29782_v34 }
 0x44f   :  { %28780 = vmatpush3.bf16.msra.mxu0 %v30840_v16  ;;  %v28353_v16 = vpack.c.bf16 %v31258_v52, %v31256_v56  ;;  %v31411_v56 = vmul.f32 0.70710677, %v30989_v39 }
 0x450   :  { %28781 = vmatprep.subr.bf16.mxu0 %v29782_v34 }
 0x451   :  { %28348 = vmatpush3.bf16.msra.mxu1 %v28347_v25  ;;  %v31435_v38 = vand.u32 2147483647, %v31411_v56  ;;  %vm16120_vm13 = vcmp.ge.f32.partialorder %v31411_v56, 0.0  ;;  %v16076_v56 = vmul.f32 0.5, %v30989_v39 }
 0x452   :  { %27307 = vmatmul.mubr.f32.vlgmr.msra.gmra.mrb[4].mxu0 %v31235_v22  ;;  %28349 = vmatprep.subr.bf16.mxu1 %v29782_v34 }
 0x453   :  { %28783 = vmatpush3.bf16.msra.mxu0 %v30846_v32  ;;  %27317 = vmatprep.mubr.msk.f32.mxu0 %vm29783_vm8, %v29784_v6  ;;  %v28362_v32 = vpack.c.bf16 %v8672_v23, %v8665_v51  ;;  %v31423_v51 = vsub.f32 %v24081_v8, %v9087_v46  ;;  %v9159_v23 = vand.u32 4294901760, %v31395_v50  ;;  %v31538_v8 = vld [vmem:[%s33416_s3 + $0xe8] sm:$0xff] }
 0x454   :  { %26275 = vmatmul.mubr.f32.vlgmr.msra.gmra.mrb[0].mxu1 %v31243_v3  ;;  %28784 = vmatprep.subr.bf16.mxu0 %v29782_v34 }
 0x455   :  { %28351 = vmatpush3.bf16.msra.mxu1 %v28350_v29  ;;  %26285 = vmatprep.mubr.msk.f32.mxu1 %vm29783_vm8, %v29784_v6  ;;  %v9180_v45 = vand.u32 4294901760, %v31423_v51 }
 0x456   :  { %28352 = vmatprep.subr.bf16.mxu1 %v29782_v34 }
 0x457   :  { %28786 = vmatpush3.bf16.msra.mxu0 %v30851_v20  ;;  %v19092_v20 = vrot.slane %v31109_v11, 6 }
 0x458   :  { %28787 = vmatprep.subr.bf16.mxu0 %v29782_v34 }
 0x459   :  { %28354 = vmatpush3.bf16.msra.mxu1 %v28353_v16  ;;  %v19093_v15 = vsel %vm4133_vm10, %v19092_v20, 0 }
 0x45a   :  { %27318 = vmatmul.mubr.f32.vlgmr.msra.gmra.mrb[4].mxu0 %v31251_v0  ;;  %28355 = vmatprep.subr.bf16.mxu1 %v29782_v34  ;;  %v31393_v30 = vand.u32 4294901760, %v19093_v15  ;;  %v31408_v0 = vsub.f32 %v24136_v36, %v19105_v7  ;;  %v19585_v7 = vrot.slane %v31109_v11, 7 }
 0x45b   :  { %28789 = vmatpush3.bf16.msra.mxu0 %v30824_v18  ;;  %27328 = vmatprep.mubr.msk.f32.mxu0 %vm29783_vm8, %v29784_v6 }
 0x45c   :  { %26286 = vmatmul.mubr.f32.vlgmr.msra.gmra.mrb[0].mxu1 %v31264_v2  ;;  %28790 = vmatprep.subr.bf16.mxu0 %v29782_v34  ;;  %v31416_v52 = vsub.f32 %v19093_v15, %v31393_v30  ;;  %v9166_v2 = vand.u32 4294901760, %v31397_v28  ;;  %v19198_v40 = vand.u32 4294901760, %v31408_v0 }
 0x45d   :  { %28357 = vmatpush3.bf16.msra.mxu1 %v31268_v35  ;;  %26296 = vmatprep.mubr.msk.f32.mxu1 %vm29783_vm8, %v29784_v6 }
 0x45e   :  { %28358 = vmatprep.subr.bf16.mxu1 %v29782_v34  ;;  %v19199_v5 = vsub.f32 %v31408_v0, %v19198_v40  ;;  %v28398_v59 = vpack.c.bf16 %v9166_v2, %v9159_v23 }
 0x45f   :  { %28792 = vmatpush3.bf16.msra.mxu0 %v30829_v37 }
 0x460   :  { %28793 = vmatprep.subr.bf16.mxu0 %v29782_v34  ;;  %v19200_v29 = vand.u32 4294901760, %v19199_v5 }
 0x461   :  { %28360 = vmatpush3.bf16.msra.mxu1 %v31288_v55 }
 0x462   :  { %27329 = vmatmul.mubr.f32.vlgmr.msra.gmra.mrb[4].mxu0 %v18673_v58  ;;  %28361 = vmatprep.subr.bf16.mxu1 %v29782_v34 }
 0x463   :  { %28795 = vmatpush3.bf16.msra.mxu0 %v30863_v21  ;;  %27339 = vmatprep.mubr.msk.f32.mxu0 %vm29783_vm8, %v29784_v6  ;;  %v28365_v21 = vpack.c.bf16 %v8686_v1, %v8679_v9  ;;  %v31438_v9 = vpack.c.bf16 %v9081_v27, %v9078_v47  ;;  %v19166_v1 = vand.u32 4294901760, %v31416_v52 }
 0x464   :  { %26297 = vmatmul.mubr.f32.vlgmr.msra.gmra.mrb[0].mxu1 %v8654_v14  ;;  %28796 = vmatprep.subr.bf16.mxu0 %v29782_v34  ;;  %v9160_v14 = vsub.f32 %v31395_v50, %v9159_v23  ;;  %v19592_v23 = vand.u32 4294901760, %v31538_v8 }
 0x465   :  { %28363 = vmatpush3.bf16.msra.mxu1 %v28362_v32  ;;  %26307 = vmatprep.mubr.msk.f32.mxu1 %vm29783_vm8, %v29784_v6  ;;  %v19167_v60 = vsub.f32 %v31416_v52, %v19166_v1 }
 0x466   :  { %28364 = vmatprep.subr.bf16.mxu1 %v29782_v34  ;;  %v9161_v43 = vand.u32 4294901760, %v9160_v14 }
 0x467   :  { %28798 = vmatpush3.bf16.msra.mxu0 %v30874_v42  ;;  %v31401_v42 = vand.u32 4294901760, %v9075_v44  ;;  %v19168_v16 = vand.u32 4294901760, %v19167_v60 }
 0x468   :  { %28799 = vmatprep.subr.bf16.mxu0 %v29782_v34 }
 0x469   :  { %28366 = vmatpush3.bf16.msra.mxu1 %v28365_v21  ;;  %v31429_v58 = vsub.f32 %v9075_v44, %v31401_v42  ;;  %v28821_v21 = vpack.c.bf16 %v31408_v0, %v31406_v49 }
 0x46a   :  { %27340 = vmatmul.mubr.f32.vlgmr.msra.gmra.mrb[4].mxu0 %v31235_v22  ;;  %28367 = vmatprep.subr.bf16.mxu1 %v29782_v34 }
 0x46b   :  { %28801 = vmatpush3.bf16.msra.mxu0 %v30824_v18  ;;  %27350 = vmatprep.mubr.msk.f32.mxu0 %vm29783_vm8, %v29784_v6  ;;  %v31421_v18 = vsub.f32 %v24080_v41, %v9084_v24  ;;  %v31533_v41 = vld [vmem:[%s33416_s3 + $0xe0] sm:$0xff] }
 0x46c   :  { %26308 = vmatmul.mubr.f32.vlgmr.msra.gmra.mrb[0].mxu1 %v31243_v3  ;;  %28802 = vmatprep.subr.bf16.mxu0 %v29782_v34  ;;  %v31553_v24 = vld [vmem:[%s33416_s3 + $0x160] sm:$0xff] }
 0x46d   :  { %28369 = vmatpush3.bf16.msra.mxu1 %v31268_v35  ;;  %26318 = vmatprep.mubr.msk.f32.mxu1 %vm29783_vm8, %v29784_v6  ;;  %v19191_v35 = vand.u32 4294901760, %v31406_v49  ;;  %v9173_v54 = vand.u32 4294901760, %v31421_v18  ;;  %v28389_v47 = vpack.c.bf16 %v31423_v51, %v31421_v18 }
 0x46e   :  { %28370 = vmatprep.subr.bf16.mxu1 %v29782_v34 }
 0x46f   :  { %28804 = vmatpush3.bf16.msra.mxu0 %v30829_v37  ;;  %v9167_v37 = vsub.f32 %v31397_v28, %v9166_v2  ;;  %v19192_v53 = vsub.f32 %v31406_v49, %v19191_v35  ;;  %v9174_v4 = vsub.f32 %v31421_v18, %v9173_v54  ;;  %v28833_v46 = vpack.c.bf16 %v19198_v40, %v19191_v35  ;;  %v31581_v49 = vld [vmem:[%s33416_s3 + $0xf8] sm:$0xff]  ;;  %v31597_v18 = vld [vmem:[%s33416_s3 + $0x170] sm:$0xff] }
 0x470   :  { %28805 = vmatprep.subr.bf16.mxu0 %v29782_v34  ;;  %v28401_v0 = vpack.c.bf16 %v9180_v45, %v9173_v54  ;;  %v9572_v2 = vand.u32 4294901760, %v31553_v24  ;;  %v19586_v35 = vsel %vm4133_vm10, %v19585_v7, 0  ;;  %v31609_v54 = vsub.f32 %v31538_v8, %v19592_v23 }
 0x471   :  { %28372 = vmatpush3.bf16.msra.mxu1 %v31288_v55  ;;  %v9148_v55 = vand.u32 4294901760, %v31429_v58  ;;  %v9168_v33 = vand.u32 4294901760, %v9167_v37  ;;  %v19193_v25 = vand.u32 4294901760, %v19192_v53  ;;  %v9175_v19 = vand.u32 4294901760, %v9174_v4 }
 0x472   :  { %27351 = vmatmul.mubr.f32.vlgmr.msra.gmra.mrb[4].mxu0 %v31235_v22  ;;  %28373 = vmatprep.subr.bf16.mxu1 %v29782_v34  ;;  %v16082_v22 = vmul.f32 0.3275911, %v31435_v38  ;;  %v31614_v53 = vand.u32 4294901760, %v19586_v35  ;;  %v31617_v5 = vsub.f32 %v31553_v24, %v9572_v2  ;;  %v9578_v60 = vand.u32 4294901760, %v31597_v18 }
 0x473   :  { %28807 = vmatpush3.bf16.msra.mxu0 %v30909_v61  ;;  %27361 = vmatprep.mubr.msk.f32.mxu0 %vm29783_vm8, %v29784_v6  ;;  %v9149_v12 = vsub.f32 %v31429_v58, %v9148_v55  ;;  %v28380_v20 = vpack.c.bf16 %v9168_v33, %v9161_v43  ;;  %v28815_v17 = vpack.c.bf16 %v19200_v29, %v19193_v25 }
 0x474   :  { %26319 = vmatmul.mubr.f32.vlgmr.msra.gmra.mrb[0].mxu1 %v31243_v3  ;;  %28808 = vmatprep.subr.bf16.mxu0 %v29782_v34  ;;  %v9181_v3 = vsub.f32 %v31423_v51, %v9180_v45  ;;  %v16084_v32 = vadd.f32 1.0, %v16082_v22  ;;  %v31602_v51 = vld [vmem:[%s33416_s3 + $0x178] sm:$0xff] }
 0x475   :  { %28375 = vmatpush3.bf16.msra.mxu1 %v31438_v9  ;;  %26329 = vmatprep.mubr.msk.f32.mxu1 %vm29783_vm8, %v29784_v6  ;;  %v9150_v13 = vand.u32 4294901760, %v9149_v12  ;;  %v9581_v43 = vand.u32 4294901760, %v31602_v51 }
 0x476   :  { %28376 = vmatprep.subr.bf16.mxu1 %v29782_v34  ;;  %v9182_v57 = vand.u32 4294901760, %v9181_v3  ;;  %29750 = vrcp.f32 %v16084_v32 }
 0x477   :  { %28810 = vmatpush3.bf16.msra.mxu0 %v31452_v63  ;;  %v31653_v32 = vsub.f32 %v31602_v51, %v9581_v43 }
 0x478   :  { %28811 = vmatprep.subr.bf16.mxu0 %v29782_v34  ;;  %v28383_v36 = vpack.c.bf16 %v9182_v57, %v9175_v19 }
 0x479   :  { %28378 = vmatpush3.bf16.msra.mxu1 %v31467_v62 }
 0x47a   :  { %27362 = vmatmul.mubr.f32.vlgmr.msra.gmra.mrb[4].mxu0 %v19168_v16  ;;  %28379 = vmatprep.subr.bf16.mxu1 %v29782_v34  ;;  %v31644_v16 = vsub.f32 %v19586_v35, %v31614_v53 }
 0x47b   :  { %28813 = vmatpush3.bf16.msra.mxu0 %v30931_v31  ;;  %27372 = vmatprep.mubr.msk.f32.mxu0 %vm29783_vm8, %v29784_v6  ;;  %v28386_v31 = vpack.c.bf16 %v31397_v28, %v31395_v50  ;;  %v31558_v50 = vld [vmem:[%s33416_s3 + $0x168] sm:$0xff]  ;;  %v9568_v28 = vrot.slane %v31081_v10, 3 }
 0x47c   :  { %26330 = vmatmul.mubr.f32.vlgmr.msra.gmra.mrb[0].mxu1 %v9150_v13  ;;  %28814 = vmatprep.subr.bf16.mxu0 %v29782_v34 }
 0x47d   :  { %28381 = vmatpush3.bf16.msra.mxu1 %v28380_v20  ;;  %26340 = vmatprep.mubr.msk.f32.mxu1 %vm29783_vm8, %v29784_v6  ;;  %v9569_v14 = vsel %vm4133_vm10, %v9568_v28, 0  ;;  %v9653_v20 = vand.u32 4294901760, %v31617_v5 }
 0x47e   :  { %28382 = vmatprep.subr.bf16.mxu1 %v29782_v34  ;;  %v31628_v3 = vand.u32 4294901760, %v9569_v14 }
 0x47f   :  { %28816 = vmatpush3.bf16.msra.mxu0 %v28815_v17 }
 0x480   :  { %28817 = vmatprep.subr.bf16.mxu0 %v29782_v34 }
 0x481   :  { %28384 = vmatpush3.bf16.msra.mxu1 %v28383_v36 }
 0x482   :  { %27373 = vmatmul.mubr.f32.vlgmr.msra.gmra.mrb[4].mxu0 %v31393_v30  ;;  %28385 = vmatprep.subr.bf16.mxu1 %v29782_v34 }
 0x483   :  { %28819 = vmatpush3.bf16.msra.mxu0 %v30940_v48  ;;  %27383 = vmatprep.mubr.msk.f32.mxu0 %vm29783_vm8, %v29784_v6  ;;  %v31513_v48 = vpop.eup %29750 }
 0x484   :  { %26341 = vmatmul.mubr.f32.vlgmr.msra.gmra.mrb[0].mxu1 %v31401_v42  ;;  %28820 = vmatprep.subr.bf16.mxu0 %v29782_v34  ;;  %v16090_v27 = vmul.f32 1.0614054, %v31513_v48 }
 0x485   :  { %28387 = vmatpush3.bf16.msra.mxu1 %v28386_v31  ;;  %26351 = vmatprep.mubr.msk.f32.mxu1 %vm29783_vm8, %v29784_v6 }
 0x486   :  { %28388 = vmatprep.subr.bf16.mxu1 %v29782_v34  ;;  %v16092_v15 = vadd.f32 -1.4531521, %v16090_v27 }
 0x487   :  { %28822 = vmatpush3.bf16.msra.mxu0 %v28821_v21 }
 0x488   :  { %28823 = vmatprep.subr.bf16.mxu0 %v29782_v34  ;;  %v16094_v44 = vmul.f32 %v31513_v48, %v16092_v15  ;;  %v19659_v15 = vand.u32 4294901760, %v31644_v16 }
 0x489   :  { %28390 = vmatpush3.bf16.msra.mxu1 %v28389_v47 }
 0x48a   :  { %27384 = vmatmul.mubr.f32.vlgmr.msra.gmra.mrb[4].mxu0 %v31416_v52  ;;  %28391 = vmatprep.subr.bf16.mxu1 %v29782_v34  ;;  %v19589_v52 = vand.u32 4294901760, %v31533_v41  ;;  %v16096_v40 = vadd.f32 1.4214138, %v16094_v44 }
 0x48b   :  { %28825 = vmatpush3.bf16.msra.mxu0 %v30909_v61  ;;  %27394 = vmatprep.mubr.msk.f32.mxu0 %vm29783_vm8, %v29784_v6 }
 0x48c   :  { %26352 = vmatmul.mubr.f32.vlgmr.msra.gmra.mrb[0].mxu1 %v31429_v58  ;;  %28826 = vmatprep.subr.bf16.mxu0 %v29782_v34  ;;  %v9575_v58 = vand.u32 4294901760, %v31558_v50  ;;  %v31606_v37 = vsub.f32 %v31533_v41, %v19589_v52  ;;  %v16098_v33 = vmul.f32 %v31513_v48, %v16096_v40  ;;  %v31658_v17 = vpack.c.bf16 %v19592_v23, %v19589_v52 }
 0x48d   :  { %28393 = vmatpush3.bf16.msra.mxu1 %v31438_v9  ;;  %26362 = vmatprep.mubr.msk.f32.mxu1 %vm29783_vm8, %v29784_v6  ;;  %v19660_v52 = vsub.f32 %v31644_v16, %v19659_v15 }
 0x48e   :  { %28394 = vmatprep.subr.bf16.mxu1 %v29782_v34  ;;  %v31620_v22 = vsub.f32 %v31558_v50, %v9575_v58  ;;  %v19670_v29 = vand.u32 4294901760, %v31606_v37  ;;  %v16100_v57 = vadd.f32 -0.28449672, %v16098_v33  ;;  %v31673_v27 = vpack.c.bf16 %v9575_v58, %v9572_v2 }
 0x48f   :  { %28828 = vmatpush3.bf16.msra.mxu0 %v31452_v63 }
 0x490   :  { %28829 = vmatprep.subr.bf16.mxu0 %v29782_v34  ;;  %v9660_v19 = vand.u32 4294901760, %v31620_v22  ;;  %v19671_v36 = vsub.f32 %v31606_v37, %v19670_v29  ;;  %v16102_v7 = vmul.f32 %v31513_v48, %v16100_v57  ;;  %v28422_v57 = vpack.c.bf16 %v31620_v22, %v31617_v5 }
 0x491   :  { %28396 = vmatpush3.bf16.msra.mxu1 %v31467_v62 }
 0x492   :  { %27395 = vmatmul.mubr.f32.vlgmr.msra.gmra.mrb[4].mxu0 %v19166_v1  ;;  %28397 = vmatprep.subr.bf16.mxu1 %v29782_v34  ;;  %v16108_v1 = vsub.f32 0.0, %v31435_v38  ;;  %v9661_v41 = vsub.f32 %v31620_v22, %v9660_v19  ;;  %v19672_v24 = vand.u32 4294901760, %v19671_v36  ;;  %v28434_v39 = vpack.c.bf16 %v9660_v19, %v9653_v20 }
 0x493   :  { %28831 = vmatpush3.bf16.msra.mxu0 %v30959_v26  ;;  %27405 = vmatprep.mubr.msk.f32.mxu0 %vm29783_vm8, %v29784_v6  ;;  %v31576_v26 = vld [vmem:[%s33416_s3 + $0xf0] sm:$0xff] }
 0x494   :  { %26363 = vmatmul.mubr.f32.vlgmr.msra.gmra.mrb[0].mxu1 %v9148_v55  ;;  %28832 = vmatprep.subr.bf16.mxu0 %v29782_v34  ;;  %v19595_v45 = vand.u32 4294901760, %v31576_v26  ;;  %v19598_v55 = vand.u32 4294901760, %v31581_v49  ;;  %v16110_v4 = vmul.f32 %v16108_v1, %v31435_v38  ;;  %v19677_v38 = vand.u32 4294901760, %v31609_v54 }
 0x495   :  { %28399 = vmatpush3.bf16.msra.mxu1 %v28398_v59  ;;  %26373 = vmatprep.mubr.msk.f32.mxu1 %vm29783_vm8, %v29784_v6  ;;  %v9674_v59 = vand.u32 4294901760, %v31653_v32  ;;  %v19661_v1 = vand.u32 4294901760, %v19660_v52 }
 0x496   :  { %28400 = vmatprep.subr.bf16.mxu1 %v29782_v34  ;;  %v31634_v12 = vsub.f32 %v31576_v26, %v19595_v45  ;;  %v31637_v25 = vsub.f32 %v31581_v49, %v19598_v55  ;;  %v16113_v13 = vmul.f32 1.442695, %v16110_v4  ;;  %v19678_v31 = vsub.f32 %v31609_v54, %v19677_v38 }
 0x497   :  { %28834 = vmatpush3.bf16.msra.mxu0 %v28833_v46  ;;  %v31702_v46 = vpack.c.bf16 %v9581_v43, %v9578_v60  ;;  %v9662_v26 = vand.u32 4294901760, %v9661_v41 }
 0x498   :  { %28835 = vmatprep.subr.bf16.mxu0 %v29782_v34  ;;  %v19684_v21 = vand.u32 4294901760, %v31634_v12  ;;  %v19691_v47 = vand.u32 4294901760, %v31637_v25  ;;  %29752 = vpow2.f32 %v16113_v13  ;;  %v19679_v50 = vand.u32 4294901760, %v19678_v31 }
 0x499   :  { %28402 = vmatpush3.bf16.msra.mxu1 %v28401_v0  ;;  %v16104_v0 = vadd.f32 0.2548296, %v16102_v7  ;;  %v28857_v36 = vpack.c.bf16 %v31637_v25, %v31634_v12 }
 0x49a   :  { %27406 = vmatmul.mubr.f32.vlgmr.msra.gmra.mrb[4].mxu0 %v31393_v30  ;;  %28403 = vmatprep.subr.bf16.mxu1 %v29782_v34  ;;  %v19685_v28 = vsub.f32 %v31634_v12, %v19684_v21  ;;  %v28848_v58 = vpack.c.bf16 %v19679_v50, %v19672_v24  ;;  %v28866_v24 = vpack.c.bf16 %v19677_v38, %v19670_v29  ;;  %v24141_v50 = vld [vmem:[%s33416_s3 + $0x100] sm:$0xff]  ;;  %v10062_v29 = vrot.slane %v31081_v10, 4  ;;  %v24144_v12 = vld [vmem:[%s33416_s3 + $0x118] sm:$0xff] }
 0x49b   :  { %28837 = vmatpush3.bf16.msra.mxu0 %v30909_v61  ;;  %27416 = vmatprep.mubr.msk.f32.mxu0 %vm29783_vm8, %v29784_v6  ;;  %v31650_v61 = vsub.f32 %v31597_v18, %v9578_v60  ;;  %v20082_v22 = vand.u32 4294901760, %v24141_v50 }
 0x49c   :  { %26374 = vmatmul.mubr.f32.vlgmr.msra.gmra.mrb[0].mxu1 %v31401_v42  ;;  %28838 = vmatprep.subr.bf16.mxu0 %v29782_v34  ;;  %v19686_v35 = vand.u32 4294901760, %v19685_v28  ;;  %v24142_v28 = vld [vmem:[%s33416_s3 + $0x108] sm:$0xff] }
 0x49d   :  { %28405 = vmatpush3.bf16.msra.mxu1 %v31438_v9  ;;  %26384 = vmatprep.mubr.msk.f32.mxu1 %vm29783_vm8, %v29784_v6  ;;  %v31661_v9 = vsub.f32 %v9569_v14, %v31628_v3  ;;  %v9667_v8 = vand.u32 4294901760, %v31650_v61  ;;  %v28425_v31 = vpack.c.bf16 %v31653_v32, %v31650_v61  ;;  %v20085_v38 = vand.u32 4294901760, %v24142_v28 }
 0x49e   :  { %28406 = vmatprep.subr.bf16.mxu1 %v29782_v34 }
 0x49f   :  { %28840 = vmatpush3.bf16.msra.mxu0 %v31452_v63  ;;  %v9654_v63 = vsub.f32 %v31617_v5, %v9653_v20  ;;  %v9642_v44 = vand.u32 4294901760, %v31661_v9  ;;  %v9668_v49 = vsub.f32 %v31650_v61, %v9667_v8  ;;  %v28869_v5 = vpack.c.bf16 %v19691_v47, %v19684_v21  ;;  %v24088_v21 = vld [vmem:[%s33416_s3 + $0x190] sm:$0xff]  ;;  %v24089_v61 = vld [vmem:[%s33416_s3 + $0x198] sm:$0xff] }
 0x4a0   :  { %28841 = vmatprep.subr.bf16.mxu0 %v29782_v34 }
 0x4a1   :  { %28408 = vmatpush3.bf16.msra.mxu1 %v31467_v62  ;;  %v31688_v62 = vpack.c.bf16 %v19598_v55, %v19595_v45  ;;  %v9655_v23 = vand.u32 4294901760, %v9654_v63  ;;  %v9643_v2 = vsub.f32 %v31661_v9, %v9642_v44  ;;  %v9669_v51 = vand.u32 4294901760, %v9668_v49 }
 0x4a2   :  { %27417 = vmatmul.mubr.f32.vlgmr.msra.gmra.mrb[4].mxu0 %v31393_v30  ;;  %28409 = vmatprep.subr.bf16.mxu1 %v29782_v34  ;;  %v19692_v30 = vsub.f32 %v31637_v25, %v19691_v47  ;;  %v16106_v45 = vmul.f32 %v31513_v48, %v16104_v0  ;;  %v29753_v43 = vpop.eup %29752  ;;  %v28854_v48 = vpack.c.bf16 %v31609_v54, %v31606_v37  ;;  %v24086_v37 = vld [vmem:[%s33416_s3 + $0x180] sm:$0xff]  ;;  %v24087_v54 = vld [vmem:[%s33416_s3 + $0x188] sm:$0xff]  ;;  %v10075_v49 = vand.u32 4294901760, %v24089_v61 }
 0x4a3   :  { %28843 = vmatpush3.bf16.msra.mxu0 %v31658_v17  ;;  %27427 = vmatprep.mubr.msk.f32.mxu0 %vm29783_vm8, %v29784_v6  ;;  %v28416_v18 = vpack.c.bf16 %v9662_v26, %v9655_v23  ;;  %v9644_v55 = vand.u32 4294901760, %v9643_v2  ;;  %v28437_v25 = vpack.c.bf16 %v9674_v59, %v9667_v8  ;;  %v10066_v20 = vand.u32 4294901760, %v24086_v37 }
 0x4a4   :  { %26385 = vmatmul.mubr.f32.vlgmr.msra.gmra.mrb[0].mxu1 %v31401_v42  ;;  %28844 = vmatprep.subr.bf16.mxu0 %v29782_v34  ;;  %v9675_v42 = vsub.f32 %v31653_v32, %v9674_v59  ;;  %v19693_v40 = vand.u32 4294901760, %v19692_v30  ;;  %v16116_v4 = vmul.f32 %v29753_v43, %v16106_v45  ;;  %v10069_v19 = vand.u32 4294901760, %v24087_v54 }
 0x4a5   :  { %28411 = vmatpush3.bf16.msra.mxu1 %v31673_v27  ;;  %26395 = vmatprep.mubr.msk.f32.mxu1 %vm29783_vm8, %v29784_v6  ;;  %v10063_v32 = vsel %vm4133_vm10, %v10062_v29, 0  ;;  %v31823_v47 = vsub.f32 %v24141_v50, %v20082_v22  ;;  %v20091_v59 = vand.u32 4294901760, %v24144_v12  ;;  %v31830_v52 = vsub.f32 %v24086_v37, %v10066_v20 }
 0x4a6   :  { %28412 = vmatprep.subr.bf16.mxu1 %v29782_v34  ;;  %v9676_v14 = vand.u32 4294901760, %v9675_v42  ;;  %v28851_v60 = vpack.c.bf16 %v19693_v40, %v19686_v35  ;;  %v16118_v13 = vsub.f32 1.0, %v16116_v4  ;;  %v31832_v23 = vsub.f32 %v24087_v54, %v10069_v19 }
 0x4a7   :  { %28846 = vmatpush3.bf16.msra.mxu0 %v31688_v62  ;;  %v10072_v26 = vand.u32 4294901760, %v24088_v21  ;;  %v31836_v42 = vand.u32 4294901760, %v10063_v32  ;;  %v31843_v2 = vsub.f32 %v24144_v12, %v20091_v59 }
 0x4a8   :  { %28847 = vmatprep.subr.bf16.mxu0 %v29782_v34  ;;  %v28419_v33 = vpack.c.bf16 %v9676_v14, %v9669_v51  ;;  %v16122_v63 = vsub.f32 0.0, %v16118_v13  ;;  %v10154_v51 = vand.u32 4294901760, %v31832_v23  ;;  %v31862_v14 = vpack.c.bf16 %v20085_v38, %v20082_v22 }
 0x4a9   :  { %28414 = vmatpush3.bf16.msra.mxu1 %v31702_v46  ;;  %v31865_v45 = vsub.f32 %v10063_v32, %v31836_v42  ;;  %v20184_v43 = vand.u32 4294901760, %v31843_v2 }
 0x4aa   :  { %27428 = vmatmul.mubr.f32.vlgmr.msra.gmra.mrb[4].mxu0 %v19661_v1  ;;  %28415 = vmatprep.subr.bf16.mxu1 %v29782_v34  ;;  %v16124_v41 = vsel %vm16120_vm13, %v16118_v13, %v16122_v63  ;;  %v31857_v1 = vsub.f32 %v24089_v61, %v10075_v49 }
 0x4ab   :  { %28849 = vmatpush3.bf16.msra.mxu0 %v28848_v58  ;;  %27438 = vmatprep.mubr.msk.f32.mxu0 %vm29783_vm8, %v29784_v6  ;;  %v16126_v7 = vadd.f32 1.0, %v16124_v41  ;;  %v20163_v58 = vand.u32 4294901760, %v31823_v47 }
 0x4ac   :  { %26396 = vmatmul.mubr.f32.vlgmr.msra.gmra.mrb[0].mxu1 %v9644_v55  ;;  %28850 = vmatprep.subr.bf16.mxu0 %v29782_v34  ;;  %v10168_v13 = vand.u32 4294901760, %v31857_v1 }
 0x4ad   :  { %28417 = vmatpush3.bf16.msra.mxu1 %v28416_v18  ;;  %26406 = vmatprep.mubr.msk.f32.mxu1 %vm29783_vm8, %v29784_v6  ;;  %v31775_v30 = vmul.f32 %v16126_v7, %v16076_v56  ;;  %v10147_v18 = vand.u32 4294901760, %v31830_v52  ;;  %v31905_v7 = vpack.c.bf16 %v10075_v49, %v10072_v26  ;;  %v24091_v49 = vld [vmem:[%s33416_s3 + $0x1a8] sm:$0xff] }
 0x4ae   :  { %28418 = vmatprep.subr.bf16.mxu1 %v29782_v34 }
 0x4af   :  { %28852 = vmatpush3.bf16.msra.mxu0 %v28851_v60 }
 0x4b0   :  { %28853 = vmatprep.subr.bf16.mxu0 %v29782_v34 }
 0x4b1   :  { %28420 = vmatpush3.bf16.msra.mxu1 %v28419_v33  ;;  %v31877_v33 = vpack.c.bf16 %v10069_v19, %v10066_v20 }
 0x4b2   :  { %27439 = vmatmul.mubr.f32.vlgmr.msra.gmra.mrb[4].mxu0 %v31614_v53  ;;  %28421 = vmatprep.subr.bf16.mxu1 %v29782_v34 }
 0x4b3   :  { %28855 = vmatpush3.bf16.msra.mxu0 %v28854_v48  ;;  %27449 = vmatprep.mubr.msk.f32.mxu0 %vm29783_vm8, %v29784_v6  ;;  %v10155_v48 = vsub.f32 %v31832_v23, %v10154_v51 }
 0x4b4   :  { %26407 = vmatmul.mubr.f32.vlgmr.msra.gmra.mrb[0].mxu1 %v31628_v3  ;;  %28856 = vmatprep.subr.bf16.mxu0 %v29782_v34 }
 0x4b5   :  { %28423 = vmatpush3.bf16.msra.mxu1 %v28422_v57  ;;  %26417 = vmatprep.mubr.msk.f32.mxu1 %vm29783_vm8, %v29784_v6  ;;  %v10156_v50 = vand.u32 4294901760, %v10155_v48 }
 0x4b6   :  { %28424 = vmatprep.subr.bf16.mxu1 %v29782_v34 }
 0x4b7   :  { %28858 = vmatpush3.bf16.msra.mxu0 %v28857_v36 }
 0x4b8   :  { %28859 = vmatprep.subr.bf16.mxu0 %v29782_v34 }
 0x4b9   :  { %28426 = vmatpush3.bf16.msra.mxu1 %v28425_v31 }
 0x4ba   :  { %27450 = vmatmul.mubr.f32.vlgmr.msra.gmra.mrb[4].mxu0 %v31644_v16  ;;  %28427 = vmatprep.subr.bf16.mxu1 %v29782_v34  ;;  %v24143_v16 = vld [vmem:[%s33416_s3 + $0x110] sm:$0xff] }
 0x4bb   :  { %28861 = vmatpush3.bf16.msra.mxu0 %v31658_v17  ;;  %27460 = vmatprep.mubr.msk.f32.mxu0 %vm29783_vm8, %v29784_v6  ;;  %v20088_v8 = vand.u32 4294901760, %v24143_v16 }
 0x4bc   :  { %26418 = vmatmul.mubr.f32.vlgmr.msra.gmra.mrb[0].mxu1 %v31661_v9  ;;  %28862 = vmatprep.subr.bf16.mxu0 %v29782_v34  ;;  %v20079_v9 = vsel %vm4133_vm10, %v31775_v30, 0 }
 0x4bd   :  { %28429 = vmatpush3.bf16.msra.mxu1 %v31673_v27  ;;  %26428 = vmatprep.mubr.msk.f32.mxu1 %vm29783_vm8, %v29784_v6  ;;  %v31841_v0 = vsub.f32 %v24143_v16, %v20088_v8  ;;  %v31891_v36 = vpack.c.bf16 %v20091_v59, %v20088_v8  ;;  %v24145_v8 = vld [vmem:[%s33416_s3 + $0x120] sm:$0xff]  ;;  %v24146_v59 = vld [vmem:[%s33416_s3 + $0x128] sm:$0xff] }
 0x4be   :  { %28430 = vmatprep.subr.bf16.mxu1 %v29782_v34 }
 0x4bf   :  { %28864 = vmatpush3.bf16.msra.mxu0 %v31688_v62  ;;  %v20177_v60 = vand.u32 4294901760, %v31841_v0 }
 0x4c0   :  { %28865 = vmatprep.subr.bf16.mxu0 %v29782_v34 }
 0x4c1   :  { %28432 = vmatpush3.bf16.msra.mxu1 %v31702_v46  ;;  %v20178_v41 = vsub.f32 %v31841_v0, %v20177_v60 }
 0x4c2   :  { %27461 = vmatmul.mubr.f32.vlgmr.msra.gmra.mrb[4].mxu0 %v19659_v15  ;;  %28433 = vmatprep.subr.bf16.mxu1 %v29782_v34  ;;  %v31825_v15 = vsub.f32 %v24142_v28, %v20085_v38 }
 0x4c3   :  { %28867 = vmatpush3.bf16.msra.mxu0 %v28866_v24  ;;  %27471 = vmatprep.mubr.msk.f32.mxu0 %vm29783_vm8, %v29784_v6  ;;  %v20179_v54 = vand.u32 4294901760, %v20178_v41 }
 0x4c4   :  { %26429 = vmatmul.mubr.f32.vlgmr.msra.gmra.mrb[0].mxu1 %v9642_v44  ;;  %28868 = vmatprep.subr.bf16.mxu0 %v29782_v34  ;;  %v31828_v44 = vand.u32 4294901760, %v20079_v9  ;;  %v20170_v35 = vand.u32 4294901760, %v31825_v15  ;;  %v28890_v19 = vpack.c.bf16 %v31825_v15, %v31823_v47 }
 0x4c5   :  { %28435 = vmatpush3.bf16.msra.mxu1 %v28434_v39  ;;  %26439 = vmatprep.mubr.msk.f32.mxu1 %vm29783_vm8, %v29784_v6 }
 0x4c6   :  { %28436 = vmatprep.subr.bf16.mxu1 %v29782_v34  ;;  %v31850_v40 = vsub.f32 %v20079_v9, %v31828_v44  ;;  %v20171_v55 = vsub.f32 %v31825_v15, %v20170_v35  ;;  %v28458_v9 = vpack.c.bf16 %v31832_v23, %v31830_v52  ;;  %v28902_v32 = vpack.c.bf16 %v20170_v35, %v20163_v58 }
 0x4c7   :  { %28870 = vmatpush3.bf16.msra.mxu0 %v28869_v5  ;;  %v20571_v15 = vrot.slane %v31775_v30, 1  ;;  %v28905_v23 = vpack.c.bf16 %v20184_v43, %v20177_v60  ;;  %v20578_v35 = vand.u32 4294901760, %v24146_v59 }
 0x4c8   :  { %28871 = vmatprep.subr.bf16.mxu0 %v29782_v34  ;;  %v20152_v4 = vand.u32 4294901760, %v31850_v40  ;;  %v20172_v63 = vand.u32 4294901760, %v20171_v55 }
 0x4c9   :  { %28438 = vmatpush3.bf16.msra.mxu1 %v28437_v25  ;;  %v32023_v60 = vsub.f32 %v24146_v59, %v20578_v35 }
 0x4ca   :  { %27472 = vmatmul.mubr.f32.vlgmr.msra.gmra.mrb[4].mxu0 %v31614_v53  ;;  %28439 = vmatprep.subr.bf16.mxu1 %v29782_v34  ;;  %v20153_v56 = vsub.f32 %v31850_v40, %v20152_v4 }
 0x4cb   :  { %28873 = vmatpush3.bf16.msra.mxu0 %v31658_v17  ;;  %27482 = vmatprep.mubr.msk.f32.mxu0 %vm29783_vm8, %v29784_v6  ;;  %v31855_v17 = vsub.f32 %v24088_v21, %v10072_v26  ;;  %v28893_v21 = vpack.c.bf16 %v31843_v2, %v31841_v0  ;;  %v24090_v26 = vld [vmem:[%s33416_s3 + $0x1a0] sm:$0xff]  ;;  %v24148_v0 = vld [vmem:[%s33416_s3 + $0x138] sm:$0xff] }
 0x4cc   :  { %26440 = vmatmul.mubr.f32.vlgmr.msra.gmra.mrb[0].mxu1 %v31628_v3  ;;  %28874 = vmatprep.subr.bf16.mxu0 %v29782_v34  ;;  %v20154_v5 = vand.u32 4294901760, %v20153_v56  ;;  %v20663_v56 = vand.u32 4294901760, %v32023_v60 }
 0x4cd   :  { %28441 = vmatpush3.bf16.msra.mxu1 %v31673_v27  ;;  %26450 = vmatprep.mubr.msk.f32.mxu1 %vm29783_vm8, %v29784_v6  ;;  %v20164_v27 = vsub.f32 %v31823_v47, %v20163_v58  ;;  %v10161_v57 = vand.u32 4294901760, %v31855_v17  ;;  %v28461_v61 = vpack.c.bf16 %v31857_v1, %v31855_v17  ;;  %v28470_v47 = vpack.c.bf16 %v10154_v51, %v10147_v18 }
 0x4ce   :  { %28442 = vmatprep.subr.bf16.mxu1 %v29782_v34  ;;  %v20575_v58 = vand.u32 4294901760, %v24145_v8  ;;  %v10563_v51 = vand.u32 4294901760, %v24091_v49 }
 0x4cf   :  { %28876 = vmatpush3.bf16.msra.mxu0 %v31688_v62  ;;  %v10148_v62 = vsub.f32 %v31830_v52, %v10147_v18  ;;  %v20165_v31 = vand.u32 4294901760, %v20164_v27  ;;  %v10162_v28 = vsub.f32 %v31855_v17, %v10161_v57  ;;  %v10556_v52 = vrot.slane %v31081_v10, 5  ;;  %v24092_v27 = vld [vmem:[%s33416_s3 + $0x1b0] sm:$0xff]  ;;  %v24093_v17 = vld [vmem:[%s33416_s3 + $0x1b8] sm:$0xff] }
 0x4d0   :  { %28877 = vmatprep.subr.bf16.mxu0 %v29782_v34  ;;  %v10560_v18 = vand.u32 4294901760, %v24090_v26  ;;  %v32021_v55 = vsub.f32 %v24145_v8, %v20575_v58 }
 0x4d1   :  { %28444 = vmatpush3.bf16.msra.mxu1 %v31702_v46  ;;  %v10136_v46 = vand.u32 4294901760, %v31865_v45  ;;  %v10149_v24 = vand.u32 4294901760, %v10148_v62  ;;  %v28884_v37 = vpack.c.bf16 %v20172_v63, %v20165_v31  ;;  %v10163_v38 = vand.u32 4294901760, %v10162_v28 }
 0x4d2   :  { %27483 = vmatmul.mubr.f32.vlgmr.msra.gmra.mrb[4].mxu0 %v31614_v53  ;;  %28445 = vmatprep.subr.bf16.mxu1 %v29782_v34  ;;  %v20185_v53 = vsub.f32 %v31843_v2, %v20184_v43  ;;  %v28473_v2 = vpack.c.bf16 %v10168_v13, %v10161_v57  ;;  %v32028_v48 = vsub.f32 %v24090_v26, %v10560_v18 }
 0x4d3   :  { %28879 = vmatpush3.bf16.msra.mxu0 %v31862_v14  ;;  %27493 = vmatprep.mubr.msk.f32.mxu0 %vm29783_vm8, %v29784_v6  ;;  %v10137_v39 = vsub.f32 %v31865_v45, %v10136_v46  ;;  %v28452_v22 = vpack.c.bf16 %v10156_v50, %v10149_v24  ;;  %v32030_v57 = vsub.f32 %v24091_v49, %v10563_v51 }
 0x4d4   :  { %26451 = vmatmul.mubr.f32.vlgmr.msra.gmra.mrb[0].mxu1 %v31628_v3  ;;  %28880 = vmatprep.subr.bf16.mxu0 %v29782_v34  ;;  %v10169_v3 = vsub.f32 %v31857_v1, %v10168_v13  ;;  %v20186_v29 = vand.u32 4294901760, %v20185_v53  ;;  %v10557_v1 = vsel %vm4133_vm10, %v10556_v52, 0  ;;  %v10566_v13 = vand.u32 4294901760, %v24092_v27 }
 0x4d5   :  { %28447 = vmatpush3.bf16.msra.mxu1 %v31877_v33  ;;  %26461 = vmatprep.mubr.msk.f32.mxu1 %vm29783_vm8, %v29784_v6  ;;  %v10138_v12 = vand.u32 4294901760, %v10137_v39  ;;  %v32034_v31 = vand.u32 4294901760, %v10557_v1  ;;  %v20656_v53 = vand.u32 4294901760, %v32021_v55  ;;  %v10641_v28 = vand.u32 4294901760, %v32028_v48 }
 0x4d6   :  { %28448 = vmatprep.subr.bf16.mxu1 %v29782_v34  ;;  %v10170_v16 = vand.u32 4294901760, %v10169_v3  ;;  %v28887_v25 = vpack.c.bf16 %v20186_v29, %v20179_v54  ;;  %v10648_v3 = vand.u32 4294901760, %v32030_v57  ;;  %v32060_v39 = vpack.c.bf16 %v20578_v35, %v20575_v58 }
 0x4d7   :  { %28882 = vmatpush3.bf16.msra.mxu0 %v31891_v36  ;;  %v20664_v54 = vsub.f32 %v32023_v60, %v20663_v56 }
 0x4d8   :  { %28883 = vmatprep.subr.bf16.mxu0 %v29782_v34  ;;  %v28455_v20 = vpack.c.bf16 %v10170_v16, %v10163_v38  ;;  %v10649_v16 = vsub.f32 %v32030_v57, %v10648_v3 }
 0x4d9   :  { %28450 = vmatpush3.bf16.msra.mxu1 %v31905_v7 }
 0x4da   :  { %27494 = vmatmul.mubr.f32.vlgmr.msra.gmra.mrb[4].mxu0 %v20154_v5  ;;  %28451 = vmatprep.subr.bf16.mxu1 %v29782_v34  ;;  %v10650_v59 = vand.u32 4294901760, %v10649_v16 }
 0x4db   :  { %28885 = vmatpush3.bf16.msra.mxu0 %v28884_v37  ;;  %27504 = vmatprep.mubr.msk.f32.mxu0 %vm29783_vm8, %v29784_v6  ;;  %v32063_v37 = vsub.f32 %v10557_v1, %v32034_v31  ;;  %v28938_v1 = vpack.c.bf16 %v20663_v56, %v20656_v53 }
 0x4dc   :  { %26462 = vmatmul.mubr.f32.vlgmr.msra.gmra.mrb[0].mxu1 %v10138_v12  ;;  %28886 = vmatprep.subr.bf16.mxu0 %v29782_v34 }
 0x4dd   :  { %28453 = vmatpush3.bf16.msra.mxu1 %v28452_v22  ;;  %26472 = vmatprep.mubr.msk.f32.mxu1 %vm29783_vm8, %v29784_v6  ;;  %v32075_v22 = vpack.c.bf16 %v10563_v51, %v10560_v18  ;;  %v28926_v51 = vpack.c.bf16 %v32023_v60, %v32021_v55  ;;  %v21064_v60 = vrot.slane %v31775_v30, 2 }
 0x4de   :  { %28454 = vmatprep.subr.bf16.mxu1 %v29782_v34 }
 0x4df   :  { %28888 = vmatpush3.bf16.msra.mxu0 %v28887_v25 }
 0x4e0   :  { %28889 = vmatprep.subr.bf16.mxu0 %v29782_v34 }
 0x4e1   :  { %28456 = vmatpush3.bf16.msra.mxu1 %v28455_v20 }
 0x4e2   :  { %27505 = vmatmul.mubr.f32.vlgmr.msra.gmra.mrb[4].mxu0 %v31828_v44  ;;  %28457 = vmatprep.subr.bf16.mxu1 %v29782_v34 }
 0x4e3   :  { %28891 = vmatpush3.bf16.msra.mxu0 %v28890_v19  ;;  %27515 = vmatprep.mubr.msk.f32.mxu0 %vm29783_vm8, %v29784_v6 }
 0x4e4   :  { %26473 = vmatmul.mubr.f32.vlgmr.msra.gmra.mrb[0].mxu1 %v31836_v42  ;;  %28892 = vmatprep.subr.bf16.mxu0 %v29782_v34 }
 0x4e5   :  { %28459 = vmatpush3.bf16.msra.mxu1 %v28458_v9  ;;  %26483 = vmatprep.mubr.msk.f32.mxu1 %vm29783_vm8, %v29784_v6  ;;  %v20665_v9 = vand.u32 4294901760, %v20664_v54 }
 0x4e6   :  { %28460 = vmatprep.subr.bf16.mxu1 %v29782_v34 }
 0x4e7   :  { %28894 = vmatpush3.bf16.msra.mxu0 %v28893_v21 }
 0x4e8   :  { %28895 = vmatprep.subr.bf16.mxu0 %v29782_v34 }
 0x4e9   :  { %28462 = vmatpush3.bf16.msra.mxu1 %v28461_v61 }
 0x4ea   :  { %27516 = vmatmul.mubr.f32.vlgmr.msra.gmra.mrb[4].mxu0 %v31850_v40  ;;  %28463 = vmatprep.subr.bf16.mxu1 %v29782_v34  ;;  %v24147_v40 = vld [vmem:[%s33416_s3 + $0x130] sm:$0xff] }
 0x4eb   :  { %28897 = vmatpush3.bf16.msra.mxu0 %v31862_v14  ;;  %27526 = vmatprep.mubr.msk.f32.mxu0 %vm29783_vm8, %v29784_v6  ;;  %v20581_v43 = vand.u32 4294901760, %v24147_v40 }
 0x4ec   :  { %26484 = vmatmul.mubr.f32.vlgmr.msra.gmra.mrb[0].mxu1 %v31865_v45  ;;  %28898 = vmatprep.subr.bf16.mxu0 %v29782_v34  ;;  %v20572_v45 = vsel %vm4133_vm10, %v20571_v15, 0 }
 0x4ed   :  { %28465 = vmatpush3.bf16.msra.mxu1 %v31877_v33  ;;  %26494 = vmatprep.mubr.msk.f32.mxu1 %vm29783_vm8, %v29784_v6  ;;  %v32026_v62 = vand.u32 4294901760, %v20572_v45  ;;  %v32039_v63 = vsub.f32 %v24147_v40, %v20581_v43 }
 0x4ee   :  { %28466 = vmatprep.subr.bf16.mxu1 %v29782_v34 }
 0x4ef   :  { %28900 = vmatpush3.bf16.msra.mxu0 %v31891_v36  ;;  %v32048_v24 = vsub.f32 %v20572_v45, %v32026_v62  ;;  %v20670_v29 = vand.u32 4294901760, %v32039_v63  ;;  %v28494_v45 = vpack.c.bf16 %v32030_v57, %v32028_v48 }
 0x4f0   :  { %28901 = vmatprep.subr.bf16.mxu0 %v29782_v34 }
 0x4f1   :  { %28468 = vmatpush3.bf16.msra.mxu1 %v31905_v7  ;;  %v20645_v38 = vand.u32 4294901760, %v32048_v24  ;;  %v20671_v21 = vsub.f32 %v32039_v63, %v20670_v29 }
 0x4f2   :  { %27527 = vmatmul.mubr.f32.vlgmr.msra.gmra.mrb[4].mxu0 %v20152_v4  ;;  %28469 = vmatprep.subr.bf16.mxu1 %v29782_v34  ;;  %v20584_v4 = vand.u32 4294901760, %v24148_v0 }
 0x4f3   :  { %28903 = vmatpush3.bf16.msra.mxu0 %v28902_v32  ;;  %27537 = vmatprep.mubr.msk.f32.mxu0 %vm29783_vm8, %v29784_v6  ;;  %v20646_v32 = vsub.f32 %v32048_v24, %v20645_v38  ;;  %v20672_v49 = vand.u32 4294901760, %v20671_v21 }
 0x4f4   :  { %26495 = vmatmul.mubr.f32.vlgmr.msra.gmra.mrb[0].mxu1 %v10136_v46  ;;  %28904 = vmatprep.subr.bf16.mxu0 %v29782_v34  ;;  %v10569_v46 = vand.u32 4294901760, %v24093_v17  ;;  %v32041_v41 = vsub.f32 %v24148_v0, %v20584_v4  ;;  %v32089_v20 = vpack.c.bf16 %v20584_v4, %v20581_v43  ;;  %v24149_v43 = vld [vmem:[%s33416_s3 + $0x140] sm:$0xff]  ;;  %v24150_v4 = vld [vmem:[%s33416_s3 + $0x148] sm:$0xff] }
 0x4f5   :  { %28471 = vmatpush3.bf16.msra.mxu1 %v28470_v47  ;;  %26505 = vmatprep.mubr.msk.f32.mxu1 %vm29783_vm8, %v29784_v6  ;;  %v21071_v56 = vand.u32 4294901760, %v24150_v4 }
 0x4f6   :  { %28472 = vmatprep.subr.bf16.mxu1 %v29782_v34  ;;  %v32055_v50 = vsub.f32 %v24093_v17, %v10569_v46  ;;  %v20677_v5 = vand.u32 4294901760, %v32041_v41  ;;  %v32103_v61 = vpack.c.bf16 %v10569_v46, %v10566_v13  ;;  %v24095_v46 = vld [vmem:[%s33416_s3 + $0x1c8] sm:$0xff] }
 0x4f7   :  { %28906 = vmatpush3.bf16.msra.mxu0 %v28905_v23  ;;  %v20647_v23 = vand.u32 4294901760, %v20646_v32 }
 0x4f8   :  { %28907 = vmatprep.subr.bf16.mxu0 %v29782_v34  ;;  %v10662_v25 = vand.u32 4294901760, %v32055_v50  ;;  %v28941_v57 = vpack.c.bf16 %v20677_v5, %v20670_v29  ;;  %v32221_v29 = vsub.f32 %v24150_v4, %v21071_v56 }
 0x4f9   :  { %28474 = vmatpush3.bf16.msra.mxu1 %v28473_v2 }
 0x4fa   :  { %27538 = vmatmul.mubr.f32.vlgmr.msra.gmra.mrb[4].mxu0 %v31828_v44  ;;  %28475 = vmatprep.subr.bf16.mxu1 %v29782_v34  ;;  %v21156_v32 = vand.u32 4294901760, %v32221_v29 }
 0x4fb   :  { %28909 = vmatpush3.bf16.msra.mxu0 %v31862_v14  ;;  %27548 = vmatprep.mubr.msk.f32.mxu0 %vm29783_vm8, %v29784_v6  ;;  %v32053_v14 = vsub.f32 %v24092_v27, %v10566_v13  ;;  %v28929_v27 = vpack.c.bf16 %v32041_v41, %v32039_v63  ;;  %v24094_v13 = vld [vmem:[%s33416_s3 + $0x1c0] sm:$0xff]  ;;  %v24152_v63 = vld [vmem:[%s33416_s3 + $0x158] sm:$0xff] }
 0x4fc   :  { %26506 = vmatmul.mubr.f32.vlgmr.msra.gmra.mrb[0].mxu1 %v31836_v42  ;;  %28910 = vmatprep.subr.bf16.mxu0 %v29782_v34 }
 0x4fd   :  { %28477 = vmatpush3.bf16.msra.mxu1 %v31877_v33  ;;  %26516 = vmatprep.mubr.msk.f32.mxu1 %vm29783_vm8, %v29784_v6  ;;  %v20657_v33 = vsub.f32 %v32021_v55, %v20656_v53  ;;  %v10655_v12 = vand.u32 4294901760, %v32053_v14  ;;  %v28497_v17 = vpack.c.bf16 %v32055_v50, %v32053_v14  ;;  %v28506_v55 = vpack.c.bf16 %v10648_v3, %v10641_v28 }
 0x4fe   :  { %28478 = vmatprep.subr.bf16.mxu1 %v29782_v34  ;;  %v21068_v53 = vand.u32 4294901760, %v24149_v43  ;;  %v11057_v3 = vand.u32 4294901760, %v24095_v46 }
 0x4ff   :  { %28912 = vmatpush3.bf16.msra.mxu0 %v31891_v36  ;;  %v10642_v36 = vsub.f32 %v32028_v48, %v10641_v28  ;;  %v20658_v19 = vand.u32 4294901760, %v20657_v33  ;;  %v10656_v47 = vsub.f32 %v32053_v14, %v10655_v12  ;;  %v11050_v48 = vrot.slane %v31081_v10, 6  ;;  %v24096_v33 = vld [vmem:[%s33416_s3 + $0x1d0] sm:$0xff]  ;;  %v24097_v14 = vld [vmem:[%s33416_s3 + $0x1d8] sm:$0xff] }
 0x500   :  { %28913 = vmatprep.subr.bf16.mxu0 %v29782_v34  ;;  %v11054_v28 = vand.u32 4294901760, %v24094_v13  ;;  %v32219_v54 = vsub.f32 %v24149_v43, %v21068_v53 }
 0x501   :  { %28480 = vmatpush3.bf16.msra.mxu1 %v31905_v7  ;;  %v10630_v7 = vand.u32 4294901760, %v32063_v37  ;;  %v10643_v8 = vand.u32 4294901760, %v10642_v36  ;;  %v28920_v26 = vpack.c.bf16 %v20665_v9, %v20658_v19  ;;  %v10657_v35 = vand.u32 4294901760, %v10656_v47 }
 0x502   :  { %27549 = vmatmul.mubr.f32.vlgmr.msra.gmra.mrb[4].mxu0 %v31828_v44  ;;  %28481 = vmatprep.subr.bf16.mxu1 %v29782_v34  ;;  %v20678_v44 = vsub.f32 %v32041_v41, %v20677_v5  ;;  %v28509_v41 = vpack.c.bf16 %v10662_v25, %v10655_v12  ;;  %v32226_v16 = vsub.f32 %v24094_v13, %v11054_v28 }
 0x503   :  { %28915 = vmatpush3.bf16.msra.mxu0 %v32060_v39  ;;  %27559 = vmatprep.mubr.msk.f32.mxu0 %vm29783_vm8, %v29784_v6  ;;  %v10631_v15 = vsub.f32 %v32063_v37, %v10630_v7  ;;  %v28488_v58 = vpack.c.bf16 %v10650_v59, %v10643_v8  ;;  %v32228_v12 = vsub.f32 %v24095_v46, %v11057_v3 }
 0x504   :  { %26517 = vmatmul.mubr.f32.vlgmr.msra.gmra.mrb[0].mxu1 %v31836_v42  ;;  %28916 = vmatprep.subr.bf16.mxu0 %v29782_v34  ;;  %v10663_v42 = vsub.f32 %v32055_v50, %v10662_v25  ;;  %v20679_v52 = vand.u32 4294901760, %v20678_v44  ;;  %v11051_v50 = vsel %vm4133_vm10, %v11050_v48, 0  ;;  %v11060_v25 = vand.u32 4294901760, %v24096_v33 }
 0x505   :  { %28483 = vmatpush3.bf16.msra.mxu1 %v32075_v22  ;;  %26527 = vmatprep.mubr.msk.f32.mxu1 %vm29783_vm8, %v29784_v6  ;;  %v10632_v0 = vand.u32 4294901760, %v10631_v15  ;;  %v32232_v19 = vand.u32 4294901760, %v11051_v50  ;;  %v21149_v44 = vand.u32 4294901760, %v32219_v54  ;;  %v11135_v47 = vand.u32 4294901760, %v32226_v16 }
 0x506   :  { %28484 = vmatprep.subr.bf16.mxu1 %v29782_v34  ;;  %v10664_v40 = vand.u32 4294901760, %v10663_v42  ;;  %v28923_v2 = vpack.c.bf16 %v20679_v52, %v20672_v49  ;;  %v11142_v42 = vand.u32 4294901760, %v32228_v12  ;;  %v32258_v15 = vpack.c.bf16 %v21071_v56, %v21068_v53 }
 0x507   :  { %28918 = vmatpush3.bf16.msra.mxu0 %v32089_v20  ;;  %v21157_v49 = vsub.f32 %v32221_v29, %v21156_v32 }
 0x508   :  { %28919 = vmatprep.subr.bf16.mxu0 %v29782_v34  ;;  %v28491_v18 = vpack.c.bf16 %v10664_v40, %v10657_v35  ;;  %v11143_v40 = vsub.f32 %v32228_v12, %v11142_v42 }
 0x509   :  { %28486 = vmatpush3.bf16.msra.mxu1 %v32103_v61 }
 0x50a   :  { %27560 = vmatmul.mubr.f32.vlgmr.msra.gmra.mrb[4].mxu0 %v20647_v23  ;;  %28487 = vmatprep.subr.bf16.mxu1 %v29782_v34  ;;  %v11144_v4 = vand.u32 4294901760, %v11143_v40 }
 0x50b   :  { %28921 = vmatpush3.bf16.msra.mxu0 %v28920_v26  ;;  %27570 = vmatprep.mubr.msk.f32.mxu0 %vm29783_vm8, %v29784_v6  ;;  %v32261_v26 = vsub.f32 %v11051_v50, %v32232_v19  ;;  %v28974_v50 = vpack.c.bf16 %v21156_v32, %v21149_v44 }
 0x50c   :  { %26528 = vmatmul.mubr.f32.vlgmr.msra.gmra.mrb[0].mxu1 %v10632_v0  ;;  %28922 = vmatprep.subr.bf16.mxu0 %v29782_v34 }
 0x50d   :  { %28489 = vmatpush3.bf16.msra.mxu1 %v28488_v58  ;;  %26538 = vmatprep.mubr.msk.f32.mxu1 %vm29783_vm8, %v29784_v6  ;;  %v32273_v58 = vpack.c.bf16 %v11057_v3, %v11054_v28  ;;  %v28962_v3 = vpack.c.bf16 %v32221_v29, %v32219_v54  ;;  %v21557_v29 = vrot.slane %v31775_v30, 3 }
 0x50e   :  { %28490 = vmatprep.subr.bf16.mxu1 %v29782_v34 }
 0x50f   :  { %28924 = vmatpush3.bf16.msra.mxu0 %v28923_v2 }
 0x510   :  { %28925 = vmatprep.subr.bf16.mxu0 %v29782_v34 }
 0x511   :  { %28492 = vmatpush3.bf16.msra.mxu1 %v28491_v18 }
 0x512   :  { %27571 = vmatmul.mubr.f32.vlgmr.msra.gmra.mrb[4].mxu0 %v32026_v62  ;;  %28493 = vmatprep.subr.bf16.mxu1 %v29782_v34 }
 0x513   :  { %28927 = vmatpush3.bf16.msra.mxu0 %v28926_v51  ;;  %27581 = vmatprep.mubr.msk.f32.mxu0 %vm29783_vm8, %v29784_v6 }
 0x514   :  { %26539 = vmatmul.mubr.f32.vlgmr.msra.gmra.mrb[0].mxu1 %v32034_v31  ;;  %28928 = vmatprep.subr.bf16.mxu0 %v29782_v34 }
 0x515   :  { %28495 = vmatpush3.bf16.msra.mxu1 %v28494_v45  ;;  %26549 = vmatprep.mubr.msk.f32.mxu1 %vm29783_vm8, %v29784_v6  ;;  %v21158_v45 = vand.u32 4294901760, %v21157_v49 }
 0x516   :  { %28496 = vmatprep.subr.bf16.mxu1 %v29782_v34 }
 0x517   :  { %28930 = vmatpush3.bf16.msra.mxu0 %v28929_v27 }
 0x518   :  { %28931 = vmatprep.subr.bf16.mxu0 %v29782_v34 }
 0x519   :  { %28498 = vmatpush3.bf16.msra.mxu1 %v28497_v17 }
 0x51a   :  { %27582 = vmatmul.mubr.f32.vlgmr.msra.gmra.mrb[4].mxu0 %v32048_v24  ;;  %28499 = vmatprep.subr.bf16.mxu1 %v29782_v34  ;;  %v24151_v24 = vld [vmem:[%s33416_s3 + $0x150] sm:$0xff] }
 0x51b   :  { %28933 = vmatpush3.bf16.msra.mxu0 %v32060_v39  ;;  %27592 = vmatprep.mubr.msk.f32.mxu0 %vm29783_vm8, %v29784_v6  ;;  %v21074_v5 = vand.u32 4294901760, %v24151_v24 }
 0x51c   :  { %26550 = vmatmul.mubr.f32.vlgmr.msra.gmra.mrb[0].mxu1 %v32063_v37  ;;  %28934 = vmatprep.subr.bf16.mxu0 %v29782_v34  ;;  %v21065_v37 = vsel %vm4133_vm10, %v21064_v60, 0 }
 0x51d   :  { %28501 = vmatpush3.bf16.msra.mxu1 %v32075_v22  ;;  %26560 = vmatprep.mubr.msk.f32.mxu1 %vm29783_vm8, %v29784_v6  ;;  %v32224_v36 = vand.u32 4294901760, %v21065_v37  ;;  %v32237_v9 = vsub.f32 %v24151_v24, %v21074_v5 }
 0x51e   :  { %28502 = vmatprep.subr.bf16.mxu1 %v29782_v34 }
 0x51f   :  { %28936 = vmatpush3.bf16.msra.mxu0 %v32089_v20  ;;  %v32246_v8 = vsub.f32 %v21065_v37, %v32224_v36  ;;  %v21163_v52 = vand.u32 4294901760, %v32237_v9  ;;  %v28530_v37 = vpack.c.bf16 %v32228_v12, %v32226_v16 }
 0x520   :  { %28937 = vmatprep.subr.bf16.mxu0 %v29782_v34 }
 0x521   :  { %28504 = vmatpush3.bf16.msra.mxu1 %v32103_v61  ;;  %v21138_v35 = vand.u32 4294901760, %v32246_v8  ;;  %v21164_v27 = vsub.f32 %v32237_v9, %v21163_v52 }
 0x522   :  { %27593 = vmatmul.mubr.f32.vlgmr.msra.gmra.mrb[4].mxu0 %v20645_v38  ;;  %28505 = vmatprep.subr.bf16.mxu1 %v29782_v34  ;;  %v21077_v38 = vand.u32 4294901760, %v24152_v63 }
 0x523   :  { %28939 = vmatpush3.bf16.msra.mxu0 %v28938_v1  ;;  %27603 = vmatprep.mubr.msk.f32.mxu0 %vm29783_vm8, %v29784_v6  ;;  %v21139_v1 = vsub.f32 %v32246_v8, %v21138_v35  ;;  %v21165_v46 = vand.u32 4294901760, %v21164_v27 }
 0x524   :  { %26561 = vmatmul.mubr.f32.vlgmr.msra.gmra.mrb[0].mxu1 %v10630_v7  ;;  %28940 = vmatprep.subr.bf16.mxu0 %v29782_v34  ;;  %v11063_v7 = vand.u32 4294901760, %v24097_v14  ;;  %v32239_v21 = vsub.f32 %v24152_v63, %v21077_v38  ;;  %v32287_v18 = vpack.c.bf16 %v21077_v38, %v21074_v5  ;;  %v24153_v5 = vld [vmem:[%s33416_s3 + $0x160] sm:$0xff]  ;;  %v24154_v38 = vld [vmem:[%s33416_s3 + $0x168] sm:$0xff] }
 0x525   :  { %28507 = vmatpush3.bf16.msra.mxu1 %v28506_v55  ;;  %26571 = vmatprep.mubr.msk.f32.mxu1 %vm29783_vm8, %v29784_v6  ;;  %v21564_v32 = vand.u32 4294901760, %v24154_v38 }
 0x526   :  { %28508 = vmatprep.subr.bf16.mxu1 %v29782_v34  ;;  %v32253_v59 = vsub.f32 %v24097_v14, %v11063_v7  ;;  %v21170_v23 = vand.u32 4294901760, %v32239_v21  ;;  %v32301_v17 = vpack.c.bf16 %v11063_v7, %v11060_v25  ;;  %v24099_v7 = vld [vmem:[%s33416_s3 + $0x1e8] sm:$0xff] }
 0x527   :  { %28942 = vmatpush3.bf16.msra.mxu0 %v28941_v57  ;;  %v21140_v57 = vand.u32 4294901760, %v21139_v1  ;;  %v32419_v49 = vsub.f32 %v24154_v38, %v21564_v32 }
 0x528   :  { %28943 = vmatprep.subr.bf16.mxu0 %v29782_v34  ;;  %v11156_v2 = vand.u32 4294901760, %v32253_v59  ;;  %v28977_v12 = vpack.c.bf16 %v21170_v23, %v21163_v52 }
 0x529   :  { %28510 = vmatpush3.bf16.msra.mxu1 %v28509_v41 }
 0x52a   :  { %27604 = vmatmul.mubr.f32.vlgmr.msra.gmra.mrb[4].mxu0 %v32026_v62  ;;  %28511 = vmatprep.subr.bf16.mxu1 %v29782_v34 }
 0x52b   :  { %28945 = vmatpush3.bf16.msra.mxu0 %v32060_v39  ;;  %27614 = vmatprep.mubr.msk.f32.mxu0 %vm29783_vm8, %v29784_v6  ;;  %v32251_v39 = vsub.f32 %v24096_v33, %v11060_v25  ;;  %v28965_v33 = vpack.c.bf16 %v32239_v21, %v32237_v9  ;;  %v24098_v25 = vld [vmem:[%s33416_s3 + $0x1e0] sm:$0xff]  ;;  %v24156_v9 = vld [vmem:[%s33416_s3 + $0x178] sm:$0xff] }
 0x52c   :  { %26572 = vmatmul.mubr.f32.vlgmr.msra.gmra.mrb[0].mxu1 %v32034_v31  ;;  %28946 = vmatprep.subr.bf16.mxu0 %v29782_v34 }
 0x52d   :  { %28513 = vmatpush3.bf16.msra.mxu1 %v32075_v22  ;;  %26582 = vmatprep.mubr.msk.f32.mxu1 %vm29783_vm8, %v29784_v6  ;;  %v21150_v22 = vsub.f32 %v32219_v54, %v21149_v44  ;;  %v11149_v0 = vand.u32 4294901760, %v32251_v39  ;;  %v28533_v14 = vpack.c.bf16 %v32253_v59, %v32251_v39  ;;  %v28542_v54 = vpack.c.bf16 %v11142_v42, %v11135_v47 }
 0x52e   :  { %28514 = vmatprep.subr.bf16.mxu1 %v29782_v34  ;;  %v21561_v44 = vand.u32 4294901760, %v24153_v5  ;;  %v21558_v42 = vsel %vm4133_vm10, %v21557_v29, 0 }
 0x52f   :  { %28948 = vmatpush3.bf16.msra.mxu0 %v32089_v20  ;;  %v11136_v20 = vsub.f32 %v32226_v16, %v11135_v47  ;;  %v21151_v51 = vand.u32 4294901760, %v21150_v22  ;;  %v11150_v55 = vsub.f32 %v32251_v39, %v11149_v0  ;;  %v11544_v16 = vrot.slane %v31081_v10, 7  ;;  %v24155_v10 = vld [vmem:[%s33416_s3 + $0x170] sm:$0xff]  ;;  %v24101_v39 = vld [vmem:[%s33416_s3 + $0x1f8] sm:$0xff] }
 0x530   :  { %28949 = vmatprep.subr.bf16.mxu0 %v29782_v34  ;;  %v11551_v47 = vand.u32 4294901760, %v24099_v7  ;;  %v32417_v22 = vsub.f32 %v24153_v5, %v21561_v44  ;;  %v21567_v52 = vand.u32 4294901760, %v24155_v10 }
 0x531   :  { %28516 = vmatpush3.bf16.msra.mxu1 %v32103_v61  ;;  %v11124_v61 = vand.u32 4294901760, %v32261_v26  ;;  %v11137_v43 = vand.u32 4294901760, %v11136_v20  ;;  %v28956_v13 = vpack.c.bf16 %v21158_v45, %v21151_v51  ;;  %v11151_v56 = vand.u32 4294901760, %v11150_v55 }
 0x532   :  { %27615 = vmatmul.mubr.f32.vlgmr.msra.gmra.mrb[4].mxu0 %v32026_v62  ;;  %28517 = vmatprep.subr.bf16.mxu1 %v29782_v34  ;;  %v21171_v62 = vsub.f32 %v32239_v21, %v21170_v23  ;;  %v28545_v21 = vpack.c.bf16 %v11156_v2, %v11149_v0  ;;  %v21570_v23 = vand.u32 4294901760, %v24156_v9  ;;  %v32426_v40 = vsub.f32 %v24099_v7, %v11551_v47 }
 0x533   :  { %28951 = vmatpush3.bf16.msra.mxu0 %v32258_v15  ;;  %27625 = vmatprep.mubr.msk.f32.mxu0 %vm29783_vm8, %v29784_v6  ;;  %v11125_v60 = vsub.f32 %v32261_v26, %v11124_v61  ;;  %v28524_v53 = vpack.c.bf16 %v11144_v4, %v11137_v43  ;;  %v32435_v51 = vsub.f32 %v24155_v10, %v21567_v52  ;;  %v21642_v27 = vand.u32 4294901760, %v32417_v22 }
 0x534   :  { %26583 = vmatmul.mubr.f32.vlgmr.msra.gmra.mrb[0].mxu1 %v32034_v31  ;;  %28952 = vmatprep.subr.bf16.mxu0 %v29782_v34  ;;  %v11157_v31 = vsub.f32 %v32253_v59, %v11156_v2  ;;  %v21172_v48 = vand.u32 4294901760, %v21171_v62  ;;  %v11545_v59 = vsel %vm4133_vm10, %v11544_v16, 0  ;;  %v11557_v2 = vand.u32 4294901760, %v24101_v39 }
 0x535   :  { %28519 = vmatpush3.bf16.msra.mxu1 %v32273_v58  ;;  %26593 = vmatprep.mubr.msk.f32.mxu1 %vm29783_vm8, %v29784_v6  ;;  %v11126_v63 = vand.u32 4294901760, %v11125_v60  ;;  %v32437_v45 = vsub.f32 %v24156_v9, %v21570_v23  ;;  %v21649_v62 = vand.u32 4294901760, %v32419_v49  ;;  %v11636_v55 = vand.u32 4294901760, %v32426_v40 }
 0x536   :  { %28520 = vmatprep.subr.bf16.mxu1 %v29782_v34  ;;  %v11158_v24 = vand.u32 4294901760, %v11157_v31  ;;  %v28959_v41 = vpack.c.bf16 %v21172_v48, %v21165_v46  ;;  %v32451_v43 = vsub.f32 %v24101_v39, %v11557_v2  ;;  %v32456_v31 = vpack.c.bf16 %v21564_v32, %v21561_v44 }
 0x537   :  { %28954 = vmatpush3.bf16.msra.mxu0 %v32287_v18  ;;  %v21656_v46 = vand.u32 4294901760, %v32435_v51  ;;  %v21663_v48 = vand.u32 4294901760, %v32437_v45  ;;  %v29010_v39 = vpack.c.bf16 %v21649_v62, %v21642_v27 }
 0x538   :  { %28955 = vmatprep.subr.bf16.mxu0 %v29782_v34  ;;  %v28527_v28 = vpack.c.bf16 %v11158_v24, %v11151_v56  ;;  %v11637_v56 = vsub.f32 %v32426_v40, %v11636_v55 }
 0x539   :  { %28522 = vmatpush3.bf16.msra.mxu1 %v32301_v17 }
 0x53a   :  { %27626 = vmatmul.mubr.f32.vlgmr.msra.gmra.mrb[4].mxu0 %v21140_v57  ;;  %28523 = vmatprep.subr.bf16.mxu1 %v29782_v34  ;;  %v11638_v5 = vand.u32 4294901760, %v11637_v56 }
 0x53b   :  { %28957 = vmatpush3.bf16.msra.mxu0 %v28956_v13  ;;  %27636 = vmatprep.mubr.msk.f32.mxu0 %vm29783_vm8, %v29784_v6  ;;  %v21650_v13 = vsub.f32 %v32419_v49, %v21649_v62 }
 0x53c   :  { %26594 = vmatmul.mubr.f32.vlgmr.msra.gmra.mrb[0].mxu1 %v11126_v63  ;;  %28958 = vmatprep.subr.bf16.mxu0 %v29782_v34  ;;  %v11650_v63 = vand.u32 4294901760, %v32451_v43 }
 0x53d   :  { %28525 = vmatpush3.bf16.msra.mxu1 %v28524_v53  ;;  %26604 = vmatprep.mubr.msk.f32.mxu1 %vm29783_vm8, %v29784_v6 }
 0x53e   :  { %28526 = vmatprep.subr.bf16.mxu1 %v29782_v34 }
 0x53f   :  { %28960 = vmatpush3.bf16.msra.mxu0 %v28959_v41  ;;  %v32485_v41 = vpack.c.bf16 %v21570_v23, %v21567_v52  ;;  %v24158_v52 = vld [vmem:[%s33416_s3 + $0x188] sm:$0xff]  ;;  %v16130_v23 = vld [vmem:[%s33416_s3] sm:$0xff] }
 0x540   :  { %28961 = vmatprep.subr.bf16.mxu0 %v29782_v34  ;;  %v16138_v62 = vand.u32 4294901760, %v16130_v23 }
 0x541   :  { %28528 = vmatpush3.bf16.msra.mxu1 %v28527_v28 }
 0x542   :  { %27637 = vmatmul.mubr.f32.vlgmr.msra.gmra.mrb[4].mxu0 %v32224_v36  ;;  %28529 = vmatprep.subr.bf16.mxu1 %v29782_v34 }
 0x543   :  { %28963 = vmatpush3.bf16.msra.mxu0 %v28962_v3  ;;  %27647 = vmatprep.mubr.msk.f32.mxu0 %vm29783_vm8, %v29784_v6  ;;  %v21651_v3 = vand.u32 4294901760, %v21650_v13 }
 0x544   :  { %26605 = vmatmul.mubr.f32.vlgmr.msra.gmra.mrb[0].mxu1 %v32232_v19  ;;  %28964 = vmatprep.subr.bf16.mxu0 %v29782_v34 }
 0x545   :  { %28531 = vmatpush3.bf16.msra.mxu1 %v28530_v37  ;;  %26615 = vmatprep.mubr.msk.f32.mxu1 %vm29783_vm8, %v29784_v6  ;;  %v21657_v37 = vsub.f32 %v32435_v51, %v21656_v46 }
 0x546   :  { %28532 = vmatprep.subr.bf16.mxu1 %v29782_v34 }
 0x547   :  { %28966 = vmatpush3.bf16.msra.mxu0 %v28965_v33 }
 0x548   :  { %28967 = vmatprep.subr.bf16.mxu0 %v29782_v34 }
 0x549   :  { %28534 = vmatpush3.bf16.msra.mxu1 %v28533_v14 }
 0x54a   :  { %27648 = vmatmul.mubr.f32.vlgmr.msra.gmra.mrb[4].mxu0 %v32246_v8  ;;  %28535 = vmatprep.subr.bf16.mxu1 %v29782_v34  ;;  %v11548_v8 = vand.u32 4294901760, %v24098_v25 }
 0x54b   :  { %28969 = vmatpush3.bf16.msra.mxu0 %v32258_v15  ;;  %27658 = vmatprep.mubr.msk.f32.mxu0 %vm29783_vm8, %v29784_v6 }
 0x54c   :  { %26616 = vmatmul.mubr.f32.vlgmr.msra.gmra.mrb[0].mxu1 %v32261_v26  ;;  %28970 = vmatprep.subr.bf16.mxu0 %v29782_v34  ;;  %v24100_v26 = vld [vmem:[%s33416_s3 + $0x1f0] sm:$0xff]  ;;  %v32424_v20 = vsub.f32 %v24098_v25, %v11548_v8  ;;  %v32471_v57 = vpack.c.bf16 %v11551_v47, %v11548_v8  ;;  %v21658_v25 = vand.u32 4294901760, %v21657_v37  ;;  %v28998_v8 = vpack.c.bf16 %v32419_v49, %v32417_v22 }
 0x54d   :  { %28537 = vmatpush3.bf16.msra.mxu1 %v32273_v58  ;;  %26626 = vmatprep.mubr.msk.f32.mxu1 %vm29783_vm8, %v29784_v6  ;;  %v11554_v0 = vand.u32 4294901760, %v24100_v26  ;;  %v22050_v49 = vrot.slane %v31775_v30, 4 }
 0x54e   :  { %28538 = vmatprep.subr.bf16.mxu1 %v29782_v34  ;;  %v11629_v4 = vand.u32 4294901760, %v32424_v20  ;;  %v28566_v47 = vpack.c.bf16 %v32426_v40, %v32424_v20 }
 0x54f   :  { %28972 = vmatpush3.bf16.msra.mxu0 %v32287_v18  ;;  %v32499_v33 = vpack.c.bf16 %v11557_v2, %v11554_v0  ;;  %v22057_v2 = vand.u32 4294901760, %v24158_v52 }
 0x550   :  { %28973 = vmatprep.subr.bf16.mxu0 %v29782_v34 }
 0x551   :  { %28540 = vmatpush3.bf16.msra.mxu1 %v32301_v17 }
 0x552   :  { %27659 = vmatmul.mubr.f32.vlgmr.msra.gmra.mrb[4].mxu0 %v21138_v35  ;;  %28541 = vmatprep.subr.bf16.mxu1 %v29782_v34  ;;  %v32422_v35 = vand.u32 4294901760, %v21558_v42 }
 0x553   :  { %28975 = vmatpush3.bf16.msra.mxu0 %v28974_v50  ;;  %27669 = vmatprep.mubr.msk.f32.mxu0 %vm29783_vm8, %v29784_v6 }
 0x554   :  { %26627 = vmatmul.mubr.f32.vlgmr.msra.gmra.mrb[0].mxu1 %v11124_v61  ;;  %28976 = vmatprep.subr.bf16.mxu0 %v29782_v34  ;;  %v32430_v61 = vand.u32 4294901760, %v11545_v59  ;;  %v32444_v1 = vsub.f32 %v21558_v42, %v32422_v35  ;;  %v29001_v42 = vpack.c.bf16 %v32437_v45, %v32435_v51  ;;  %v24160_v51 = vld [vmem:[%s33416_s3 + $0x198] sm:$0xff] }
 0x555   :  { %28543 = vmatpush3.bf16.msra.mxu1 %v28542_v54  ;;  %26637 = vmatprep.mubr.msk.f32.mxu1 %vm29783_vm8, %v29784_v6 }
 0x556   :  { %28544 = vmatprep.subr.bf16.mxu1 %v29782_v34  ;;  %v32459_v60 = vsub.f32 %v11545_v59, %v32430_v61  ;;  %v21631_v53 = vand.u32 4294901760, %v32444_v1  ;;  %v24157_v59 = vld [vmem:[%s33416_s3 + $0x180] sm:$0xff] }
 0x557   :  { %28978 = vmatpush3.bf16.msra.mxu0 %v28977_v12  ;;  %v22054_v40 = vand.u32 4294901760, %v24157_v59 }
 0x558   :  { %28979 = vmatprep.subr.bf16.mxu0 %v29782_v34  ;;  %v21632_v14 = vsub.f32 %v32444_v1, %v21631_v53 }
 0x559   :  { %28546 = vmatpush3.bf16.msra.mxu1 %v28545_v21 }
 0x55a   :  { %27670 = vmatmul.mubr.f32.vlgmr.msra.gmra.mrb[4].mxu0 %v32224_v36  ;;  %28547 = vmatprep.subr.bf16.mxu1 %v29782_v34  ;;  %v21633_v16 = vand.u32 4294901760, %v21632_v14 }
 0x55b   :  { %28981 = vmatpush3.bf16.msra.mxu0 %v32258_v15  ;;  %27680 = vmatprep.mubr.msk.f32.mxu0 %vm29783_vm8, %v29784_v6  ;;  %v32449_v15 = vsub.f32 %v24100_v26, %v11554_v0  ;;  %v16131_v0 = vld [vmem:[%s33416_s3 + $0x8] sm:$0xff] }
 0x55c   :  { %26638 = vmatmul.mubr.f32.vlgmr.msra.gmra.mrb[0].mxu1 %v32232_v19  ;;  %28982 = vmatprep.subr.bf16.mxu0 %v29782_v34 }
 0x55d   :  { %28549 = vmatpush3.bf16.msra.mxu1 %v32273_v58  ;;  %26648 = vmatprep.mubr.msk.f32.mxu1 %vm29783_vm8, %v29784_v6  ;;  %v21643_v58 = vsub.f32 %v32417_v22, %v21642_v27  ;;  %v11643_v24 = vand.u32 4294901760, %v32449_v15  ;;  %v28569_v26 = vpack.c.bf16 %v32451_v43, %v32449_v15  ;;  %v28578_v22 = vpack.c.bf16 %v11636_v55, %v11629_v4  ;;  %v24159_v27 = vld [vmem:[%s33416_s3 + $0x190] sm:$0xff] }
 0x55e   :  { %28550 = vmatprep.subr.bf16.mxu1 %v29782_v34  ;;  %v16132_v55 = vld [vmem:[%s33416_s3 + $0x10] sm:$0xff]  ;;  %v22060_v13 = vand.u32 4294901760, %v24159_v27 }
 0x55f   :  { %28984 = vmatpush3.bf16.msra.mxu0 %v32287_v18  ;;  %v11630_v18 = vsub.f32 %v32424_v20, %v11629_v4  ;;  %v21644_v28 = vand.u32 4294901760, %v21643_v58  ;;  %v11644_v38 = vsub.f32 %v32449_v15, %v11643_v24  ;;  %v29013_v20 = vpack.c.bf16 %v21663_v48, %v21656_v46  ;;  %v16133_v15 = vld [vmem:[%s33416_s3 + $0x18] sm:$0xff] }
 0x560   :  { %28985 = vmatprep.subr.bf16.mxu0 %v29782_v34  ;;  %v22051_v4 = vsel %vm4133_vm10, %v22050_v49, 0  ;;  %v32617_v58 = vsub.f32 %v24158_v52, %v22057_v2  ;;  %v22063_v46 = vand.u32 4294901760, %v24160_v51  ;;  %v16144_v56 = vand.u32 4294901760, %v16132_v55 }
 0x561   :  { %28552 = vmatpush3.bf16.msra.mxu1 %v32301_v17  ;;  %v11618_v17 = vand.u32 4294901760, %v32459_v60  ;;  %v11631_v50 = vand.u32 4294901760, %v11630_v18  ;;  %v28992_v29 = vpack.c.bf16 %v21651_v3, %v21644_v28  ;;  %v11645_v44 = vand.u32 4294901760, %v11644_v38 }
 0x562   :  { %27681 = vmatmul.mubr.f32.vlgmr.msra.gmra.mrb[4].mxu0 %v32224_v36  ;;  %28553 = vmatprep.subr.bf16.mxu1 %v29782_v34  ;;  %v21664_v36 = vsub.f32 %v32437_v45, %v21663_v48  ;;  %v28581_v45 = vpack.c.bf16 %v11650_v63, %v11643_v24  ;;  %v32620_v48 = vand.u32 4294901760, %v22051_v4  ;;  %v16147_v24 = vand.u32 4294901760, %v16133_v15 }
 0x563   :  { %28987 = vmatpush3.bf16.msra.mxu0 %v32456_v31  ;;  %27691 = vmatprep.mubr.msk.f32.mxu0 %vm29783_vm8, %v29784_v6  ;;  %v11619_v54 = vsub.f32 %v32459_v60, %v11618_v17  ;;  %v28560_v12 = vpack.c.bf16 %v11638_v5, %v11631_v50  ;;  %v32635_v28 = vsub.f32 %v24160_v51, %v22063_v46  ;;  %v22142_v37 = vand.u32 4294901760, %v32617_v58 }
 0x564   :  { %26649 = vmatmul.mubr.f32.vlgmr.msra.gmra.mrb[0].mxu1 %v32232_v19  ;;  %28988 = vmatprep.subr.bf16.mxu0 %v29782_v34  ;;  %v11651_v19 = vsub.f32 %v32451_v43, %v11650_v63  ;;  %v21665_v7 = vand.u32 4294901760, %v21664_v36  ;;  %v16135_v43 = vsel %vm4133_vm10, %v31109_v11, 0  ;;  %v32642_v36 = vsub.f32 %v22051_v4, %v32620_v48 }
 0x565   :  { %28555 = vmatpush3.bf16.msra.mxu1 %v32471_v57  ;;  %26659 = vmatprep.mubr.msk.f32.mxu1 %vm29783_vm8, %v29784_v6  ;;  %v11620_v10 = vand.u32 4294901760, %v11619_v54  ;;  %v32628_v63 = vand.u32 4294901760, %v16135_v43  ;;  %v32649_v14 = vsub.f32 %v16133_v15, %v16147_v24  ;;  %v32654_v38 = vpack.c.bf16 %v22057_v2, %v22054_v40 }
 0x566   :  { %28556 = vmatprep.subr.bf16.mxu1 %v29782_v34  ;;  %v11652_v32 = vand.u32 4294901760, %v11651_v19  ;;  %v28995_v9 = vpack.c.bf16 %v21665_v7, %v21658_v25  ;;  %v22143_v54 = vsub.f32 %v32617_v58, %v22142_v37  ;;  %v22156_v25 = vand.u32 4294901760, %v32635_v28 }
 0x567   :  { %28990 = vmatpush3.bf16.msra.mxu0 %v32485_v41  ;;  %v32657_v19 = vsub.f32 %v16135_v43, %v32628_v63  ;;  %v24161_v43 = vld [vmem:[%s33416_s3 + $0x1a0] sm:$0xff] }
 0x568   :  { %28991 = vmatprep.subr.bf16.mxu0 %v29782_v34  ;;  %v28563_v21 = vpack.c.bf16 %v11652_v32, %v11645_v44  ;;  %v16240_v32 = vand.u32 4294901760, %v32649_v14 }
 0x569   :  { %28558 = vmatpush3.bf16.msra.mxu1 %v32499_v33 }
 0x56a   :  { %27692 = vmatmul.mubr.f32.vlgmr.msra.gmra.mrb[4].mxu0 %v21633_v16  ;;  %28559 = vmatprep.subr.bf16.mxu1 %v29782_v34  ;;  %v22124_v16 = vand.u32 4294901760, %v32642_v36 }
 0x56b   :  { %28993 = vmatpush3.bf16.msra.mxu0 %v28992_v29  ;;  %27702 = vmatprep.mubr.msk.f32.mxu0 %vm29783_vm8, %v29784_v6 }
 0x56c   :  { %26660 = vmatmul.mubr.f32.vlgmr.msra.gmra.mrb[0].mxu1 %v11620_v10  ;;  %28994 = vmatprep.subr.bf16.mxu0 %v29782_v34  ;;  %v32683_v10 = vpack.c.bf16 %v22063_v46, %v22060_v13  ;;  %v24113_v46 = vld [vmem:[%s33416_s3 + $0x20] sm:$0xff] }
 0x56d   :  { %28561 = vmatpush3.bf16.msra.mxu1 %v28560_v12  ;;  %26670 = vmatprep.mubr.msk.f32.mxu1 %vm29783_vm8, %v29784_v6 }
 0x56e   :  { %28562 = vmatprep.subr.bf16.mxu1 %v29782_v34 }
 0x56f   :  { %28996 = vmatpush3.bf16.msra.mxu0 %v28995_v9 }
 0x570   :  { %28997 = vmatprep.subr.bf16.mxu0 %v29782_v34 }
 0x571   :  { %28564 = vmatpush3.bf16.msra.mxu1 %v28563_v21  ;;  %v22144_v21 = vand.u32 4294901760, %v22143_v54 }
 0x572   :  { %27703 = vmatmul.mubr.f32.vlgmr.msra.gmra.mrb[4].mxu0 %v32422_v35  ;;  %28565 = vmatprep.subr.bf16.mxu1 %v29782_v34 }
 0x573   :  { %28999 = vmatpush3.bf16.msra.mxu0 %v28998_v8  ;;  %27713 = vmatprep.mubr.msk.f32.mxu0 %vm29783_vm8, %v29784_v6 }
 0x574   :  { %26671 = vmatmul.mubr.f32.vlgmr.msra.gmra.mrb[0].mxu1 %v32430_v61  ;;  %29000 = vmatprep.subr.bf16.mxu0 %v29782_v34 }
 0x575   :  { %28567 = vmatpush3.bf16.msra.mxu1 %v28566_v47  ;;  %26681 = vmatprep.mubr.msk.f32.mxu1 %vm29783_vm8, %v29784_v6  ;;  %v32697_v47 = vpack.c.bf16 %v16147_v24, %v16144_v56  ;;  %v22547_v24 = vand.u32 4294901760, %v24161_v43 }
 0x576   :  { %28568 = vmatprep.subr.bf16.mxu1 %v29782_v34 }
 0x577   :  { %29002 = vmatpush3.bf16.msra.mxu0 %v29001_v42  ;;  %v22125_v42 = vsub.f32 %v32642_v36, %v22124_v16 }
 0x578   :  { %29003 = vmatprep.subr.bf16.mxu0 %v29782_v34 }
 0x579   :  { %28570 = vmatpush3.bf16.msra.mxu1 %v28569_v26 }
 0x57a   :  { %27714 = vmatmul.mubr.f32.vlgmr.msra.gmra.mrb[4].mxu0 %v32444_v1  ;;  %28571 = vmatprep.subr.bf16.mxu1 %v29782_v34  ;;  %v16141_v1 = vand.u32 4294901760, %v16131_v0 }
 0x57b   :  { %29005 = vmatpush3.bf16.msra.mxu0 %v32456_v31  ;;  %27724 = vmatprep.mubr.msk.f32.mxu0 %vm29783_vm8, %v29784_v6 }
 0x57c   :  { %26682 = vmatmul.mubr.f32.vlgmr.msra.gmra.mrb[0].mxu1 %v32459_v60  ;;  %29006 = vmatprep.subr.bf16.mxu0 %v29782_v34  ;;  %v32615_v60 = vsub.f32 %v24157_v59, %v22054_v40  ;;  %v32624_v18 = vsub.f32 %v16131_v0, %v16141_v1  ;;  %v32669_v7 = vpack.c.bf16 %v16141_v1, %v16138_v62  ;;  %v22126_v0 = vand.u32 4294901760, %v22125_v42 }
 0x57d   :  { %28573 = vmatpush3.bf16.msra.mxu1 %v32471_v57  ;;  %26692 = vmatprep.mubr.msk.f32.mxu1 %vm29783_vm8, %v29784_v6 }
 0x57e   :  { %28574 = vmatprep.subr.bf16.mxu1 %v29782_v34  ;;  %v22135_v3 = vand.u32 4294901760, %v32615_v60  ;;  %v16226_v5 = vand.u32 4294901760, %v32624_v18 }
 0x57f   :  { %29008 = vmatpush3.bf16.msra.mxu0 %v32485_v41 }
 0x580   :  { %29009 = vmatprep.subr.bf16.mxu0 %v29782_v34  ;;  %v16227_v12 = vsub.f32 %v32624_v18, %v16226_v5  ;;  %v29046_v15 = vpack.c.bf16 %v22142_v37, %v22135_v3  ;;  %v24163_v37 = vld [vmem:[%s33416_s3 + $0x1b0] sm:$0xff] }
 0x581   :  { %28576 = vmatpush3.bf16.msra.mxu1 %v32499_v33 }
 0x582   :  { %27725 = vmatmul.mubr.f32.vlgmr.msra.gmra.mrb[4].mxu0 %v21631_v53  ;;  %28577 = vmatprep.subr.bf16.mxu1 %v29782_v34  ;;  %v32622_v53 = vsub.f32 %v16130_v23, %v16138_v62  ;;  %v29034_v62 = vpack.c.bf16 %v32617_v58, %v32615_v60  ;;  %v22543_v58 = vrot.slane %v31775_v30, 5 }
 0x583   :  { %29011 = vmatpush3.bf16.msra.mxu0 %v29010_v39  ;;  %27735 = vmatprep.mubr.msk.f32.mxu0 %vm29783_vm8, %v29784_v6  ;;  %v16228_v39 = vand.u32 4294901760, %v16227_v12 }
 0x584   :  { %26693 = vmatmul.mubr.f32.vlgmr.msra.gmra.mrb[0].mxu1 %v11618_v17  ;;  %29012 = vmatprep.subr.bf16.mxu0 %v29782_v34  ;;  %v32633_v17 = vsub.f32 %v24159_v27, %v22060_v13  ;;  %v16219_v50 = vand.u32 4294901760, %v32622_v53  ;;  %v28602_v1 = vpack.c.bf16 %v32624_v18, %v32622_v53  ;;  %v24162_v13 = vld [vmem:[%s33416_s3 + $0x1a8] sm:$0xff] }
 0x585   :  { %28579 = vmatpush3.bf16.msra.mxu1 %v28578_v22  ;;  %26703 = vmatprep.mubr.msk.f32.mxu1 %vm29783_vm8, %v29784_v6 }
 0x586   :  { %28580 = vmatprep.subr.bf16.mxu1 %v29782_v34  ;;  %v22149_v29 = vand.u32 4294901760, %v32633_v17  ;;  %v29037_v4 = vpack.c.bf16 %v32635_v28, %v32633_v17 }
 0x587   :  { %29014 = vmatpush3.bf16.msra.mxu0 %v29013_v20 }
 0x588   :  { %29015 = vmatprep.subr.bf16.mxu0 %v29782_v34  ;;  %v22150_v8 = vsub.f32 %v32633_v17, %v22149_v29  ;;  %v29049_v18 = vpack.c.bf16 %v22156_v25, %v22149_v29  ;;  %v24164_v17 = vld [vmem:[%s33416_s3 + $0x1b8] sm:$0xff]  ;;  %v22553_v29 = vand.u32 4294901760, %v24163_v37 }
 0x589   :  { %28582 = vmatpush3.bf16.msra.mxu1 %v28581_v45 }
 0x58a   :  { %27736 = vmatmul.mubr.f32.vlgmr.msra.gmra.mrb[4].mxu0 %v32422_v35  ;;  %28583 = vmatprep.subr.bf16.mxu1 %v29782_v34  ;;  %v22151_v49 = vand.u32 4294901760, %v22150_v8 }
 0x58b   :  { %29017 = vmatpush3.bf16.msra.mxu0 %v32456_v31  ;;  %27746 = vmatprep.mubr.msk.f32.mxu0 %vm29783_vm8, %v29784_v6  ;;  %v32647_v31 = vsub.f32 %v16132_v55, %v16144_v56  ;;  %v24114_v56 = vld [vmem:[%s33416_s3 + $0x28] sm:$0xff] }
 0x58c   :  { %26704 = vmatmul.mubr.f32.vlgmr.msra.gmra.mrb[0].mxu1 %v32430_v61  ;;  %29018 = vmatprep.subr.bf16.mxu0 %v29782_v34 }
 0x58d   :  { %28585 = vmatpush3.bf16.msra.mxu1 %v32471_v57  ;;  %26714 = vmatprep.mubr.msk.f32.mxu1 %vm29783_vm8, %v29784_v6  ;;  %v22136_v57 = vsub.f32 %v32615_v60, %v22135_v3  ;;  %v16233_v44 = vand.u32 4294901760, %v32647_v31  ;;  %v28605_v55 = vpack.c.bf16 %v32649_v14, %v32647_v31  ;;  %v28614_v60 = vpack.c.bf16 %v16226_v5, %v16219_v50 }
 0x58e   :  { %28586 = vmatprep.subr.bf16.mxu1 %v29782_v34  ;;  %v22550_v3 = vand.u32 4294901760, %v24162_v13  ;;  %v22544_v5 = vsel %vm4133_vm10, %v22543_v58, 0 }
 0x58f   :  { %29020 = vmatpush3.bf16.msra.mxu0 %v32485_v41  ;;  %v16220_v41 = vsub.f32 %v32622_v53, %v16219_v50  ;;  %v22137_v9 = vand.u32 4294901760, %v22136_v57  ;;  %v16234_v59 = vsub.f32 %v32647_v31, %v16233_v44  ;;  %v16627_v53 = vrot.slane %v31109_v11, 1  ;;  %v24116_v31 = vld [vmem:[%s33416_s3 + $0x38] sm:$0xff] }
 0x590   :  { %29021 = vmatprep.subr.bf16.mxu0 %v29782_v34  ;;  %v16634_v50 = vand.u32 4294901760, %v24114_v56  ;;  %v32813_v57 = vsub.f32 %v24161_v43, %v22547_v24  ;;  %v32815_v54 = vsub.f32 %v24162_v13, %v22550_v3 }
 0x591   :  { %28588 = vmatpush3.bf16.msra.mxu1 %v32499_v33  ;;  %v16208_v33 = vand.u32 4294901760, %v32657_v19  ;;  %v16221_v26 = vand.u32 4294901760, %v16220_v41  ;;  %v29028_v22 = vpack.c.bf16 %v22144_v21, %v22137_v9  ;;  %v16235_v40 = vand.u32 4294901760, %v16234_v59 }
 0x592   :  { %27747 = vmatmul.mubr.f32.vlgmr.msra.gmra.mrb[4].mxu0 %v32422_v35  ;;  %28589 = vmatprep.subr.bf16.mxu1 %v29782_v34  ;;  %v22157_v35 = vsub.f32 %v32635_v28, %v22156_v25  ;;  %v28617_v28 = vpack.c.bf16 %v16240_v32, %v16233_v44  ;;  %v22556_v25 = vand.u32 4294901760, %v24164_v17  ;;  %v32822_v12 = vsub.f32 %v24114_v56, %v16634_v50 }
 0x593   :  { %29023 = vmatpush3.bf16.msra.mxu0 %v32654_v38  ;;  %27757 = vmatprep.mubr.msk.f32.mxu0 %vm29783_vm8, %v29784_v6  ;;  %v16209_v52 = vsub.f32 %v32657_v19, %v16208_v33  ;;  %v28596_v20 = vpack.c.bf16 %v16228_v39, %v16221_v26  ;;  %v32831_v9 = vsub.f32 %v24163_v37, %v22553_v29  ;;  %v22628_v8 = vand.u32 4294901760, %v32813_v57 }
 0x594   :  { %26715 = vmatmul.mubr.f32.vlgmr.msra.gmra.mrb[0].mxu1 %v32430_v61  ;;  %29024 = vmatprep.subr.bf16.mxu0 %v29782_v34  ;;  %v16241_v61 = vsub.f32 %v32649_v14, %v16240_v32  ;;  %v22158_v23 = vand.u32 4294901760, %v22157_v35  ;;  %v16628_v14 = vsel %vm4133_vm10, %v16627_v53, 0  ;;  %v16640_v32 = vand.u32 4294901760, %v24116_v31 }
 0x595   :  { %28591 = vmatpush3.bf16.msra.mxu1 %v32669_v7  ;;  %26965 = vmatprep.mubr.msk.f32.mxu1 %vm29783_vm8, %v29784_v6  ;;  %v16210_v27 = vand.u32 4294901760, %v16209_v52  ;;  %v32833_v21 = vsub.f32 %v24164_v17, %v22556_v25  ;;  %v22635_v35 = vand.u32 4294901760, %v32815_v54  ;;  %v16719_v59 = vand.u32 4294901760, %v32822_v12 }
 0x596   :  { %28592 = vmatprep.subr.bf16.mxu1 %v29782_v34  ;;  %v16242_v2 = vand.u32 4294901760, %v16241_v61  ;;  %v29031_v51 = vpack.c.bf16 %v22158_v23, %v22151_v49  ;;  %v32847_v26 = vsub.f32 %v24116_v31, %v16640_v32  ;;  %v32852_v61 = vpack.c.bf16 %v22550_v3, %v22547_v24 }
 0x597   :  { %29026 = vmatpush3.bf16.msra.mxu0 %v32683_v10  ;;  %v22642_v49 = vand.u32 4294901760, %v32831_v9  ;;  %v22649_v23 = vand.u32 4294901760, %v32833_v21  ;;  %v29082_v31 = vpack.c.bf16 %v22635_v35, %v22628_v8 }
 0x598   :  { %29027 = vmatprep.subr.bf16.mxu0 %v29782_v34  ;;  %v28599_v45 = vpack.c.bf16 %v16242_v2, %v16235_v40  ;;  %v16720_v40 = vsub.f32 %v32822_v12, %v16719_v59 }
 0x599   :  { %28594 = vmatpush3.bf16.msra.mxu1 %v32697_v47 }
 0x59a   :  { %27758 = vmatmul.mubr.f32.vlgmr.msra.gmra.mrb[4].mxu0 %v22126_v0  ;;  %28595 = vmatprep.subr.bf16.mxu1 %v29782_v34  ;;  %v16721_v43 = vand.u32 4294901760, %v16720_v40 }
 0x59b   :  { %29029 = vmatpush3.bf16.msra.mxu0 %v29028_v22  ;;  %27768 = vmatprep.mubr.msk.f32.mxu0 %vm29783_vm8, %v29784_v6  ;;  %v22636_v22 = vsub.f32 %v32815_v54, %v22635_v35  ;;  %v24167_v35 = vld [vmem:[%s33416_s3 + $0x1d0] sm:$0xff] }
 0x59c   :  { %26966 = vmatmul.mubr.f32.vlgmr.msra.gmra.mrb[2].mxu1 %v16210_v27  ;;  %29030 = vmatprep.subr.bf16.mxu0 %v29782_v34  ;;  %v16733_v27 = vand.u32 4294901760, %v32847_v26 }
 0x59d   :  { %28597 = vmatpush3.bf16.msra.mxu1 %v28596_v20  ;;  %26976 = vmatprep.mubr.msk.f32.mxu1 %vm29783_vm8, %v29784_v6 }
 0x59e   :  { %28598 = vmatprep.subr.bf16.mxu1 %v29782_v34 }
 0x59f   :  { %29032 = vmatpush3.bf16.msra.mxu0 %v29031_v51  ;;  %v32881_v51 = vpack.c.bf16 %v22556_v25, %v22553_v29  ;;  %v24166_v29 = vld [vmem:[%s33416_s3 + $0x1c8] sm:$0xff]  ;;  %v24117_v25 = vld [vmem:[%s33416_s3 + $0x40] sm:$0xff] }
 0x5a0   :  { %29033 = vmatprep.subr.bf16.mxu0 %v29782_v34 }
 0x5a1   :  { %28600 = vmatpush3.bf16.msra.mxu1 %v28599_v45 }
 0x5a2   :  { %27769 = vmatmul.mubr.f32.vlgmr.msra.gmra.mrb[4].mxu0 %v32620_v48  ;;  %28601 = vmatprep.subr.bf16.mxu1 %v29782_v34 }
 0x5a3   :  { %29035 = vmatpush3.bf16.msra.mxu0 %v29034_v62  ;;  %27779 = vmatprep.mubr.msk.f32.mxu0 %vm29783_vm8, %v29784_v6  ;;  %v22637_v62 = vand.u32 4294901760, %v22636_v22 }
 0x5a4   :  { %26977 = vmatmul.mubr.f32.vlgmr.msra.gmra.mrb[2].mxu1 %v32628_v63  ;;  %29036 = vmatprep.subr.bf16.mxu0 %v29782_v34 }
 0x5a5   :  { %28603 = vmatpush3.bf16.msra.mxu1 %v28602_v1  ;;  %26987 = vmatprep.mubr.msk.f32.mxu1 %vm29783_vm8, %v29784_v6  ;;  %v22643_v1 = vsub.f32 %v32831_v9, %v22642_v49 }
 0x5a6   :  { %28604 = vmatprep.subr.bf16.mxu1 %v29782_v34 }
 0x5a7   :  { %29038 = vmatpush3.bf16.msra.mxu0 %v29037_v4 }
 0x5a8   :  { %29039 = vmatprep.subr.bf16.mxu0 %v29782_v34 }
 0x5a9   :  { %28606 = vmatpush3.bf16.msra.mxu1 %v28605_v55 }
 0x5aa   :  { %27780 = vmatmul.mubr.f32.vlgmr.msra.gmra.mrb[4].mxu0 %v32642_v36  ;;  %28607 = vmatprep.subr.bf16.mxu1 %v29782_v34  ;;  %v16631_v36 = vand.u32 4294901760, %v24113_v46 }
 0x5ab   :  { %29041 = vmatpush3.bf16.msra.mxu0 %v32654_v38  ;;  %27790 = vmatprep.mubr.msk.f32.mxu0 %vm29783_vm8, %v29784_v6 }
 0x5ac   :  { %26988 = vmatmul.mubr.f32.vlgmr.msra.gmra.mrb[2].mxu1 %v32657_v19  ;;  %29042 = vmatprep.subr.bf16.mxu0 %v29782_v34  ;;  %v24115_v19 = vld [vmem:[%s33416_s3 + $0x30] sm:$0xff]  ;;  %v32820_v41 = vsub.f32 %v24113_v46, %v16631_v36  ;;  %v32867_v0 = vpack.c.bf16 %v16634_v50, %v16631_v36  ;;  %v22644_v46 = vand.u32 4294901760, %v22643_v1  ;;  %v29070_v36 = vpack.c.bf16 %v32815_v54, %v32813_v57 }
 0x5ad   :  { %28609 = vmatpush3.bf16.msra.mxu1 %v32669_v7  ;;  %26998 = vmatprep.mubr.msk.f32.mxu1 %vm29783_vm8, %v29784_v6  ;;  %v16637_v44 = vand.u32 4294901760, %v24115_v19  ;;  %v23036_v54 = vrot.slane %v31775_v30, 6 }
 0x5ae   :  { %28610 = vmatprep.subr.bf16.mxu1 %v29782_v34  ;;  %v16712_v39 = vand.u32 4294901760, %v32820_v41  ;;  %v28638_v50 = vpack.c.bf16 %v32822_v12, %v32820_v41  ;;  %v29085_v12 = vpack.c.bf16 %v22649_v23, %v22642_v49  ;;  %v23046_v49 = vand.u32 4294901760, %v24167_v35 }
 0x5af   :  { %29044 = vmatpush3.bf16.msra.mxu0 %v32683_v10  ;;  %v32895_v4 = vpack.c.bf16 %v16640_v32, %v16637_v44 }
 0x5b0   :  { %29045 = vmatprep.subr.bf16.mxu0 %v29782_v34 }
 0x5b1   :  { %28612 = vmatpush3.bf16.msra.mxu1 %v32697_v47 }
 0x5b2   :  { %27791 = vmatmul.mubr.f32.vlgmr.msra.gmra.mrb[4].mxu0 %v22124_v16  ;;  %28613 = vmatprep.subr.bf16.mxu1 %v29782_v34  ;;  %v32818_v16 = vand.u32 4294901760, %v22544_v5 }
 0x5b3   :  { %29047 = vmatpush3.bf16.msra.mxu0 %v29046_v15  ;;  %27801 = vmatprep.mubr.msk.f32.mxu0 %vm29783_vm8, %v29784_v6 }
 0x5b4   :  { %26999 = vmatmul.mubr.f32.vlgmr.msra.gmra.mrb[2].mxu1 %v16208_v33  ;;  %29048 = vmatprep.subr.bf16.mxu0 %v29782_v34  ;;  %v32826_v33 = vand.u32 4294901760, %v16628_v14  ;;  %v32840_v42 = vsub.f32 %v22544_v5, %v32818_v16  ;;  %v29073_v5 = vpack.c.bf16 %v32833_v21, %v32831_v9  ;;  %v24168_v9 = vld [vmem:[%s33416_s3 + $0x1d8] sm:$0xff] }
 0x5b5   :  { %28615 = vmatpush3.bf16.msra.mxu1 %v28614_v60  ;;  %27009 = vmatprep.mubr.msk.f32.mxu1 %vm29783_vm8, %v29784_v6 }
 0x5b6   :  { %28616 = vmatprep.subr.bf16.mxu1 %v29782_v34  ;;  %v32855_v52 = vsub.f32 %v16628_v14, %v32826_v33  ;;  %v22617_v20 = vand.u32 4294901760, %v32840_v42  ;;  %v24165_v14 = vld [vmem:[%s33416_s3 + $0x1c0] sm:$0xff] }
 0x5b7   :  { %29050 = vmatpush3.bf16.msra.mxu0 %v29049_v18  ;;  %v23040_v32 = vand.u32 4294901760, %v24165_v14 }
 0x5b8   :  { %29051 = vmatprep.subr.bf16.mxu0 %v29782_v34  ;;  %v22618_v55 = vsub.f32 %v32840_v42, %v22617_v20 }
 0x5b9   :  { %28618 = vmatpush3.bf16.msra.mxu1 %v28617_v28 }
 0x5ba   :  { %27802 = vmatmul.mubr.f32.vlgmr.msra.gmra.mrb[4].mxu0 %v32620_v48  ;;  %28619 = vmatprep.subr.bf16.mxu1 %v29782_v34  ;;  %v22619_v53 = vand.u32 4294901760, %v22618_v55 }
 0x5bb   :  { %29053 = vmatpush3.bf16.msra.mxu0 %v32654_v38  ;;  %27812 = vmatprep.mubr.msk.f32.mxu0 %vm29783_vm8, %v29784_v6  ;;  %v32845_v38 = vsub.f32 %v24115_v19, %v16637_v44  ;;  %v24118_v44 = vld [vmem:[%s33416_s3 + $0x48] sm:$0xff] }
 0x5bc   :  { %27010 = vmatmul.mubr.f32.vlgmr.msra.gmra.mrb[2].mxu1 %v32628_v63  ;;  %29054 = vmatprep.subr.bf16.mxu0 %v29782_v34 }
 0x5bd   :  { %28621 = vmatpush3.bf16.msra.mxu1 %v32669_v7  ;;  %27020 = vmatprep.mubr.msk.f32.mxu1 %vm29783_vm8, %v29784_v6  ;;  %v22629_v7 = vsub.f32 %v32813_v57, %v22628_v8  ;;  %v16726_v2 = vand.u32 4294901760, %v32845_v38  ;;  %v28641_v19 = vpack.c.bf16 %v32847_v26, %v32845_v38  ;;  %v28650_v57 = vpack.c.bf16 %v16719_v59, %v16712_v39 }
 0x5be   :  { %28622 = vmatprep.subr.bf16.mxu1 %v29782_v34  ;;  %v23043_v8 = vand.u32 4294901760, %v24166_v29  ;;  %v23037_v59 = vsel %vm4133_vm10, %v23036_v54, 0 }
 0x5bf   :  { %29056 = vmatpush3.bf16.msra.mxu0 %v32683_v10  ;;  %v16713_v10 = vsub.f32 %v32820_v41, %v16712_v39  ;;  %v22630_v45 = vand.u32 4294901760, %v22629_v7  ;;  %v16727_v13 = vsub.f32 %v32845_v38, %v16726_v2  ;;  %v17120_v41 = vrot.slane %v31109_v11, 2  ;;  %v24120_v38 = vld [vmem:[%s33416_s3 + $0x58] sm:$0xff] }
 0x5c0   :  { %29057 = vmatprep.subr.bf16.mxu0 %v29782_v34  ;;  %v17127_v39 = vand.u32 4294901760, %v24118_v44  ;;  %v33011_v7 = vsub.f32 %v24165_v14, %v23040_v32  ;;  %v33013_v22 = vsub.f32 %v24166_v29, %v23043_v8 }
 0x5c1   :  { %28624 = vmatpush3.bf16.msra.mxu1 %v32697_v47  ;;  %v16701_v47 = vand.u32 4294901760, %v32855_v52  ;;  %v16714_v15 = vand.u32 4294901760, %v16713_v10  ;;  %v29064_v58 = vpack.c.bf16 %v22637_v62, %v22630_v45  ;;  %v16728_v24 = vand.u32 4294901760, %v16727_v13 }
 0x5c2   :  { %27813 = vmatmul.mubr.f32.vlgmr.msra.gmra.mrb[4].mxu0 %v32620_v48  ;;  %28625 = vmatprep.subr.bf16.mxu1 %v29782_v34  ;;  %v22650_v48 = vsub.f32 %v32833_v21, %v22649_v23  ;;  %v28653_v21 = vpack.c.bf16 %v16733_v27, %v16726_v2  ;;  %v23049_v23 = vand.u32 4294901760, %v24168_v9  ;;  %v33020_v40 = vsub.f32 %v24118_v44, %v17127_v39 }
 0x5c3   :  { %29059 = vmatpush3.bf16.msra.mxu0 %v32852_v61  ;;  %27823 = vmatprep.mubr.msk.f32.mxu0 %vm29783_vm8, %v29784_v6  ;;  %v16702_v60 = vsub.f32 %v32855_v52, %v16701_v47  ;;  %v28632_v18 = vpack.c.bf16 %v16721_v43, %v16714_v15  ;;  %v33029_v45 = vsub.f32 %v24167_v35, %v23046_v49  ;;  %v23121_v1 = vand.u32 4294901760, %v33011_v7 }
 0x5c4   :  { %27021 = vmatmul.mubr.f32.vlgmr.msra.gmra.mrb[2].mxu1 %v32628_v63  ;;  %29060 = vmatprep.subr.bf16.mxu0 %v29782_v34  ;;  %v16734_v63 = vsub.f32 %v32847_v26, %v16733_v27  ;;  %v22651_v56 = vand.u32 4294901760, %v22650_v48  ;;  %v17121_v26 = vsel %vm4133_vm10, %v17120_v41, 0  ;;  %v17133_v27 = vand.u32 4294901760, %v24120_v38 }
 0x5c5   :  { %28627 = vmatpush3.bf16.msra.mxu1 %v32867_v0  ;;  %27031 = vmatprep.mubr.msk.f32.mxu1 %vm29783_vm8, %v29784_v6  ;;  %v16703_v37 = vand.u32 4294901760, %v16702_v60  ;;  %v33031_v62 = vsub.f32 %v24168_v9, %v23049_v23  ;;  %v23128_v48 = vand.u32 4294901760, %v33013_v22  ;;  %v17212_v13 = vand.u32 4294901760, %v33020_v40 }
 0x5c6   :  { %28628 = vmatprep.subr.bf16.mxu1 %v29782_v34  ;;  %v16735_v3 = vand.u32 4294901760, %v16734_v63  ;;  %v29067_v17 = vpack.c.bf16 %v22651_v56, %v22644_v46  ;;  %v33045_v15 = vsub.f32 %v24120_v38, %v17133_v27  ;;  %v33050_v63 = vpack.c.bf16 %v23043_v8, %v23040_v32 }
 0x5c7   :  { %29062 = vmatpush3.bf16.msra.mxu0 %v32881_v51  ;;  %v23135_v46 = vand.u32 4294901760, %v33029_v45  ;;  %v23142_v56 = vand.u32 4294901760, %v33031_v62  ;;  %v29118_v38 = vpack.c.bf16 %v23128_v48, %v23121_v1 }
 0x5c8   :  { %29063 = vmatprep.subr.bf16.mxu0 %v29782_v34  ;;  %v28635_v28 = vpack.c.bf16 %v16735_v3, %v16728_v24  ;;  %v17213_v24 = vsub.f32 %v33020_v40, %v17212_v13 }
 0x5c9   :  { %28630 = vmatpush3.bf16.msra.mxu1 %v32895_v4 }
 0x5ca   :  { %27824 = vmatmul.mubr.f32.vlgmr.msra.gmra.mrb[4].mxu0 %v22619_v53  ;;  %28631 = vmatprep.subr.bf16.mxu1 %v29782_v34  ;;  %v17214_v14 = vand.u32 4294901760, %v17213_v24 }
 0x5cb   :  { %29065 = vmatpush3.bf16.msra.mxu0 %v29064_v58  ;;  %27834 = vmatprep.mubr.msk.f32.mxu0 %vm29783_vm8, %v29784_v6  ;;  %v23129_v58 = vsub.f32 %v33013_v22, %v23128_v48 }
 0x5cc   :  { %27032 = vmatmul.mubr.f32.vlgmr.msra.gmra.mrb[2].mxu1 %v16703_v37  ;;  %29066 = vmatprep.subr.bf16.mxu0 %v29782_v34  ;;  %v17226_v37 = vand.u32 4294901760, %v33045_v15 }
 0x5cd   :  { %28633 = vmatpush3.bf16.msra.mxu1 %v28632_v18  ;;  %27042 = vmatprep.mubr.msk.f32.mxu1 %vm29783_vm8, %v29784_v6 }
 0x5ce   :  { %28634 = vmatprep.subr.bf16.mxu1 %v29782_v34 }
 0x5cf   :  { %29068 = vmatpush3.bf16.msra.mxu0 %v29067_v17  ;;  %v33079_v17 = vpack.c.bf16 %v23049_v23, %v23046_v49  ;;  %v24170_v49 = vld [vmem:[%s33416_s3 + $0x1e8] sm:$0xff]  ;;  %v24121_v23 = vld [vmem:[%s33416_s3 + $0x60] sm:$0xff] }
 0x5d0   :  { %29069 = vmatprep.subr.bf16.mxu0 %v29782_v34 }
 0x5d1   :  { %28636 = vmatpush3.bf16.msra.mxu1 %v28635_v28 }
 0x5d2   :  { %27835 = vmatmul.mubr.f32.vlgmr.msra.gmra.mrb[4].mxu0 %v32818_v16  ;;  %28637 = vmatprep.subr.bf16.mxu1 %v29782_v34 }
 0x5d3   :  { %29071 = vmatpush3.bf16.msra.mxu0 %v29070_v36  ;;  %27845 = vmatprep.mubr.msk.f32.mxu0 %vm29783_vm8, %v29784_v6  ;;  %v23130_v36 = vand.u32 4294901760, %v23129_v58 }
 0x5d4   :  { %27043 = vmatmul.mubr.f32.vlgmr.msra.gmra.mrb[2].mxu1 %v32826_v33  ;;  %29072 = vmatprep.subr.bf16.mxu0 %v29782_v34 }
 0x5d5   :  { %28639 = vmatpush3.bf16.msra.mxu1 %v28638_v50  ;;  %27053 = vmatprep.mubr.msk.f32.mxu1 %vm29783_vm8, %v29784_v6  ;;  %v23136_v50 = vsub.f32 %v33029_v45, %v23135_v46 }
 0x5d6   :  { %28640 = vmatprep.subr.bf16.mxu1 %v29782_v34 }
 0x5d7   :  { %29074 = vmatpush3.bf16.msra.mxu0 %v29073_v5 }
 0x5d8   :  { %29075 = vmatprep.subr.bf16.mxu0 %v29782_v34 }
 0x5d9   :  { %28642 = vmatpush3.bf16.msra.mxu1 %v28641_v19 }
 0x5da   :  { %27846 = vmatmul.mubr.f32.vlgmr.msra.gmra.mrb[4].mxu0 %v32840_v42  ;;  %28643 = vmatprep.subr.bf16.mxu1 %v29782_v34  ;;  %v17124_v42 = vand.u32 4294901760, %v24117_v25 }
 0x5db   :  { %29077 = vmatpush3.bf16.msra.mxu0 %v32852_v61  ;;  %27856 = vmatprep.mubr.msk.f32.mxu0 %vm29783_vm8, %v29784_v6 }
 0x5dc   :  { %27054 = vmatmul.mubr.f32.vlgmr.msra.gmra.mrb[2].mxu1 %v32855_v52  ;;  %29078 = vmatprep.subr.bf16.mxu0 %v29782_v34  ;;  %v24119_v52 = vld [vmem:[%s33416_s3 + $0x50] sm:$0xff]  ;;  %v33018_v10 = vsub.f32 %v24117_v25, %v17124_v42  ;;  %v33065_v53 = vpack.c.bf16 %v17127_v39, %v17124_v42  ;;  %v23137_v25 = vand.u32 4294901760, %v23136_v50  ;;  %v29106_v42 = vpack.c.bf16 %v33013_v22, %v33011_v7 }
 0x5dd   :  { %28645 = vmatpush3.bf16.msra.mxu1 %v32867_v0  ;;  %27064 = vmatprep.mubr.msk.f32.mxu1 %vm29783_vm8, %v29784_v6  ;;  %v17130_v2 = vand.u32 4294901760, %v24119_v52  ;;  %v23529_v22 = vrot.slane %v31775_v30, 7  ;;  %v29121_v30 = vpack.c.bf16 %v23142_v56, %v23135_v46 }
 0x5de   :  { %28646 = vmatprep.subr.bf16.mxu1 %v29782_v34  ;;  %v17205_v43 = vand.u32 4294901760, %v33018_v10  ;;  %v28674_v39 = vpack.c.bf16 %v33020_v40, %v33018_v10 }
 0x5df   :  { %29080 = vmatpush3.bf16.msra.mxu0 %v32881_v51  ;;  %v33093_v5 = vpack.c.bf16 %v17133_v27, %v17130_v2  ;;  %v23536_v27 = vand.u32 4294901760, %v24170_v49 }
 0x5e0   :  { %29081 = vmatprep.subr.bf16.mxu0 %v29782_v34 }
 0x5e1   :  { %28648 = vmatpush3.bf16.msra.mxu1 %v32895_v4 }
 0x5e2   :  { %27857 = vmatmul.mubr.f32.vlgmr.msra.gmra.mrb[4].mxu0 %v22617_v20  ;;  %28649 = vmatprep.subr.bf16.mxu1 %v29782_v34  ;;  %v33016_v20 = vand.u32 4294901760, %v23037_v59 }
 0x5e3   :  { %29083 = vmatpush3.bf16.msra.mxu0 %v29082_v31  ;;  %27867 = vmatprep.mubr.msk.f32.mxu0 %vm29783_vm8, %v29784_v6 }
 0x5e4   :  { %27065 = vmatmul.mubr.f32.vlgmr.msra.gmra.mrb[2].mxu1 %v16701_v47  ;;  %29084 = vmatprep.subr.bf16.mxu0 %v29782_v34  ;;  %v33024_v47 = vand.u32 4294901760, %v17121_v26  ;;  %v33038_v55 = vsub.f32 %v23037_v59, %v33016_v20  ;;  %v29109_v59 = vpack.c.bf16 %v33031_v62, %v33029_v45  ;;  %v24172_v45 = vld [vmem:[%s33416_s3 + $0x1f8] sm:$0xff] }
 0x5e5   :  { %28651 = vmatpush3.bf16.msra.mxu1 %v28650_v57  ;;  %27075 = vmatprep.mubr.msk.f32.mxu1 %vm29783_vm8, %v29784_v6  ;;  %v23542_v58 = vand.u32 4294901760, %v24172_v45 }
 0x5e6   :  { %28652 = vmatprep.subr.bf16.mxu1 %v29782_v34  ;;  %v33053_v60 = vsub.f32 %v17121_v26, %v33024_v47  ;;  %v23110_v18 = vand.u32 4294901760, %v33038_v55  ;;  %v24169_v26 = vld [vmem:[%s33416_s3 + $0x1e0] sm:$0xff] }
 0x5e7   :  { %29086 = vmatpush3.bf16.msra.mxu0 %v29085_v12  ;;  %v23533_v40 = vand.u32 4294901760, %v24169_v26 }
 0x5e8   :  { %29087 = vmatprep.subr.bf16.mxu0 %v29782_v34  ;;  %v23111_v19 = vsub.f32 %v33038_v55, %v23110_v18 }
 0x5e9   :  { %28654 = vmatpush3.bf16.msra.mxu1 %v28653_v21 }
 0x5ea   :  { %27868 = vmatmul.mubr.f32.vlgmr.msra.gmra.mrb[4].mxu0 %v32818_v16  ;;  %28655 = vmatprep.subr.bf16.mxu1 %v29782_v34  ;;  %v23112_v41 = vand.u32 4294901760, %v23111_v19 }
 0x5eb   :  { %29089 = vmatpush3.bf16.msra.mxu0 %v32852_v61  ;;  %27878 = vmatprep.mubr.msk.f32.mxu0 %vm29783_vm8, %v29784_v6  ;;  %v33043_v61 = vsub.f32 %v24119_v52, %v17130_v2  ;;  %v24122_v2 = vld [vmem:[%s33416_s3 + $0x68] sm:$0xff] }
 0x5ec   :  { %27076 = vmatmul.mubr.f32.vlgmr.msra.gmra.mrb[2].mxu1 %v32826_v33  ;;  %29090 = vmatprep.subr.bf16.mxu0 %v29782_v34  ;;  %v17620_v48 = vand.u32 4294901760, %v24122_v2 }
 0x5ed   :  { %28657 = vmatpush3.bf16.msra.mxu1 %v32867_v0  ;;  %27086 = vmatprep.mubr.msk.f32.mxu1 %vm29783_vm8, %v29784_v6  ;;  %v23122_v0 = vsub.f32 %v33011_v7, %v23121_v1  ;;  %v17219_v3 = vand.u32 4294901760, %v33043_v61  ;;  %v28677_v52 = vpack.c.bf16 %v33045_v15, %v33043_v61  ;;  %v28686_v7 = vpack.c.bf16 %v17212_v13, %v17205_v43 }
 0x5ee   :  { %28658 = vmatprep.subr.bf16.mxu1 %v29782_v34  ;;  %v17617_v1 = vand.u32 4294901760, %v24121_v23  ;;  %v33209_v13 = vsub.f32 %v24169_v26, %v23533_v40 }
 0x5ef   :  { %29092 = vmatpush3.bf16.msra.mxu0 %v32881_v51  ;;  %v17206_v51 = vsub.f32 %v33018_v10, %v17205_v43  ;;  %v23123_v28 = vand.u32 4294901760, %v23122_v0  ;;  %v17220_v29 = vsub.f32 %v33043_v61, %v17219_v3  ;;  %v17613_v10 = vrot.slane %v31109_v11, 3  ;;  %v24171_v11 = vld [vmem:[%s33416_s3 + $0x1f0] sm:$0xff]  ;;  %v24124_v61 = vld [vmem:[%s33416_s3 + $0x78] sm:$0xff] }
 0x5f0   :  { %29093 = vmatprep.subr.bf16.mxu0 %v29782_v34  ;;  %v24123_v43 = vld [vmem:[%s33416_s3 + $0x70] sm:$0xff]  ;;  %v23539_v0 = vand.u32 4294901760, %v24171_v11  ;;  %v17626_v24 = vand.u32 4294901760, %v24124_v61 }
 0x5f1   :  { %28660 = vmatpush3.bf16.msra.mxu1 %v32895_v4  ;;  %v17194_v4 = vand.u32 4294901760, %v33053_v60  ;;  %v17207_v31 = vand.u32 4294901760, %v17206_v51  ;;  %v29100_v54 = vpack.c.bf16 %v23130_v36, %v23123_v28  ;;  %v17221_v32 = vand.u32 4294901760, %v17220_v29 }
 0x5f2   :  { %27879 = vmatmul.mubr.f32.vlgmr.msra.gmra.mrb[4].mxu0 %v32818_v16  ;;  %28661 = vmatprep.subr.bf16.mxu1 %v29782_v34  ;;  %v23143_v16 = vsub.f32 %v33031_v62, %v23142_v56  ;;  %v28689_v62 = vpack.c.bf16 %v17226_v37, %v17219_v3  ;;  %v33216_v56 = vsub.f32 %v24121_v23, %v17617_v1  ;;  %v17623_v51 = vand.u32 4294901760, %v24123_v43 }
 0x5f3   :  { %29095 = vmatpush3.bf16.msra.mxu0 %v33050_v63  ;;  %27889 = vmatprep.mubr.msk.f32.mxu0 %vm29783_vm8, %v29784_v6  ;;  %v17195_v57 = vsub.f32 %v33053_v60, %v17194_v4  ;;  %v28668_v12 = vpack.c.bf16 %v17214_v14, %v17207_v31  ;;  %v23614_v28 = vand.u32 4294901760, %v33209_v13  ;;  %v33248_v14 = vpack.c.bf16 %v23536_v27, %v23533_v40 }
 0x5f4   :  { %27087 = vmatmul.mubr.f32.vlgmr.msra.gmra.mrb[2].mxu1 %v32826_v33  ;;  %29096 = vmatprep.subr.bf16.mxu0 %v29782_v34  ;;  %v17227_v33 = vsub.f32 %v33045_v15, %v17226_v37  ;;  %v23144_v44 = vand.u32 4294901760, %v23143_v16  ;;  %v17614_v15 = vsel %vm4133_vm10, %v17613_v10, 0  ;;  %v33227_v37 = vsub.f32 %v24171_v11, %v23539_v0 }
 0x5f5   :  { %28663 = vmatpush3.bf16.msra.mxu1 %v33065_v53  ;;  %27097 = vmatprep.mubr.msk.f32.mxu1 %vm29783_vm8, %v29784_v6  ;;  %v17196_v35 = vand.u32 4294901760, %v17195_v57  ;;  %v33222_v3 = vand.u32 4294901760, %v17614_v15  ;;  %v33243_v16 = vsub.f32 %v24124_v61, %v17626_v24  ;;  %v17698_v19 = vand.u32 4294901760, %v33216_v56 }
 0x5f6   :  { %28664 = vmatprep.subr.bf16.mxu1 %v29782_v34  ;;  %v17228_v8 = vand.u32 4294901760, %v17227_v33  ;;  %v29103_v9 = vpack.c.bf16 %v23144_v44, %v23137_v25  ;;  %v23628_v57 = vand.u32 4294901760, %v33227_v37  ;;  %v33263_v25 = vpack.c.bf16 %v17620_v48, %v17617_v1 }
 0x5f7   :  { %29098 = vmatpush3.bf16.msra.mxu0 %v33079_v17  ;;  %v33251_v29 = vsub.f32 %v17614_v15, %v33222_v3 }
 0x5f8   :  { %29099 = vmatprep.subr.bf16.mxu0 %v29782_v34  ;;  %v28671_v21 = vpack.c.bf16 %v17228_v8, %v17221_v32  ;;  %v17719_v32 = vand.u32 4294901760, %v33243_v16  ;;  %v33277_v8 = vpack.c.bf16 %v23542_v58, %v23539_v0 }
 0x5f9   :  { %28666 = vmatpush3.bf16.msra.mxu1 %v33093_v5 }
 0x5fa   :  { %27890 = vmatmul.mubr.f32.vlgmr.msra.gmra.mrb[4].mxu0 %v23112_v41  ;;  %28667 = vmatprep.subr.bf16.mxu1 %v29782_v34 }
 0x5fb   :  { %29101 = vmatpush3.bf16.msra.mxu0 %v29100_v54  ;;  %27900 = vmatprep.mubr.msk.f32.mxu0 %vm29783_vm8, %v29784_v6 }
 0x5fc   :  { %27098 = vmatmul.mubr.f32.vlgmr.msra.gmra.mrb[2].mxu1 %v17196_v35  ;;  %29102 = vmatprep.subr.bf16.mxu0 %v29782_v34 }
 0x5fd   :  { %28669 = vmatpush3.bf16.msra.mxu1 %v28668_v12  ;;  %27108 = vmatprep.mubr.msk.f32.mxu1 %vm29783_vm8, %v29784_v6 }
 0x5fe   :  { %28670 = vmatprep.subr.bf16.mxu1 %v29782_v34 }
 0x5ff   :  { %29104 = vmatpush3.bf16.msra.mxu0 %v29103_v9 }
 0x600   :  { %29105 = vmatprep.subr.bf16.mxu0 %v29782_v34 }
 0x601   :  { %28672 = vmatpush3.bf16.msra.mxu1 %v28671_v21  ;;  %v23629_v21 = vsub.f32 %v33227_v37, %v23628_v57 }
 0x602   :  { %27901 = vmatmul.mubr.f32.vlgmr.msra.gmra.mrb[4].mxu0 %v33016_v20  ;;  %28673 = vmatprep.subr.bf16.mxu1 %v29782_v34 }
 0x603   :  { %29107 = vmatpush3.bf16.msra.mxu0 %v29106_v42  ;;  %27911 = vmatprep.mubr.msk.f32.mxu0 %vm29783_vm8, %v29784_v6  ;;  %v33291_v42 = vpack.c.bf16 %v17626_v24, %v17623_v51 }
 0x604   :  { %27109 = vmatmul.mubr.f32.vlgmr.msra.gmra.mrb[2].mxu1 %v33024_v47  ;;  %29108 = vmatprep.subr.bf16.mxu0 %v29782_v34 }
 0x605   :  { %28675 = vmatpush3.bf16.msra.mxu1 %v28674_v39  ;;  %27119 = vmatprep.mubr.msk.f32.mxu1 %vm29783_vm8, %v29784_v6 }
 0x606   :  { %28676 = vmatprep.subr.bf16.mxu1 %v29782_v34 }
 0x607   :  { %29110 = vmatpush3.bf16.msra.mxu0 %v29109_v59 }
 0x608   :  { %29111 = vmatprep.subr.bf16.mxu0 %v29782_v34 }
 0x609   :  { %28678 = vmatpush3.bf16.msra.mxu1 %v28677_v52 }
 0x60a   :  { %27912 = vmatmul.mubr.f32.vlgmr.msra.gmra.mrb[4].mxu0 %v33038_v55  ;;  %28679 = vmatprep.subr.bf16.mxu1 %v29782_v34  ;;  %v23530_v55 = vsel %vm4133_vm10, %v23529_v22, 0 }
 0x60b   :  { %29113 = vmatpush3.bf16.msra.mxu0 %v33050_v63  ;;  %27922 = vmatprep.mubr.msk.f32.mxu0 %vm29783_vm8, %v29784_v6  ;;  %v33214_v46 = vand.u32 4294901760, %v23530_v55 }
 0x60c   :  { %27120 = vmatmul.mubr.f32.vlgmr.msra.gmra.mrb[2].mxu1 %v33053_v60  ;;  %29114 = vmatprep.subr.bf16.mxu0 %v29782_v34  ;;  %v33211_v60 = vsub.f32 %v24170_v49, %v23536_v27 }
 0x60d   :  { %28681 = vmatpush3.bf16.msra.mxu1 %v33065_v53  ;;  %27130 = vmatprep.mubr.msk.f32.mxu1 %vm29783_vm8, %v29784_v6  ;;  %v33236_v50 = vsub.f32 %v23530_v55, %v33214_v46 }
 0x60e   :  { %28682 = vmatprep.subr.bf16.mxu1 %v29782_v34  ;;  %v23621_v36 = vand.u32 4294901760, %v33211_v60 }
 0x60f   :  { %29116 = vmatpush3.bf16.msra.mxu0 %v33079_v17  ;;  %v23603_v44 = vand.u32 4294901760, %v33236_v50 }
 0x610   :  { %29117 = vmatprep.subr.bf16.mxu0 %v29782_v34  ;;  %v23622_v33 = vsub.f32 %v33211_v60, %v23621_v36  ;;  %v29154_v55 = vpack.c.bf16 %v23621_v36, %v23614_v28 }
 0x611   :  { %28684 = vmatpush3.bf16.msra.mxu1 %v33093_v5  ;;  %v23604_v39 = vsub.f32 %v33236_v50, %v23603_v44 }
 0x612   :  { %27923 = vmatmul.mubr.f32.vlgmr.msra.gmra.mrb[4].mxu0 %v23110_v18  ;;  %28685 = vmatprep.subr.bf16.mxu1 %v29782_v34  ;;  %v33218_v18 = vsub.f32 %v24122_v2, %v17620_v48  ;;  %v23623_v9 = vand.u32 4294901760, %v23622_v33 }
 0x613   :  { %29119 = vmatpush3.bf16.msra.mxu0 %v29118_v38  ;;  %27933 = vmatprep.mubr.msk.f32.mxu0 %vm29783_vm8, %v29784_v6  ;;  %v23605_v23 = vand.u32 4294901760, %v23604_v39 }
 0x614   :  { %27131 = vmatmul.mubr.f32.vlgmr.msra.gmra.mrb[2].mxu1 %v17194_v4  ;;  %29120 = vmatprep.subr.bf16.mxu0 %v29782_v34  ;;  %v33229_v4 = vsub.f32 %v24172_v45, %v23542_v58  ;;  %v17705_v31 = vand.u32 4294901760, %v33218_v18  ;;  %v29142_v45 = vpack.c.bf16 %v33211_v60, %v33209_v13 }
 0x615   :  { %28687 = vmatpush3.bf16.msra.mxu1 %v28686_v7  ;;  %27141 = vmatprep.mubr.msk.f32.mxu1 %vm29783_vm8, %v29784_v6  ;;  %v23630_v7 = vand.u32 4294901760, %v23629_v21 }
 0x616   :  { %28688 = vmatprep.subr.bf16.mxu1 %v29782_v34  ;;  %v23635_v54 = vand.u32 4294901760, %v33229_v4  ;;  %v17706_v41 = vsub.f32 %v33218_v18, %v17705_v31  ;;  %v29145_v1 = vpack.c.bf16 %v33229_v4, %v33227_v37 }
 0x617   :  { %29122 = vmatpush3.bf16.msra.mxu0 %v29121_v30 }
 0x618   :  { %29123 = vmatprep.subr.bf16.mxu0 %v29782_v34  ;;  %v17707_v52 = vand.u32 4294901760, %v17706_v41  ;;  %v29157_v61 = vpack.c.bf16 %v23635_v54, %v23628_v57 }
 0x619   :  { %28690 = vmatpush3.bf16.msra.mxu1 %v28689_v62  ;;  %v28710_v62 = vpack.c.bf16 %v33218_v18, %v33216_v56 }
 0x61a   :  { %27934 = vmatmul.mubr.f32.vlgmr.msra.gmra.mrb[4].mxu0 %v33016_v20  ;;  %28691 = vmatprep.subr.bf16.mxu1 %v29782_v34 }
 0x61b   :  { %29125 = vmatpush3.bf16.msra.mxu0 %v33050_v63  ;;  %27944 = vmatprep.mubr.msk.f32.mxu0 %vm29783_vm8, %v29784_v6  ;;  %v33241_v63 = vsub.f32 %v24123_v43, %v17623_v51  ;;  %v28722_v43 = vpack.c.bf16 %v17705_v31, %v17698_v19 }
 0x61c   :  { %27142 = vmatmul.mubr.f32.vlgmr.msra.gmra.mrb[2].mxu1 %v33024_v47  ;;  %29126 = vmatprep.subr.bf16.mxu0 %v29782_v34 }
 0x61d   :  { %28693 = vmatpush3.bf16.msra.mxu1 %v33065_v53  ;;  %27152 = vmatprep.mubr.msk.f32.mxu1 %vm29783_vm8, %v29784_v6  ;;  %v23615_v53 = vsub.f32 %v33209_v13, %v23614_v28  ;;  %v17712_v12 = vand.u32 4294901760, %v33241_v63  ;;  %v28713_v48 = vpack.c.bf16 %v33243_v16, %v33241_v63  ;;  %v4128_v13 = vld [vmem:[%s33417_s4] sm:$0x1] }
 0x61e   :  { %28694 = vmatprep.subr.bf16.mxu1 %v29782_v34 }
 0x61f   :  { %29128 = vmatpush3.bf16.msra.mxu0 %v33079_v17  ;;  %v17699_v17 = vsub.f32 %v33216_v56, %v17698_v19  ;;  %v23616_v35 = vand.u32 4294901760, %v23615_v53  ;;  %v17713_v38 = vsub.f32 %v33241_v63, %v17712_v12  ;;  %v28725_v15 = vpack.c.bf16 %v17719_v32, %v17712_v12  ;;  %v16129_v56 = vld [vmem:[%s33417_s4] sm:$0x1] }
 0x620   :  { %29129 = vmatprep.subr.bf16.mxu0 %v29782_v34 }
 0x621   :  { %28696 = vmatpush3.bf16.msra.mxu1 %v33093_v5  ;;  %v17687_v5 = vand.u32 4294901760, %v33251_v29  ;;  %v17700_v59 = vand.u32 4294901760, %v17699_v17  ;;  %v29136_v49 = vpack.c.bf16 %v23623_v9, %v23616_v35  ;;  %v17714_v10 = vand.u32 4294901760, %v17713_v38 }
 0x622   :  { %27945 = vmatmul.mubr.f32.vlgmr.msra.gmra.mrb[4].mxu0 %v33016_v20  ;;  %28697 = vmatprep.subr.bf16.mxu1 %v29782_v34  ;;  %v23636_v20 = vsub.f32 %v33229_v4, %v23635_v54 }
 0x623   :  { %29131 = vmatpush3.bf16.msra.mxu0 %v33248_v14  ;;  %27955 = vmatprep.mubr.msk.f32.mxu0 %vm29783_vm8, %v29784_v6  ;;  %v17688_v26 = vsub.f32 %v33251_v29, %v17687_v5  ;;  %v28704_v2 = vpack.c.bf16 %v17707_v52, %v17700_v59 }
 0x624   :  { %27153 = vmatmul.mubr.f32.vlgmr.msra.gmra.mrb[2].mxu1 %v33024_v47  ;;  %29132 = vmatprep.subr.bf16.mxu0 %v29782_v34  ;;  %v17720_v47 = vsub.f32 %v33243_v16, %v17719_v32  ;;  %v23637_v22 = vand.u32 4294901760, %v23636_v20 }
 0x625   :  { %28699 = vmatpush3.bf16.msra.mxu1 %v33263_v25  ;;  %27163 = vmatprep.mubr.msk.f32.mxu1 %vm29783_vm8, %v29784_v6  ;;  %v17689_v40 = vand.u32 4294901760, %v17688_v26 }
 0x626   :  { %28700 = vmatprep.subr.bf16.mxu1 %v29782_v34  ;;  %v17721_v30 = vand.u32 4294901760, %v17720_v47  ;;  %v29139_v27 = vpack.c.bf16 %v23637_v22, %v23630_v7 }
 0x627   :  { %29134 = vmatpush3.bf16.msra.mxu0 %v33277_v8 }
 0x628   :  { %29135 = vmatprep.subr.bf16.mxu0 %v29782_v34  ;;  %v28707_v11 = vpack.c.bf16 %v17721_v30, %v17714_v10 }
 0x629   :  { %28702 = vmatpush3.bf16.msra.mxu1 %v33291_v42 }
 0x62a   :  { %27956 = vmatmul.mubr.f32.vlgmr.msra.gmra.mrb[4].mxu0 %v23605_v23  ;;  %28703 = vmatprep.subr.bf16.mxu1 %v29782_v34 }
 0x62b   :  { %29137 = vmatpush3.bf16.msra.mxu0 %v29136_v49  ;;  %27966 = vmatprep.mubr.msk.f32.mxu0 %vm29783_vm8, %v29784_v6 }
 0x62c   :  { %27164 = vmatmul.mubr.f32.vlgmr.msra.gmra.mrb[2].mxu1 %v17689_v40  ;;  %29138 = vmatprep.subr.bf16.mxu0 %v29782_v34 }
 0x62d   :  { %28705 = vmatpush3.bf16.msra.mxu1 %v28704_v2  ;;  %27174 = vmatprep.mubr.msk.f32.mxu1 %vm29783_vm8, %v29784_v6 }
 0x62e   :  { %28706 = vmatprep.subr.bf16.mxu1 %v29782_v34 }
 0x62f   :  { %29140 = vmatpush3.bf16.msra.mxu0 %v29139_v27 }
 0x630   :  { %29141 = vmatprep.subr.bf16.mxu0 %v29782_v34 }
 0x631   :  { %28708 = vmatpush3.bf16.msra.mxu1 %v28707_v11 }
 0x632   :  { %27967 = vmatmul.mubr.f32.vlgmr.msra.gmra.mrb[4].mxu0 %v33214_v46  ;;  %28709 = vmatprep.subr.bf16.mxu1 %v29782_v34 }
 0x633   :  { %29143 = vmatpush3.bf16.msra.mxu0 %v29142_v45  ;;  %27977 = vmatprep.mubr.msk.f32.mxu0 %vm29783_vm8, %v29784_v6 }
 0x634   :  { %27175 = vmatmul.mubr.f32.vlgmr.msra.gmra.mrb[2].mxu1 %v33222_v3  ;;  %29144 = vmatprep.subr.bf16.mxu0 %v29782_v34 }
 0x635   :  { %28711 = vmatpush3.bf16.msra.mxu1 %v28710_v62  ;;  %27185 = vmatprep.mubr.msk.f32.mxu1 %vm29783_vm8, %v29784_v6 }
 0x636   :  { %28712 = vmatprep.subr.bf16.mxu1 %v29782_v34 }
 0x637   :  { %29146 = vmatpush3.bf16.msra.mxu0 %v29145_v1 }
 0x638   :  { %29147 = vmatprep.subr.bf16.mxu0 %v29782_v34 }
 0x639   :  { %28714 = vmatpush3.bf16.msra.mxu1 %v28713_v48 }
 0x63a   :  { %27978 = vmatmul.mubr.f32.vlgmr.msra.gmra.mrb[4].mxu0 %v33236_v50  ;;  %28715 = vmatprep.subr.bf16.mxu1 %v29782_v34 }
 0x63b   :  { %29149 = vmatpush3.bf16.msra.mxu0 %v33248_v14  ;;  %27988 = vmatprep.mubr.msk.f32.mxu0 %vm29783_vm8, %v29784_v6 }
 0x63c   :  { %27186 = vmatmul.mubr.f32.vlgmr.msra.gmra.mrb[2].mxu1 %v33251_v29  ;;  %29150 = vmatprep.subr.bf16.mxu0 %v29782_v34 }
 0x63d   :  { %28717 = vmatpush3.bf16.msra.mxu1 %v33263_v25  ;;  %27196 = vmatprep.mubr.msk.f32.mxu1 %vm29783_vm8, %v29784_v6 }
 0x63e   :  { %28718 = vmatprep.subr.bf16.mxu1 %v29782_v34 }
 0x63f   :  { %29152 = vmatpush3.bf16.msra.mxu0 %v33277_v8 }
 0x640   :  { %29153 = vmatprep.subr.bf16.mxu0 %v29782_v34 }
 0x641   :  { %28720 = vmatpush3.bf16.msra.mxu1 %v33291_v42 }
 0x642   :  { %27989 = vmatmul.mubr.f32.vlgmr.msra.gmra.mrb[4].mxu0 %v23603_v44  ;;  %28721 = vmatprep.subr.bf16.mxu1 %v29782_v34 }
 0x643   :  { %29155 = vmatpush3.bf16.msra.mxu0 %v29154_v55  ;;  %27999 = vmatprep.mubr.msk.f32.mxu0 %vm29783_vm8, %v29784_v6 }
 0x644   :  { %27197 = vmatmul.mubr.f32.vlgmr.msra.gmra.mrb[2].mxu1 %v17687_v5  ;;  %29156 = vmatprep.subr.bf16.mxu0 %v29782_v34 }
 0x645   :  { %28723 = vmatpush3.bf16.msra.mxu1 %v28722_v43  ;;  %27207 = vmatprep.mubr.msk.f32.mxu1 %vm29783_vm8, %v29784_v6 }
 0x646   :  { %28724 = vmatprep.subr.bf16.mxu1 %v29782_v34 }
 0x647   :  { %29158 = vmatpush3.bf16.msra.mxu0 %v29157_v61 }
 0x648   :  { %29159 = vmatprep.subr.bf16.mxu0 %v29782_v34 }
 0x649   :  { %28726 = vmatpush3.bf16.msra.mxu1 %v28725_v15 }
 0x64a   :  { %28000 = vmatmul.mubr.f32.vlgmr.msra.gmra.mrb[4].mxu0 %v33214_v46  ;;  %28727 = vmatprep.subr.bf16.mxu1 %v29782_v34 }
 0x64b   :  { %29161 = vmatpush3.bf16.msra.mxu0 %v33248_v14  ;;  %28010 = vmatprep.mubr.msk.f32.mxu0 %vm29783_vm8, %v29784_v6 }
 0x64c   :  { %27208 = vmatmul.mubr.f32.vlgmr.msra.gmra.mrb[2].mxu1 %v33222_v3  ;;  %29162 = vmatprep.subr.bf16.mxu0 %v29782_v34 }
 0x64d   :  { %28729 = vmatpush3.bf16.msra.mxu1 %v33263_v25  ;;  %27218 = vmatprep.mubr.msk.f32.mxu1 %vm29783_vm8, %v29784_v6 }
 0x64e   :  { %28730 = vmatprep.subr.bf16.mxu1 %v29782_v34 }
 0x64f   :  { %29164 = vmatpush3.bf16.msra.mxu0 %v33277_v8 }
 0x651   :  { %28732 = vmatpush3.bf16.msra.mxu1 %v33291_v42 }
 0x652   :  { %28011 = vmatmul.mubr.f32.vlgmr.msra.gmra.mrb[4].mxu0 %v33214_v46 }
 0x654   :  { %27219 = vmatmul.mubr.f32.vlgmr.msra.gmra.mrb[2].mxu1 %v33222_v3 }
 0x667   :  { %v12028_v60 = vpop.f32.mrb[0].mxu1 }
 0x668   :  { %v29165_v0 = vadd.f32 %v12028_v60, %v4128_v13  ;;  %v26716_v58 = vpop.f32.mrb[1].mxu1 }
 0x66a   :  { %29754 = vtanh.f32 %v29165_v0 }
 0x674   :  { %v29755_v6 = vpop.eup %29754 }
 0x675   :  { %12035 = vst.msk [vmem:[#allocation2] sm:$0x1] %vm12034_vm14, %v29755_v6 }
 0x725   :  { %v24013_v34 = vpop.f32.mrb[4].mxu0 }
 0x726   :  { %v28012_v18 = vpop.f32.mrb[5].mxu0 }
 0x727   :  { %v18097_v46 = vpop.f32.mrb[2].mxu1 }
 0x728   :  { %v29166_v51 = vadd.f32 %v18097_v46, %v16129_v56  ;;  %v27220_v24 = vpop.f32.mrb[3].mxu1 }
 0x72a   :  { %v29167_v3 = vadd.f32 %v29166_v51, %v24013_v34 }
 0x72c   :  { %29756 = vtanh.f32 %v29167_v3 }
 0x736   :  { %v29757_v37 = vpop.eup %29756 }
 0x737   :  { %24019 = vst.msk [vmem:[#allocation2 + $0x1] sm:$0x1] %vm12034_vm14, %v29757_v37 }
 0x738   :  { %29769 = shalt.err (!%p29766_p4)
}
 0x739   :  { %s29770_s8 = scalar_lea.hbm %s33418_s5, 32 }
 0x73a   :  { %p29771_p5 = scmp.ne.s32.totalorder %s33418_s5, %s29770_s8  ;;  %p29774_p6 = scmp.lt.u32.totalorder %s29770_s8, %s33418_s5 }
 0x73c   :  { %p29776_p7 = pnand %p29774_p6, %p29771_p5 }
 0x73e   :  { %29779 = shalt.err (!%p29776_p7)
}
 0x73f   :  { %24029 = dma.vmem_to_hbm [thread:$0]  %s24027_s30, 32, %s33418_s5, [#allocation3]  }
 0x740   :  { %29780 = dma.done.wait [#allocation3], 32  }
 0x741   :  { %29781 = vsyncadd [#allocation3], 4294967264 }
 0x742   :  { %24033 = vsyncpa [#allocation3], 1 }

</bundles_post_ra>
